<compile_context>
chip_gen: v5e
topology: v5e:2x2
jax: 0.10.0
libtpu: 0.0.40
codegen_flags: <defaults>
</compile_context>

<pallas_src>
import functools

import jax
import jax.numpy as jnp
import numpy as np
from jax.experimental import pallas as pl
from jax.experimental.pallas import tpu as pltpu

_MIB = 1024 * 1024
# Conservative across generations: v7x has 64 MiB physical VMEM (v5e/v6e: 128).
_VMEM_LIMIT_BYTES = 48 * _MIB
_FUSED_BLOCK_BUDGET = 8 * _MIB    # fused: x in + out, double-buffered -> ~4x block
_PASS1_BLOCK_BUDGET = 10 * _MIB   # pass 1: only x double-buffered      -> ~2x block
_PASS2_BLOCK_BUDGET = 8 * _MIB    # pass 2: x in + out, double-buffered -> ~4x block


def _temporal_conv3(inp, w3, b):
    """Kernel-3 conv along the segment axis with zero padding 1 (f32).

    inp: (T, c_in), w3: (3, c_in, c_out) laid out (k, c_in, c_out), b: (1, c_out).
    """
    zero = jnp.zeros((1, inp.shape[1]), jnp.float32)
    prev = jnp.concatenate([zero, inp[:-1]], axis=0)     # inp[t-1]
    nxt = jnp.concatenate([inp[1:], zero], axis=0)       # inp[t+1]
    return (jnp.dot(prev, w3[0], preferred_element_type=jnp.float32)
            + jnp.dot(inp, w3[1], preferred_element_type=jnp.float32)
            + jnp.dot(nxt, w3[2], preferred_element_type=jnp.float32)
            + b)


def _se_gate(pooled, wr, br, we, be):
    """Temporal SE gate from the (T, C) pooled means (all f32)."""
    r = _temporal_conv3(pooled, wr, br)                  # (T, Cs)
    r = r * jax.nn.sigmoid(r)                            # MemoryEfficientSwish
    return jax.nn.sigmoid(_temporal_conv3(r, we, be))    # (T, C)


def fused_kernel(x_ref, wr_ref, br_ref, we_ref, be_ref, o_ref, *, inv_hw):
    """Single pass over one batch element: pool + gate + broadcast multiply.

    x_ref/o_ref: (1, T, C, HW); weights tiny/resident.  x is read from HBM
    exactly once (2x total HBM traffic vs 3x for the two-pass structure).
    """
    x = x_ref[0]                                                  # (T, C, HW)
    pooled = jnp.sum(x.astype(jnp.float32), axis=-1) * inv_hw     # (T, C) mean
    g = _se_gate(pooled, wr_ref[...], br_ref[...], we_ref[...], be_ref[...])
    o_ref[0] = x * g.astype(x.dtype)[:, :, None]


def pool_gate_kernel(x_ref, wr_ref, br_ref, we_ref, be_ref, g_ref, acc_ref,
                     *, inv_hw, hw, hw_tile, needs_mask):
    """Pass 1: tiled spatial mean + temporal-SE gate for one batch element.

    x_ref  : (1, T, C, hw_tile)  current spatial tile
    g_ref  : (1, T, C) f32       gate, written on the last spatial tile
    acc_ref: (T, C) f32 scratch  running spatial sum (resident per batch elem)
    """
    j = pl.program_id(1)

    @pl.when(j == 0)
    def _():
        acc_ref[...] = jnp.zeros_like(acc_ref)

    x = x_ref[0].astype(jnp.float32)                     # (T, C, hw_tile)
    if needs_mask:
        # hw_tile does not divide H*W: zero the padded lanes of the last tile.
        lane = jax.lax.broadcasted_iota(jnp.int32, (1, 1, hw_tile), 2)
        x = jnp.where(j * hw_tile + lane < hw, x, 0.0)
    acc_ref[...] += jnp.sum(x, axis=-1)

    @pl.when(j == pl.num_programs(1) - 1)
    def _():
        pooled = acc_ref[...] * inv_hw                   # (T, C) spatial mean
        g_ref[0] = _se_gate(pooled, wr_ref[...], br_ref[...],
                            we_ref[...], be_ref[...])


def apply_gate_kernel(x_ref, g_ref, o_ref):
    """Pass 2: out = gate (broadcast over the H*W lanes) * x, in input dtype."""
    g = g_ref[0].astype(x_ref.dtype)                     # (T, C)
    o_ref[0] = x_ref[0] * g[:, :, None]


def _pick_hw_tile(hw, bytes_per_lane, budget_bytes):
    """Pick a lane-dense spatial tile for (.., C, HW) blocks.

    bytes_per_lane = T * C * itemsize (bytes per unit of HW in a block).
    Returns (hw_tile, needs_mask): the tile is the full extent, or a multiple
    of 128 (unmasked lane-dense loads/stores).  needs_mask is True when the
    tile does not evenly divide HW (partial last block).
    """
    if hw * bytes_per_lane <= budget_bytes:
        return hw, False                                 # whole extent fits
    if hw % 128 == 0:
        n128 = hw // 128
        budget_m = budget_bytes // (128 * bytes_per_lane)
        for m in range(min(n128, budget_m), 0, -1):      # largest fitting divisor
            if n128 % m == 0:
                return 128 * m, False
        return 128, False                                # smallest aligned tile
    # HW not a multiple of 128 and too large for one block: 128-multiple tile
    # with a masked partial last block.
    tile = max((budget_bytes // bytes_per_lane) // 128 * 128, 128)
    if tile >= hw:
        return hw, False
    return tile, True


def _weight_specs(c, cs, grid_ndim):
    """Constant-index-map BlockSpecs so conv weights/biases stay resident."""
    if grid_ndim == 1:
        c3 = lambda b: (0, 0, 0)
        c2 = lambda b: (0, 0)
    else:
        c3 = lambda b, j: (0, 0, 0)
        c2 = lambda b, j: (0, 0)
    return [pl.BlockSpec((3, c, cs), c3),
            pl.BlockSpec((1, cs), c2),
            pl.BlockSpec((3, cs, c), c3),
            pl.BlockSpec((1, c), c2)]


def addse_block_pallas(x_nchw, wr_pt, br, we_pt, be, n_segment, *,
                       force_two_pass=False,
                       fused_budget_bytes=_FUSED_BLOCK_BUDGET,
                       pass1_budget_bytes=_PASS1_BLOCK_BUDGET,
                       pass2_budget_bytes=_PASS2_BLOCK_BUDGET):
    nt, c, h, w = x_nchw.shape
    assert nt % n_segment == 0
    nb = nt // n_segment
    t = n_segment
    cs = wr_pt.shape[0]
    hw = h * w
    itemsize = x_nchw.dtype.itemsize

    # Native layout: pure reshape (no HBM transpose); H*W on the lane axis.
    x4 = x_nchw.reshape(nb, t, c, hw)

    # PyTorch Conv3d weight (C_out, C_in, 3, 1, 1) -> (k, C_in, C_out).
    wr = jnp.transpose(wr_pt[..., 0, 0], (2, 1, 0)).astype(jnp.float32)  # (3, c, cs)
    we = jnp.transpose(we_pt[..., 0, 0], (2, 1, 0)).astype(jnp.float32)  # (3, cs, c)
    brr = br.reshape(1, cs).astype(jnp.float32)
    ber = be.reshape(1, c).astype(jnp.float32)

    # ---- Fused single-pass path: one HBM read + one write of x. ----
    elem_bytes = t * c * hw * itemsize
    if not force_two_pass and elem_bytes <= fused_budget_bytes:
        x_spec = pl.BlockSpec((1, t, c, hw), lambda b: (b, 0, 0, 0))
        out = pl.pallas_call(
            functools.partial(fused_kernel, inv_hw=1.0 / hw),
            out_shape=jax.ShapeDtypeStruct((nb, t, c, hw), x_nchw.dtype),
            grid=(nb,),
            in_specs=[x_spec] + _weight_specs(c, cs, 1),
            out_specs=x_spec,
            compiler_params=pltpu.CompilerParams(
                dimension_semantics=("parallel",),
                vmem_limit_bytes=_VMEM_LIMIT_BYTES),
        )(x4, wr, brr, we, ber)
        return out.reshape(nt, c, h, w)

    # ---- Two-pass fallback with decoupled tile sizes. ----
    bytes_per_lane = t * c * itemsize
    hw_tile1, mask1 = _pick_hw_tile(hw, bytes_per_lane, pass1_budget_bytes)
    hw_tile2, _ = _pick_hw_tile(hw, bytes_per_lane, pass2_budget_bytes)
    n_hw1 = pl.cdiv(hw, hw_tile1)
    n_hw2 = pl.cdiv(hw, hw_tile2)

    gate_spec = pl.BlockSpec((1, t, c), lambda b, j: (b, 0, 0))

    # Pass 1: spatial pooling (tiled, f32 accumulation) + tiny temporal-SE gate.
    gate = pl.pallas_call(
        functools.partial(pool_gate_kernel, inv_hw=1.0 / hw,
                          hw=hw, hw_tile=hw_tile1, needs_mask=mask1),
        out_shape=jax.ShapeDtypeStruct((nb, t, c), jnp.float32),
        grid=(nb, n_hw1),
        in_specs=[pl.BlockSpec((1, t, c, hw_tile1), lambda b, j: (b, 0, 0, j))]
        + _weight_specs(c, cs, 2),
        out_specs=gate_spec,
        scratch_shapes=[pltpu.VMEM((t, c), jnp.float32)],
        compiler_params=pltpu.CompilerParams(
            # hw axis MUST stay "arbitrary": the gate/acc rely on output-block
            # residency across the spatial tiles of one batch element.
            dimension_semantics=("parallel", "arbitrary"),
            vmem_limit_bytes=_VMEM_LIMIT_BYTES),
    )(x4, wr, brr, we, ber)

    # Pass 2: lane-dense tiled elementwise gating; both axes parallel (megacore).
    x_spec2 = pl.BlockSpec((1, t, c, hw_tile2), lambda b, j: (b, 0, 0, j))
    out = pl.pallas_call(
        apply_gate_kernel,
        out_shape=jax.ShapeDtypeStruct((nb, t, c, hw), x_nchw.dtype),
        grid=(nb, n_hw2),
        in_specs=[x_spec2, gate_spec],
        out_specs=x_spec2,
        compiler_params=pltpu.CompilerParams(
            dimension_semantics=("parallel", "parallel"),
            vmem_limit_bytes=_VMEM_LIMIT_BYTES),
    )(x4, gate)

    return out.reshape(nt, c, h, w)


def addse_block_ref(x_nchw, wr_pt, br, we_pt, be, n_segment):
    """Pure-JAX reference mirroring the PyTorch forward."""
    nt, c, h, w = x_nchw.shape
    nb = nt // n_segment
    p = jnp.mean(x_nchw.astype(jnp.float32), axis=(2, 3)).reshape(nb, n_segment, c)

    def tconv(inp, w_pt, b):          # inp (nb, T, cin); w_pt (cout, cin, 3, 1, 1)
        w3 = jnp.transpose(w_pt[..., 0, 0], (2, 1, 0))   # (3, cin, cout)
        pad = jnp.pad(inp, ((0, 0), (1, 1), (0, 0)))
        return (jnp.einsum('bti,io->bto', pad[:, :-2], w3[0])
                + jnp.einsum('bti,io->bto', pad[:, 1:-1], w3[1])
                + jnp.einsum('bti,io->bto', pad[:, 2:], w3[2]) + b)

    r = tconv(p, wr_pt, br)
    r = r * jax.nn.sigmoid(r)
    e = jax.nn.sigmoid(tconv(r, we_pt, be))
    scale = e.reshape(nt, c)[:, :, None, None]
    return x_nchw * scale.astype(x_nchw.dtype)


if __name__ == "__main__":
    key = jax.random.PRNGKey(0)
    n_batch, n_segment = 2, 4
    net_out_channels = 256                 # module default
    cs = net_out_channels // 16            # num_squeezed_channels = 16
    nt = n_batch * n_segment

    k1, k2, k3, k4 = jax.random.split(key, 4)

    # TODO(synk): `block` is an arbitrary external submodule passed to __init__;
    # it is treated as identity here (x = block(x) == x).

    # The original __init__ sets conv weights = 0 and biases = 1; small
    # deterministic random weights are used instead so the conv/matmul path is
    # actually exercised (still deterministic via PRNGKey(0)).
    wr_pt = 0.1 * jax.random.normal(
        k2, (cs, net_out_channels, 3, 1, 1), jnp.float32)
    br = jnp.ones((cs,), jnp.float32)
    we_pt = 0.1 * jax.random.normal(
        k3, (net_out_channels, cs, 3, 1, 1), jnp.float32)
    be = jnp.ones((net_out_channels,), jnp.float32)

    # Case 1: 128-aligned H*W (16x16 = 256) -> fused single-pass path.
    x1 = jax.random.normal(k1, (nt, net_out_channels, 16, 16), jnp.float32)
    ref1 = addse_block_ref(x1, wr_pt, br, we_pt, be, n_segment)
    out = jax.block_until_ready(
        addse_block_pallas(x1, wr_pt, br, we_pt, be, n_segment))
    np.testing.assert_allclose(np.asarray(out), np.asarray(ref1),
                               rtol=1e-5, atol=1e-5)

    # Case 1b: same input, forced two-pass path with tiny block budgets so the
    # tiled spatial-sum accumulation (128-lane tiles, 2 tiles) is exercised.
    out = jax.block_until_ready(addse_block_pallas(
        x1, wr_pt, br, we_pt, be, n_segment, force_two_pass=True,
        pass1_budget_bytes=256 * 1024, pass2_budget_bytes=512 * 1024))
    np.testing.assert_allclose(np.asarray(out), np.asarray(ref1),
                               rtol=1e-5, atol=1e-5)

    # Case 2: non-128-aligned H*W (14x14 = 196): fused path uses a full-extent
    # lane block; the forced two-pass path exercises the masked partial tiles.
    x2 = jax.random.normal(k4, (nt, net_out_channels, 14, 14), jnp.float32)
    ref2 = addse_block_ref(x2, wr_pt, br, we_pt, be, n_segment)
    out = jax.block_until_ready(
        addse_block_pallas(x2, wr_pt, br, we_pt, be, n_segment))
    np.testing.assert_allclose(np.asarray(out), np.asarray(ref2),
                               rtol=1e-5, atol=1e-5)
    out = jax.block_until_ready(addse_block_pallas(
        x2, wr_pt, br, we_pt, be, n_segment, force_two_pass=True,
        pass1_budget_bytes=512 * 1024, pass2_budget_bytes=512 * 1024))
    np.testing.assert_allclose(np.asarray(out), np.asarray(ref2),
                               rtol=1e-5, atol=1e-5)

    print("KERNEL_OK")
</pallas_src>

<mosaic_0001>
module attributes {stable_mosaic.version = 11 : i64} {
  func.func @fused_kernel(%arg0: i32, %arg1: memref<1x4x256x256xf32, #tpu.memory_space<vmem>>, %arg2: memref<3x256x16xf32, #tpu.memory_space<vmem>>, %arg3: memref<1x16xf32, #tpu.memory_space<vmem>>, %arg4: memref<3x16x256xf32, #tpu.memory_space<vmem>>, %arg5: memref<1x256xf32, #tpu.memory_space<vmem>>, %arg6: memref<1x4x256x256xf32, #tpu.memory_space<vmem>>) attributes {dimension_semantics = [#tpu.dimension_semantics<parallel>], iteration_bounds = array<i64: 2>, scalar_prefetch = 0 : i64, scratch_operands = 0 : i64, tpu.core_type = #tpu.core_type<tc>, window_params = [{transform_indices = @transform_0, window_bounds = array<i64: 1, 4, 256, 256>}, {pipeline_mode = #tpu.pipeline_mode<synchronous>, transform_indices = @transform_1, window_bounds = array<i64: 3, 256, 16>}, {pipeline_mode = #tpu.pipeline_mode<synchronous>, transform_indices = @transform_2, window_bounds = array<i64: 1, 16>}, {pipeline_mode = #tpu.pipeline_mode<synchronous>, transform_indices = @transform_3, window_bounds = array<i64: 3, 16, 256>}, {pipeline_mode = #tpu.pipeline_mode<synchronous>, transform_indices = @transform_4, window_bounds = array<i64: 1, 256>}, {transform_indices = @transform_5, window_bounds = array<i64: 1, 4, 256, 256>}]} {
    %c0 = arith.constant 0 : index
    %c0_0 = arith.constant 0 : index
    %c0_1 = arith.constant 0 : index
    %c0_2 = arith.constant 0 : index
    %0 = vector.load %arg1[%c0, %c0_0, %c0_1, %c0_2] : memref<1x4x256x256xf32, #tpu.memory_space<vmem>>, vector<1x4x256x256xf32>
    %1 = vector.shape_cast %0 : vector<1x4x256x256xf32> to vector<4x256x256xf32>
    %cst = arith.constant dense<0.000000e+00> : vector<4x256xf32>
    %2 = vector.multi_reduction <add>, %1, %cst [2] : vector<4x256x256xf32> to vector<4x256xf32>
    %cst_3 = arith.constant 3.906250e-03 : f32
    %3 = vector.broadcast %cst_3 : f32 to vector<4x256xf32>
    %4 = arith.mulf %2, %3 : vector<4x256xf32>
    %c0_4 = arith.constant 0 : index
    %c0_5 = arith.constant 0 : index
    %c0_6 = arith.constant 0 : index
    %5 = vector.load %arg2[%c0_4, %c0_5, %c0_6] : memref<3x256x16xf32, #tpu.memory_space<vmem>>, vector<3x256x16xf32>
    %c0_7 = arith.constant 0 : index
    %c0_8 = arith.constant 0 : index
    %6 = vector.load %arg3[%c0_7, %c0_8] : memref<1x16xf32, #tpu.memory_space<vmem>>, vector<1x16xf32>
    %c0_9 = arith.constant 0 : index
    %c0_10 = arith.constant 0 : index
    %c0_11 = arith.constant 0 : index
    %7 = vector.load %arg4[%c0_9, %c0_10, %c0_11] : memref<3x16x256xf32, #tpu.memory_space<vmem>>, vector<3x16x256xf32>
    %c0_12 = arith.constant 0 : index
    %c0_13 = arith.constant 0 : index
    %8 = vector.load %arg5[%c0_12, %c0_13] : memref<1x256xf32, #tpu.memory_space<vmem>>, vector<1x256xf32>
    %cst_14 = arith.constant 0.000000e+00 : f32
    %9 = vector.broadcast %cst_14 : f32 to vector<1x256xf32>
    %10 = vector.extract_strided_slice %4 {offsets = [0, 0], sizes = [3, 256], strides = [1, 1]} : vector<4x256xf32> to vector<3x256xf32>
    %11 = tpu.concatenate %9, %10 in 0 : vector<1x256xf32>, vector<3x256xf32> -> vector<4x256xf32>
    %12 = vector.extract_strided_slice %4 {offsets = [1, 0], sizes = [3, 256], strides = [1, 1]} : vector<4x256xf32> to vector<3x256xf32>
    %13 = tpu.concatenate %12, %9 in 0 : vector<3x256xf32>, vector<1x256xf32> -> vector<4x256xf32>
    %14 = vector.extract_strided_slice %5 {offsets = [0, 0, 0], sizes = [1, 256, 16], strides = [1, 1, 1]} : vector<3x256x16xf32> to vector<1x256x16xf32>
    %15 = vector.shape_cast %14 : vector<1x256x16xf32> to vector<256x16xf32>
    %cst_15 = arith.constant dense<0.000000e+00> : vector<4x16xf32>
    %16 = tpu.matmul %11, %15, %cst_15 {dimension_numbers = #tpu.dot_dimension_numbers<[1], [0], [0], [1], [0, 0, 1, 1], [], []>} : vector<4x256xf32>, vector<256x16xf32>, vector<4x16xf32> -> vector<4x16xf32>
    %17 = vector.extract_strided_slice %5 {offsets = [1, 0, 0], sizes = [1, 256, 16], strides = [1, 1, 1]} : vector<3x256x16xf32> to vector<1x256x16xf32>
    %18 = vector.shape_cast %17 : vector<1x256x16xf32> to vector<256x16xf32>
    %cst_16 = arith.constant dense<0.000000e+00> : vector<4x16xf32>
    %19 = tpu.matmul %4, %18, %cst_16 {dimension_numbers = #tpu.dot_dimension_numbers<[1], [0], [0], [1], [0, 0, 1, 1], [], []>} : vector<4x256xf32>, vector<256x16xf32>, vector<4x16xf32> -> vector<4x16xf32>
    %20 = arith.addf %16, %19 : vector<4x16xf32>
    %21 = vector.extract_strided_slice %5 {offsets = [2, 0, 0], sizes = [1, 256, 16], strides = [1, 1, 1]} : vector<3x256x16xf32> to vector<1x256x16xf32>
    %22 = vector.shape_cast %21 : vector<1x256x16xf32> to vector<256x16xf32>
    %cst_17 = arith.constant dense<0.000000e+00> : vector<4x16xf32>
    %23 = tpu.matmul %13, %22, %cst_17 {dimension_numbers = #tpu.dot_dimension_numbers<[1], [0], [0], [1], [0, 0, 1, 1], [], []>} : vector<4x256xf32>, vector<256x16xf32>, vector<4x16xf32> -> vector<4x16xf32>
    %24 = arith.addf %20, %23 : vector<4x16xf32>
    %25 = vector.broadcast %6 : vector<1x16xf32> to vector<4x16xf32>
    %26 = arith.addf %24, %25 : vector<4x16xf32>
    %27 = arith.negf %26 : vector<4x16xf32>
    %28 = math.exp %27 : vector<4x16xf32>
    %cst_18 = arith.constant 1.000000e+00 : f32
    %29 = vector.broadcast %cst_18 : f32 to vector<4x16xf32>
    %30 = arith.addf %29, %28 : vector<4x16xf32>
    %31 = arith.divf %29, %30 : vector<4x16xf32>
    %32 = arith.mulf %26, %31 : vector<4x16xf32>
    %cst_19 = arith.constant 0.000000e+00 : f32
    %33 = vector.broadcast %cst_19 : f32 to vector<1x16xf32>
    %34 = vector.extract_strided_slice %32 {offsets = [0, 0], sizes = [3, 16], strides = [1, 1]} : vector<4x16xf32> to vector<3x16xf32>
    %35 = tpu.concatenate %33, %34 in 0 : vector<1x16xf32>, vector<3x16xf32> -> vector<4x16xf32>
    %36 = vector.extract_strided_slice %32 {offsets = [1, 0], sizes = [3, 16], strides = [1, 1]} : vector<4x16xf32> to vector<3x16xf32>
    %37 = tpu.concatenate %36, %33 in 0 : vector<3x16xf32>, vector<1x16xf32> -> vector<4x16xf32>
    %38 = vector.extract_strided_slice %7 {offsets = [0, 0, 0], sizes = [1, 16, 256], strides = [1, 1, 1]} : vector<3x16x256xf32> to vector<1x16x256xf32>
    %39 = vector.shape_cast %38 : vector<1x16x256xf32> to vector<16x256xf32>
    %cst_20 = arith.constant dense<0.000000e+00> : vector<4x256xf32>
    %40 = tpu.matmul %35, %39, %cst_20 {dimension_numbers = #tpu.dot_dimension_numbers<[1], [0], [0], [1], [0, 0, 1, 1], [], []>} : vector<4x16xf32>, vector<16x256xf32>, vector<4x256xf32> -> vector<4x256xf32>
    %41 = vector.extract_strided_slice %7 {offsets = [1, 0, 0], sizes = [1, 16, 256], strides = [1, 1, 1]} : vector<3x16x256xf32> to vector<1x16x256xf32>
    %42 = vector.shape_cast %41 : vector<1x16x256xf32> to vector<16x256xf32>
    %cst_21 = arith.constant dense<0.000000e+00> : vector<4x256xf32>
    %43 = tpu.matmul %32, %42, %cst_21 {dimension_numbers = #tpu.dot_dimension_numbers<[1], [0], [0], [1], [0, 0, 1, 1], [], []>} : vector<4x16xf32>, vector<16x256xf32>, vector<4x256xf32> -> vector<4x256xf32>
    %44 = arith.addf %40, %43 : vector<4x256xf32>
    %45 = vector.extract_strided_slice %7 {offsets = [2, 0, 0], sizes = [1, 16, 256], strides = [1, 1, 1]} : vector<3x16x256xf32> to vector<1x16x256xf32>
    %46 = vector.shape_cast %45 : vector<1x16x256xf32> to vector<16x256xf32>
    %cst_22 = arith.constant dense<0.000000e+00> : vector<4x256xf32>
    %47 = tpu.matmul %37, %46, %cst_22 {dimension_numbers = #tpu.dot_dimension_numbers<[1], [0], [0], [1], [0, 0, 1, 1], [], []>} : vector<4x16xf32>, vector<16x256xf32>, vector<4x256xf32> -> vector<4x256xf32>
    %48 = arith.addf %44, %47 : vector<4x256xf32>
    %49 = vector.broadcast %8 : vector<1x256xf32> to vector<4x256xf32>
    %50 = arith.addf %48, %49 : vector<4x256xf32>
    %51 = arith.negf %50 : vector<4x256xf32>
    %52 = math.exp %51 : vector<4x256xf32>
    %cst_23 = arith.constant 1.000000e+00 : f32
    %53 = vector.broadcast %cst_23 : f32 to vector<4x256xf32>
    %54 = arith.addf %53, %52 : vector<4x256xf32>
    %55 = arith.divf %53, %54 : vector<4x256xf32>
    %56 = vector.shape_cast %55 : vector<4x256xf32> to vector<4x256x1xf32>
    %57 = vector.broadcast %56 : vector<4x256x1xf32> to vector<4x256x256xf32>
    %58 = arith.mulf %1, %57 : vector<4x256x256xf32>
    %c0_24 = arith.constant 0 : index
    %c0_25 = arith.constant 0 : index
    %c0_26 = arith.constant 0 : index
    %c0_27 = arith.constant 0 : index
    %59 = vector.load %arg6[%c0_24, %c0_25, %c0_26, %c0_27] : memref<1x4x256x256xf32, #tpu.memory_space<vmem>>, vector<1x4x256x256xf32>
    %60 = vector.shape_cast %59 : vector<1x4x256x256xf32> to vector<4x256x256xf32>
    %61 = vector.shape_cast %58 : vector<4x256x256xf32> to vector<1x4x256x256xf32>
    tpu.vector_store %arg6[%c0_24, %c0_25, %c0_26, %c0_27], %61 {strides = array<i32>} : memref<1x4x256x256xf32, #tpu.memory_space<vmem>>, vector<1x4x256x256xf32>,
    return
  }
  func.func @transform_0(%arg0: i32) -> (i32, i32, i32, i32) {
    %c0_i32 = arith.constant 0 : i32
    %c0_i32_0 = arith.constant 0 : i32
    %c0_i32_1 = arith.constant 0 : i32
    %c0_i32_2 = arith.constant 0 : i32
    return %arg0, %c0_i32, %c0_i32_0, %c0_i32_1 : i32, i32, i32, i32
  }
  func.func @transform_1(%arg0: i32) -> (i32, i32, i32) {
    %c0_i32 = arith.constant 0 : i32
    %c0_i32_0 = arith.constant 0 : i32
    %c0_i32_1 = arith.constant 0 : i32
    %c0_i32_2 = arith.constant 0 : i32
    return %c0_i32, %c0_i32_0, %c0_i32_1 : i32, i32, i32
  }
  func.func @transform_2(%arg0: i32) -> (i32, i32) {
    %c0_i32 = arith.constant 0 : i32
    %c0_i32_0 = arith.constant 0 : i32
    %c0_i32_1 = arith.constant 0 : i32
    return %c0_i32, %c0_i32_0 : i32, i32
  }
  func.func @transform_3(%arg0: i32) -> (i32, i32, i32) {
    %c0_i32 = arith.constant 0 : i32
    %c0_i32_0 = arith.constant 0 : i32
    %c0_i32_1 = arith.constant 0 : i32
    %c0_i32_2 = arith.constant 0 : i32
    return %c0_i32, %c0_i32_0, %c0_i32_1 : i32, i32, i32
  }
  func.func @transform_4(%arg0: i32) -> (i32, i32) {
    %c0_i32 = arith.constant 0 : i32
    %c0_i32_0 = arith.constant 0 : i32
    %c0_i32_1 = arith.constant 0 : i32
    return %c0_i32, %c0_i32_0 : i32, i32
  }
  func.func @transform_5(%arg0: i32) -> (i32, i32, i32, i32) {
    %c0_i32 = arith.constant 0 : i32
    %c0_i32_0 = arith.constant 0 : i32
    %c0_i32_1 = arith.constant 0 : i32
    %c0_i32_2 = arith.constant 0 : i32
    return %arg0, %c0_i32, %c0_i32_0, %c0_i32_1 : i32, i32, i32, i32
  }
}

</mosaic_0001>

<bundles_post_ra>
// kernel: tpu_custom_call.1
= control target key start
LH: loop header
LB: loop body
LE: loop exit
PB: predicated region body
PF: predicated region fallthrough
CT: control target
= control target key end

     0   :  { %10 = vsyncpa [#allocation3], 0  ;;  %s6137_s0 = inlined_call_operand.hbm [shape: f32[2,4,256,256], index: 0, kind: input, shape index: {}]   ;;  %s6138_s1 = inlined_call_operand.vmem [shape: f32[3,256,16], index: 1, kind: input, shape index: {}]   ;;  %s6139_s2 = inlined_call_operand.hbm [shape: f32[1,16], index: 2, kind: input, shape index: {}]   ;;  %s6140_s3 = inlined_call_operand.hbm [shape: f32[3,16,256], index: 3, kind: input, shape index: {}]   ;;  %s6141_s4 = inlined_call_operand.hbm [shape: f32[1,256], index: 4, kind: input, shape index: {}]   ;;  %s6142_s5 = inlined_call_operand.hbm [shape: f32[2,4,256,256], index: 5, kind: output, shape index: {}]  }
   0x1   :  { %12 = vsyncpa [#allocation3 + $0x1], 0 }
   0x2   :  { %13 = vsyncpa [#allocation6], 0 }
   0x3   :  { %14 = vsyncpa [#allocation9], 0 }
   0x4   :  { %15 = vsyncpa [#allocation4], 0 }
   0x5   :  { %17 = vsyncpa [#allocation4 + $0x1], 0  ;;  %s4081_s18 = smov 0   ;;  %s4083_s19 = smov 0  }
   0x6   :  { %s4085_s20 = smov 0   ;;  %s4087_s21 = smov 0  }
   0x7 LB: > { %s4102_s22 = sadd.s32 4294967295, %s4042_s21   ;;  %s3340_s23 = sadd.s32 4294967294, %s4042_s21   ;;  %s4042_s21 = sphi %s4087_s21, %s6230_s21   ;;  %s4038_s20 = sphi %s4085_s20, %s6229_s20   ;;  %s4034_s19 = sphi %s4083_s19, %s6228_s19   ;;  %s4030_s18 = sphi %s4081_s18, %s6227_s18  }
   0x8   : > { %p43_p0 = scmp.ne.s32.totalorder %s4034_s19, %s4030_s18  ;;  %p44_p1 = scmp.eq.s32.totalorder %s4102_s22, 0 }
   0x9   : > { %p151_p2 = scmp.eq.s32.totalorder %s4102_s22, 1  ;;  %p157_p3 = scmp.eq.s32.totalorder %s3340_s23, 1 }
   0xa   : > { %p4111_p4 = por %p44_p1, %p43_p0  ;;  %p3341_p5 = scmp.ge.s32.totalorder %s4042_s21, 1 }
   0xb   : > { %p4116_p6 = por %p157_p3, %p43_p0  ;;  %p164_p7 = scmp.lt.s32.totalorder %s4042_s21, 3 }
   0xc   : > { %s179_s28 = sshll.u32 %s6139_s2, 4  ;;  %s4044_s30 = smov [#allocation5]   ;;  %s180_s28 = int_to_ptr.hbm [resolvable:$true] %s179_s28 }
   0xd   : > { %p4124_p8 = pnand %p3341_p5, %p164_p7  ;;  %s181_s6 = sshll.u32 %s4044_s30, 4  ;;  %s182_s6 = int_to_ptr.vmem [resolvable:$true] %s181_s6 }
   0xe   : > { %s190_s9 = sshll.u32 %s6140_s3, 4  ;;  %s4045_s11 = smov [#allocation7]   ;;  %s191_s9 = int_to_ptr.hbm [resolvable:$true] %s190_s9 }
   0xf   : > { %p3393_p10 = pneg %p4124_p8  ;;  %s192_s12 = sshll.u32 %s4045_s11, 4  ;;  %s193_s12 = int_to_ptr.vmem [resolvable:$true] %s192_s12 }
  0x10   : > { %s6143_s13 = smov 256   ;;  %s4047_s14 = smov 16  }
  0x11   : > { %p4136_p11 = pnand %p3393_p10, %p44_p1  ;;  %s205_s17 = sshll.u32 %s6141_s4, 4  ;;  %s206_s17 = int_to_ptr.hbm [resolvable:$true] %s205_s17 }
  0x12   : > { %s4048_s23 = smov [#allocation8]   ;;  %s4153_s27 = sadd.s32 1, %s4042_s21  }
  0x13   : > { %3396 = dma.hbm_to_vmem [thread:$0]  (!%p4136_p11), %s180_s28, 16, %s182_s6, [#allocation6]  }
  0x14   : > { %3399 = dma.hbm_to_vmem [thread:$0]  (!%p4136_p11), %s191_s9, 1536, %s193_s12, [#allocation6], %s6143_s13, %s6143_s13, %s4047_s14  }
  0x15   : > { %s207_s26 = sshll.u32 %s4048_s23, 4  ;;  %s27_s28 = ssub.s32 %s4042_s21, %s4153_s27  ;;  %s208_s26 = int_to_ptr.vmem [resolvable:$true] %s207_s26 }
  0x16   : > { %3402 = dma.hbm_to_vmem [thread:$0]  (!%p4136_p11), %s206_s17, 32, %s208_s26, [#allocation9]  }
  0x17   : > { %s30_s30 = sadd.s32 1, %s4038_s20  ;;  %p28_p12 = scmp.eq.s32.totalorder %s27_s28, 0 }
  0x18   : > { %p37_p13 = scmp.ne.s32.totalorder %s4038_s20, %s4034_s19  ;;  %p38_p0 = scmp.eq.s32.totalorder %s4042_s21, 0 }
  0x19   : > { %s4162_s6 = scalar_select %p28_p12, %s4038_s20, %s30_s30  }
  0x1a   : > { %p4166_p3 = por %p151_p2, %p37_p13  ;;  %p3414_p5 = scmp.lt.s32.totalorder %s4042_s21, 2 }
  0x1b   : > { %s218_s8 = sand.u32 1, %s4038_s20   ;;  %s3375_s9 = sshll.u32 %s4042_s21, 11 }
  0x1c   : > { %p39_p7 = por %p38_p0, %p37_p13  ;;  %s3346_s10 = sshll.u32 %s218_s8, 11 }
  0x1d   : > { %s227_s15 = scalar_lea.hbm %s6137_s0, %s3375_s9  ;;  %s222_s17 = scalar_lea.vmem [#allocation2], %s3346_s10 }
  0x1e   : > { %s228_s16 = sshll.u32 %s227_s15, 4  ;;  %s230_s23 = sshll.u32 %s222_s17, 4  ;;  %s229_s16 = int_to_ptr.hbm [resolvable:$true] %s228_s16  ;;  %s231_s23 = int_to_ptr.vmem [resolvable:$true] %s230_s23 }
  0x1f   : > { %p4176_p10 = pnand %p3414_p5, %p39_p7  ;;  %s219_s28 = scalar_lea.sflag [#allocation3], %s218_s8 }
  0x20   : > { %s3938_s30 = sshra.s32 %s229_s16, 4  ;;  %s3945_s10 = scalar_lea.hbm %s6137_s0, 4096  ;;  %s3939_s30 = int_to_ptr.hbm [resolvable:$true] %s3938_s30 }
  0x21   : > { %s3940_s13 = scalar_lea.hbm %s3939_s30, 2048  ;;  %p3942_p11 = pneg %p4176_p10 }
  0x22   : > { %p3941_p2 = scmp.ne.s32.totalorder %s3939_s30, %s3940_s13  ;;  %p3946_p0 = scmp.lt.s32.totalorder %s3939_s30, %s6137_s0 }
  0x23   : > { %p3947_p5 = scmp.lt.s32.totalorder %s3945_s10, %s3940_s13 }
  0x24   : > { %p3943_p12 = pnand %p3942_p11, %p3941_p2 }
  0x25   : > { %p3948_p7 = por %p3947_p5, %p3946_p0 }
  0x26   : > { %p3944_p13 = pneg %p3943_p12 }
  0x28   : > { %p3949_p9 = pnand %p3948_p7, %p3944_p13 }
  0x2a   : > { %3952 = shalt.err (!%p3949_p9)
}
  0x2b   : > { %s6160_s8 = smov 256   ;;  %242 = sbr.rel (%p4124_p8) target bundleno = 1793 (0x701), region = 40 }
  0x2c   : > { %3406 = dma.hbm_to_vmem [thread:$0]  (!%p4176_p10), %s229_s16, 32768, %s231_s23, %s219_s28, %s6160_s8, %s6160_s8, %s4047_s14  }
  0x30   : > { %s4196_s17 = sand.u32 1, %s4034_s19  }
  0x31   : > { %s3350_s13 = sshll.u32 %s4196_s17, 11  ;;  %s245_s30 = scalar_lea.sflag [#allocation3], %s4196_s17 }
  0x32   : > { %s4202_s9 = scalar_lea.vmem [#allocation2], %s3350_s13 }
  0x33   : > { %4013 = dma.done.wait (%p4111_p4), %s245_s30, 32768  }
  0x34   : > { %4015 = vsyncadd (%p4111_p4), %s245_s30, 4294934528 }
  0x35   : > { %4017 = dma.done.wait (%p44_p1), [#allocation6], 1552  }
  0x36   : > { %4019 = vsyncadd (%p44_p1), [#allocation6], 4294965744 }
  0x37   : > { %4021 = dma.done.wait (%p44_p1), [#allocation9], 32  }
  0x38   : > { %4023 = vsyncadd (%p44_p1), [#allocation9], 4294967264  ;;  %v295_v0 = vld [vmem:[%s4202_s9 + $0x20] sm:$0xff]  ;;  %v296_v1 = vld [vmem:[%s4202_s9 + $0x28] sm:$0xff]  ;;  %vm1270_vm0 = vcmask 130112   ;;  %vm1274_vm1 = vcmask 195712  }
  0x39   : > { %v291_v2 = vld [vmem:[%s4202_s9] sm:$0xff]  ;;  %v553_v3 = vadd.f32 %v296_v1, %v295_v0  ;;  %v292_v4 = vld [vmem:[%s4202_s9 + $0x8] sm:$0xff]  ;;  %v297_v9 = vld [vmem:[%s4202_s9 + $0x30] sm:$0xff]  ;;  %vm1278_vm2 = vcmask 261312   ;;  %vm1282_vm3 = vcmask 326912   ;;  %vm1286_vm4 = vcmask 392512  }
  0x3a   : > { %v299_v5 = vld [vmem:[%s4202_s9 + $0x40] sm:$0xff]  ;;  %v300_v6 = vld [vmem:[%s4202_s9 + $0x48] sm:$0xff]  ;;  %v547_v7 = vadd.f32 %v292_v4, %v291_v2  ;;  %v298_v10 = vld [vmem:[%s4202_s9 + $0x38] sm:$0xff]  ;;  %vm1290_vm5 = vcmask 458112   ;;  %vm6152_vm6 = vcmask 523712   ;;  %vm6153_vm7 = vcmask 589312  }
  0x3b   : > { %v559_v8 = vadd.f32 %v300_v6, %v299_v5  ;;  %554 = vadd.xlane.f32.xlu1 %v553_v3  ;;  %v293_v11 = vld [vmem:[%s4202_s9 + $0x10] sm:$0xff]  ;;  %v294_v12 = vld [vmem:[%s4202_s9 + $0x18] sm:$0xff]  ;;  %v556_v15 = vadd.f32 %v298_v10, %v297_v9  ;;  %v303_v20 = vld [vmem:[%s4202_s9 + $0x60] sm:$0xff]  ;;  %vm6150_vm8 = vcmask 654912   ;;  %vm6149_vm9 = vcmask 720512   ;;  %s5366_s15 = scalar_lea.vmem [#allocation10], %s3350_s13 }
  0x3c   : > { %548 = vadd.xlane.f32.xlu0 %v547_v7  ;;  %v301_v13 = vld [vmem:[%s4202_s9 + $0x50] sm:$0xff]  ;;  %v302_v14 = vld [vmem:[%s4202_s9 + $0x58] sm:$0xff]  ;;  %v550_v16 = vadd.f32 %v294_v12, %v293_v11  ;;  %v304_v21 = vld [vmem:[%s4202_s9 + $0x68] sm:$0xff]  ;;  %vm6147_vm10 = vcmask 786112   ;;  %vm6148_vm11 = vcmask 851712   ;;  %vm1318_vm12 = vcmask 917312  }
  0x3d   : > { %560 = vadd.xlane.f32.xlu2 %v559_v8  ;;  %v562_v17 = vadd.f32 %v302_v14, %v301_v13  ;;  %v305_v18 = vld [vmem:[%s4202_s9 + $0x70] sm:$0xff]  ;;  %v306_v19 = vld [vmem:[%s4202_s9 + $0x78] sm:$0xff]  ;;  %v307_v22 = vld [vmem:[%s4202_s9 + $0x80] sm:$0xff]  ;;  %v565_v25 = vadd.f32 %v304_v21, %v303_v20  ;;  %vm1322_vm13 = vcmask 982912   ;;  %vm1326_vm14 = vcmask 1048512   ;;  %s3376_s13 = sshll.u32 %s4102_s22, 11 }
  0x3e   : > { %v308_v23 = vld [vmem:[%s4202_s9 + $0x88] sm:$0xff]  ;;  %v568_v24 = vadd.f32 %v306_v19, %v305_v18  ;;  %v311_v27 = vld [vmem:[%s4202_s9 + $0xa0] sm:$0xff]  ;;  %v309_v29 = vld [vmem:[%s4202_s9 + $0x90] sm:$0xff]  ;;  %vm6151_vm15 = vcmask 1040384   ;;  %s3234_s24 = scalar_lea.hbm %s6142_s5, %s3376_s13  ;;  %s3235_s29 = sshll.u32 %s5366_s15, 4  ;;  %s3236_s29 = int_to_ptr.vmem [resolvable:$true] %s3235_s29 }
  0x3f   : > { %v571_v26 = vadd.f32 %v308_v23, %v307_v22  ;;  %v312_v28 = vld [vmem:[%s4202_s9 + $0xa8] sm:$0xff]  ;;  %v310_v30 = vld [vmem:[%s4202_s9 + $0x98] sm:$0xff]  ;;  %v313_v31 = vld [vmem:[%s4202_s9 + $0xb0] sm:$0xff]  ;;  %s3237_s14 = sshll.u32 %s3234_s24, 4  ;;  %s3223_s22 = scalar_lea.sflag [#allocation4], %s4196_s17  ;;  %s3238_s14 = int_to_ptr.hbm [resolvable:$true] %s3237_s14 }
  0x40   : > { %v314_v32 = vld [vmem:[%s4202_s9 + $0xb8] sm:$0xff]  ;;  %v577_v33 = vadd.f32 %v312_v28, %v311_v27  ;;  %v574_v34 = vadd.f32 %v310_v30, %v309_v29  ;;  %v317_v36 = vld [vmem:[%s4202_s9 + $0xd0] sm:$0xff]  ;;  %v315_v38 = vld [vmem:[%s4202_s9 + $0xc0] sm:$0xff]  ;;  %s3982_s16 = sshra.s32 %s3238_s14, 4  ;;  %s3988_s11 = scalar_lea.hbm %s6142_s5, 4096  ;;  %s3983_s16 = int_to_ptr.hbm [resolvable:$true] %s3982_s16 }
  0x41   : > { %v580_v35 = vadd.f32 %v314_v32, %v313_v31  ;;  %v318_v37 = vld [vmem:[%s4202_s9 + $0xd8] sm:$0xff]  ;;  %v316_v39 = vld [vmem:[%s4202_s9 + $0xc8] sm:$0xff]  ;;  %v319_v40 = vld [vmem:[%s4202_s9 + $0xe0] sm:$0xff]  ;;  %s3984_s23 = scalar_lea.hbm %s3983_s16, 2048  ;;  %p3989_p9 = scmp.lt.s32.totalorder %s3983_s16, %s6142_s5 }
  0x42   : > { %v320_v41 = vld [vmem:[%s4202_s9 + $0xe8] sm:$0xff]  ;;  %v586_v42 = vadd.f32 %v318_v37, %v317_v36  ;;  %v583_v43 = vadd.f32 %v316_v39, %v315_v38  ;;  %v323_v45 = vld [vmem:[%s4202_s9 + $0x100] sm:$0xff]  ;;  %v321_v47 = vld [vmem:[%s4202_s9 + $0xf0] sm:$0xff]  ;;  %p3985_p1 = scmp.ne.s32.totalorder %s3983_s16, %s3984_s23  ;;  %p3990_p10 = scmp.lt.s32.totalorder %s3988_s11, %s3984_s23 }
  0x43   : > { %557 = vadd.xlane.f32.xlu1 %v556_v15  ;;  %v589_v44 = vadd.f32 %v320_v41, %v319_v40  ;;  %v324_v46 = vld [vmem:[%s4202_s9 + $0x108] sm:$0xff]  ;;  %v322_v48 = vld [vmem:[%s4202_s9 + $0xf8] sm:$0xff]  ;;  %v325_v49 = vld [vmem:[%s4202_s9 + $0x110] sm:$0xff] }
  0x44   : > { %551 = vadd.xlane.f32.xlu0 %v550_v16  ;;  %v326_v50 = vld [vmem:[%s4202_s9 + $0x118] sm:$0xff]  ;;  %v595_v51 = vadd.f32 %v324_v46, %v323_v45  ;;  %v592_v52 = vadd.f32 %v322_v48, %v321_v47  ;;  %v329_v54 = vld [vmem:[%s4202_s9 + $0x130] sm:$0xff]  ;;  %v327_v56 = vld [vmem:[%s4202_s9 + $0x120] sm:$0xff]  ;;  %p3986_p4 = pnand %p3985_p1, %p4166_p3  ;;  %p3991_p2 = por %p3990_p10, %p3989_p9 }
  0x45   : > { %563 = vadd.xlane.f32.xlu2 %v562_v17  ;;  %v598_v53 = vadd.f32 %v326_v50, %v325_v49  ;;  %v330_v55 = vld [vmem:[%s4202_s9 + $0x138] sm:$0xff]  ;;  %v328_v57 = vld [vmem:[%s4202_s9 + $0x128] sm:$0xff]  ;;  %v331_v58 = vld [vmem:[%s4202_s9 + $0x140] sm:$0xff] }
  0x46   : > { %v332_v59 = vld [vmem:[%s4202_s9 + $0x148] sm:$0xff]  ;;  %v604_v60 = vadd.f32 %v330_v55, %v329_v54  ;;  %v601_v61 = vadd.f32 %v328_v57, %v327_v56  ;;  %v335_v63 = vld [vmem:[%s4202_s9 + $0x160] sm:$0xff]  ;;  %v333_v1 = vld [vmem:[%s4202_s9 + $0x150] sm:$0xff]  ;;  %p3987_p8 = pneg %p3986_p4 }
  0x47   : > { %v607_v62 = vadd.f32 %v332_v59, %v331_v58  ;;  %v336_v0 = vld [vmem:[%s4202_s9 + $0x168] sm:$0xff]  ;;  %v334_v2 = vld [vmem:[%s4202_s9 + $0x158] sm:$0xff]  ;;  %v337_v3 = vld [vmem:[%s4202_s9 + $0x170] sm:$0xff] }
  0x48   : > { %v338_v4 = vld [vmem:[%s4202_s9 + $0x178] sm:$0xff]  ;;  %v613_v5 = vadd.f32 %v336_v0, %v335_v63  ;;  %v610_v6 = vadd.f32 %v334_v2, %v333_v1  ;;  %v341_v8 = vld [vmem:[%s4202_s9 + $0x190] sm:$0xff]  ;;  %v339_v10 = vld [vmem:[%s4202_s9 + $0x180] sm:$0xff]  ;;  %p3992_p11 = pnand %p3991_p2, %p3987_p8 }
  0x49   : > { %v616_v7 = vadd.f32 %v338_v4, %v337_v3  ;;  %v342_v9 = vld [vmem:[%s4202_s9 + $0x198] sm:$0xff]  ;;  %v340_v11 = vld [vmem:[%s4202_s9 + $0x188] sm:$0xff]  ;;  %v343_v12 = vld [vmem:[%s4202_s9 + $0x1a0] sm:$0xff] }
  0x4a   : > { %v344_v13 = vld [vmem:[%s4202_s9 + $0x1a8] sm:$0xff]  ;;  %v622_v14 = vadd.f32 %v342_v9, %v341_v8  ;;  %v619_v15 = vadd.f32 %v340_v11, %v339_v10  ;;  %v347_v17 = vld [vmem:[%s4202_s9 + $0x1c0] sm:$0xff]  ;;  %v345_v19 = vld [vmem:[%s4202_s9 + $0x1b0] sm:$0xff] }
  0x4b   : > { %569 = vadd.xlane.f32.xlu1 %v568_v24  ;;  %v625_v16 = vadd.f32 %v344_v13, %v343_v12  ;;  %v348_v18 = vld [vmem:[%s4202_s9 + $0x1c8] sm:$0xff]  ;;  %v346_v20 = vld [vmem:[%s4202_s9 + $0x1b8] sm:$0xff]  ;;  %v349_v21 = vld [vmem:[%s4202_s9 + $0x1d0] sm:$0xff] }
  0x4c   : > { %566 = vadd.xlane.f32.xlu0 %v565_v25  ;;  %v350_v22 = vld [vmem:[%s4202_s9 + $0x1d8] sm:$0xff]  ;;  %v631_v23 = vadd.f32 %v348_v18, %v347_v17  ;;  %v628_v24 = vadd.f32 %v346_v20, %v345_v19  ;;  %v351_v28 = vld [vmem:[%s4202_s9 + $0x1e0] sm:$0xff]  ;;  %v352_v29 = vld [vmem:[%s4202_s9 + $0x1e8] sm:$0xff] }
  0x4d   : > { %572 = vadd.xlane.f32.xlu2 %v571_v26  ;;  %v634_v25 = vadd.f32 %v350_v22, %v349_v21  ;;  %v353_v26 = vld [vmem:[%s4202_s9 + $0x1f0] sm:$0xff]  ;;  %v354_v27 = vld [vmem:[%s4202_s9 + $0x1f8] sm:$0xff]  ;;  %v355_v30 = vld [vmem:[%s4202_s9 + $0x200] sm:$0xff] }
  0x4e   : > { %v356_v31 = vld [vmem:[%s4202_s9 + $0x208] sm:$0xff]  ;;  %v640_v32 = vadd.f32 %v354_v27, %v353_v26  ;;  %v357_v37 = vld [vmem:[%s4202_s9 + $0x210] sm:$0xff]  ;;  %v358_v38 = vld [vmem:[%s4202_s9 + $0x218] sm:$0xff] }
  0x4f   : > { %v360_v36 = vld [vmem:[%s4202_s9 + $0x228] sm:$0xff]  ;;  %v361_v39 = vld [vmem:[%s4202_s9 + $0x230] sm:$0xff]  ;;  %v362_v40 = vld [vmem:[%s4202_s9 + $0x238] sm:$0xff] }
  0x50   : > { %v366_v45 = vld [vmem:[%s4202_s9 + $0x258] sm:$0xff]  ;;  %v363_v46 = vld [vmem:[%s4202_s9 + $0x240] sm:$0xff]  ;;  %v364_v47 = vld [vmem:[%s4202_s9 + $0x248] sm:$0xff] }
  0x51   : > { %v367_v48 = vld [vmem:[%s4202_s9 + $0x260] sm:$0xff]  ;;  %v368_v49 = vld [vmem:[%s4202_s9 + $0x268] sm:$0xff]  ;;  %v369_v55 = vld [vmem:[%s4202_s9 + $0x270] sm:$0xff] }
  0x52   : > { %v372_v54 = vld [vmem:[%s4202_s9 + $0x288] sm:$0xff]  ;;  %v370_v56 = vld [vmem:[%s4202_s9 + $0x278] sm:$0xff]  ;;  %v373_v57 = vld [vmem:[%s4202_s9 + $0x290] sm:$0xff] }
  0x53   : > { %578 = vadd.xlane.f32.xlu1 %v577_v33  ;;  %v637_v33 = vadd.f32 %v352_v29, %v351_v28  ;;  %v374_v58 = vld [vmem:[%s4202_s9 + $0x298] sm:$0xff]  ;;  %v375_v0 = vld [vmem:[%s4202_s9 + $0x2a0] sm:$0xff]  ;;  %v376_v1 = vld [vmem:[%s4202_s9 + $0x2a8] sm:$0xff] }
  0x54   : > { %575 = vadd.xlane.f32.xlu0 %v574_v34  ;;  %v643_v34 = vadd.f32 %v356_v31, %v355_v30  ;;  %v378_v63 = vld [vmem:[%s4202_s9 + $0x2b8] sm:$0xff]  ;;  %v379_v2 = vld [vmem:[%s4202_s9 + $0x2c0] sm:$0xff]  ;;  %v380_v3 = vld [vmem:[%s4202_s9 + $0x2c8] sm:$0xff] }
  0x55   : > { %581 = vadd.xlane.f32.xlu2 %v580_v35  ;;  %v359_v35 = vld [vmem:[%s4202_s9 + $0x220] sm:$0xff]  ;;  %v384_v8 = vld [vmem:[%s4202_s9 + $0x2e8] sm:$0xff]  ;;  %v381_v9 = vld [vmem:[%s4202_s9 + $0x2d0] sm:$0xff] }
  0x56   : > { %v649_v41 = vadd.f32 %v360_v36, %v359_v35  ;;  %v382_v10 = vld [vmem:[%s4202_s9 + $0x2d8] sm:$0xff]  ;;  %v385_v11 = vld [vmem:[%s4202_s9 + $0x2f0] sm:$0xff]  ;;  %v387_v21 = vld [vmem:[%s4202_s9 + $0x300] sm:$0xff] }
  0x57   : > { %v386_v12 = vld [vmem:[%s4202_s9 + $0x2f8] sm:$0xff]  ;;  %v682_v17 = vadd.f32 %v382_v10, %v381_v9  ;;  %v389_v19 = vld [vmem:[%s4202_s9 + $0x310] sm:$0xff]  ;;  %v388_v22 = vld [vmem:[%s4202_s9 + $0x308] sm:$0xff] }
  0x58   : > { %v688_v18 = vadd.f32 %v386_v12, %v385_v11  ;;  %v390_v20 = vld [vmem:[%s4202_s9 + $0x318] sm:$0xff]  ;;  %v691_v29 = vadd.f32 %v388_v22, %v387_v21  ;;  %v395_v31 = vld [vmem:[%s4202_s9 + $0x340] sm:$0xff]  ;;  %v397_v35 = vld [vmem:[%s4202_s9 + $0x350] sm:$0xff] }
  0x59   : > { %v694_v28 = vadd.f32 %v390_v20, %v389_v19  ;;  %v398_v36 = vld [vmem:[%s4202_s9 + $0x358] sm:$0xff]  ;;  %v420_v19 = vld [vmem:[%s4202_s9 + $0x408] sm:$0xff]  ;;  %v417_v20 = vld [vmem:[%s4202_s9 + $0x3f0] sm:$0xff] }
  0x5a   : > { %v418_v21 = vld [vmem:[%s4202_s9 + $0x3f8] sm:$0xff]  ;;  %v421_v22 = vld [vmem:[%s4202_s9 + $0x410] sm:$0xff] }
  0x5b   : > { %587 = vadd.xlane.f32.xlu1 %v586_v42  ;;  %v646_v42 = vadd.f32 %v358_v38, %v357_v37 }
  0x5c   : > { %584 = vadd.xlane.f32.xlu0 %v583_v43  ;;  %v652_v43 = vadd.f32 %v362_v40, %v361_v39 }
  0x5d   : > { %590 = vadd.xlane.f32.xlu2 %v589_v44  ;;  %v365_v44 = vld [vmem:[%s4202_s9 + $0x250] sm:$0xff] }
  0x5e   : > { %v658_v50 = vadd.f32 %v366_v45, %v365_v44  ;;  %v402_v44 = vld [vmem:[%s4202_s9 + $0x378] sm:$0xff]  ;;  %v399_v45 = vld [vmem:[%s4202_s9 + $0x360] sm:$0xff] }
  0x63   : > { %596 = vadd.xlane.f32.xlu1 %v595_v51  ;;  %v655_v51 = vadd.f32 %v364_v47, %v363_v46  ;;  %v400_v46 = vld [vmem:[%s4202_s9 + $0x368] sm:$0xff]  ;;  %v403_v47 = vld [vmem:[%s4202_s9 + $0x380] sm:$0xff] }
  0x64   : > { %593 = vadd.xlane.f32.xlu0 %v592_v52  ;;  %v661_v52 = vadd.f32 %v368_v49, %v367_v48  ;;  %v404_v48 = vld [vmem:[%s4202_s9 + $0x388] sm:$0xff] }
  0x65   : > { %599 = vadd.xlane.f32.xlu2 %v598_v53  ;;  %v371_v53 = vld [vmem:[%s4202_s9 + $0x280] sm:$0xff] }
  0x66   : > { %v667_v59 = vadd.f32 %v372_v54, %v371_v53  ;;  %v709_v53 = vadd.f32 %v400_v46, %v399_v45  ;;  %v715_v54 = vadd.f32 %v404_v48, %v403_v47  ;;  %v431_v48 = vld [vmem:[%s4202_s9 + $0x460] sm:$0xff] }
  0x6b   : > { %605 = vadd.xlane.f32.xlu1 %v604_v60  ;;  %v664_v60 = vadd.f32 %v370_v56, %v369_v55  ;;  %v407_v55 = vld [vmem:[%s4202_s9 + $0x3a0] sm:$0xff]  ;;  %v408_v56 = vld [vmem:[%s4202_s9 + $0x3a8] sm:$0xff] }
  0x6c   : > { %602 = vadd.xlane.f32.xlu0 %v601_v61  ;;  %v670_v61 = vadd.f32 %v374_v58, %v373_v57  ;;  %v405_v57 = vld [vmem:[%s4202_s9 + $0x390] sm:$0xff]  ;;  %v406_v58 = vld [vmem:[%s4202_s9 + $0x398] sm:$0xff] }
  0x6d   : > { %608 = vadd.xlane.f32.xlu2 %v607_v62  ;;  %v377_v62 = vld [vmem:[%s4202_s9 + $0x2b0] sm:$0xff] }
  0x6e   : > { %v676_v4 = vadd.f32 %v378_v63, %v377_v62 }
  0x73   : > { %614 = vadd.xlane.f32.xlu1 %v613_v5  ;;  %v673_v5 = vadd.f32 %v376_v1, %v375_v0  ;;  %v721_v0 = vadd.f32 %v408_v56, %v407_v55  ;;  %v718_v1 = vadd.f32 %v406_v58, %v405_v57  ;;  %v433_v55 = vld [vmem:[%s4202_s9 + $0x470] sm:$0xff]  ;;  %v434_v56 = vld [vmem:[%s4202_s9 + $0x478] sm:$0xff] }
  0x74   : > { %611 = vadd.xlane.f32.xlu0 %v610_v6  ;;  %v679_v6 = vadd.f32 %v380_v3, %v379_v2  ;;  %v413_v3 = vld [vmem:[%s4202_s9 + $0x3d0] sm:$0xff] }
  0x75   : > { %617 = vadd.xlane.f32.xlu2 %v616_v7  ;;  %v383_v7 = vld [vmem:[%s4202_s9 + $0x2e0] sm:$0xff] }
  0x7b   : > { %623 = vadd.xlane.f32.xlu1 %v622_v14 }
  0x7c   : > { %620 = vadd.xlane.f32.xlu0 %v619_v15 }
  0x7d   : > { %626 = vadd.xlane.f32.xlu2 %v625_v16  ;;  %v685_v16 = vadd.f32 %v384_v8, %v383_v7  ;;  %v415_v7 = vld [vmem:[%s4202_s9 + $0x3e0] sm:$0xff]  ;;  %v416_v8 = vld [vmem:[%s4202_s9 + $0x3e8] sm:$0xff] }
  0x83   : > { %632 = vadd.xlane.f32.xlu1 %v631_v23  ;;  %v391_v23 = vld [vmem:[%s4202_s9 + $0x320] sm:$0xff] }
  0x84   : > { %629 = vadd.xlane.f32.xlu0 %v628_v24  ;;  %v392_v24 = vld [vmem:[%s4202_s9 + $0x328] sm:$0xff] }
  0x85   : > { %635 = vadd.xlane.f32.xlu2 %v634_v25  ;;  %v697_v30 = vadd.f32 %v392_v24, %v391_v23  ;;  %v422_v23 = vld [vmem:[%s4202_s9 + $0x418] sm:$0xff] }
  0x8b   : > { %641 = vadd.xlane.f32.xlu1 %v640_v32  ;;  %v396_v32 = vld [vmem:[%s4202_s9 + $0x348] sm:$0xff] }
  0x8c   : > { %638 = vadd.xlane.f32.xlu0 %v637_v33  ;;  %v393_v33 = vld [vmem:[%s4202_s9 + $0x330] sm:$0xff]  ;;  %v703_v40 = vadd.f32 %v396_v32, %v395_v31  ;;  %v736_v31 = vadd.f32 %v418_v21, %v417_v20  ;;  %v742_v32 = vadd.f32 %v422_v23, %v421_v22  ;;  %v443_v20 = vld [vmem:[%s4202_s9 + $0x4c0] sm:$0xff]  ;;  %v444_v21 = vld [vmem:[%s4202_s9 + $0x4c8] sm:$0xff] }
  0x8d   : > { %644 = vadd.xlane.f32.xlu2 %v643_v34  ;;  %v394_v34 = vld [vmem:[%s4202_s9 + $0x338] sm:$0xff]  ;;  %v441_v22 = vld [vmem:[%s4202_s9 + $0x4b0] sm:$0xff] }
  0x8e   : > { %v442_v23 = vld [vmem:[%s4202_s9 + $0x4b8] sm:$0xff] }
  0x93   : > { %650 = vadd.xlane.f32.xlu1 %v649_v41  ;;  %v700_v41 = vadd.f32 %v394_v34, %v393_v33  ;;  %v425_v33 = vld [vmem:[%s4202_s9 + $0x430] sm:$0xff]  ;;  %v426_v34 = vld [vmem:[%s4202_s9 + $0x438] sm:$0xff] }
  0x94   : > { %647 = vadd.xlane.f32.xlu0 %v646_v42  ;;  %v706_v42 = vadd.f32 %v398_v36, %v397_v35  ;;  %v423_v35 = vld [vmem:[%s4202_s9 + $0x420] sm:$0xff]  ;;  %v424_v36 = vld [vmem:[%s4202_s9 + $0x428] sm:$0xff]  ;;  %v748_v45 = vadd.f32 %v426_v34, %v425_v33 }
  0x95   : > { %653 = vadd.xlane.f32.xlu2 %v652_v43  ;;  %v401_v43 = vld [vmem:[%s4202_s9 + $0x370] sm:$0xff]  ;;  %v745_v46 = vadd.f32 %v424_v36, %v423_v35  ;;  %v775_v35 = vadd.f32 %v444_v21, %v443_v20  ;;  %v772_v36 = vadd.f32 %v442_v23, %v441_v22  ;;  %v462_v23 = vld [vmem:[%s4202_s9 + $0x558] sm:$0xff] }
  0x96   : > { %v461_v22 = vld [vmem:[%s4202_s9 + $0x550] sm:$0xff] }
  0x9b   : > { %659 = vadd.xlane.f32.xlu1 %v658_v50 }
  0x9c   : > { %656 = vadd.xlane.f32.xlu0 %v655_v51 }
  0x9d   : > { %662 = vadd.xlane.f32.xlu2 %v661_v52  ;;  %v712_v52 = vadd.f32 %v402_v44, %v401_v43 }
  0xa3   : > { %668 = vadd.xlane.f32.xlu1 %v667_v59  ;;  %v409_v59 = vld [vmem:[%s4202_s9 + $0x3b0] sm:$0xff] }
  0xa4   : > { %665 = vadd.xlane.f32.xlu0 %v664_v60  ;;  %v410_v60 = vld [vmem:[%s4202_s9 + $0x3b8] sm:$0xff] }
  0xa5   : > { %671 = vadd.xlane.f32.xlu2 %v670_v61  ;;  %v724_v2 = vadd.f32 %v410_v60, %v409_v59 }
  0xab   : > { %677 = vadd.xlane.f32.xlu1 %v676_v4  ;;  %v414_v4 = vld [vmem:[%s4202_s9 + $0x3d8] sm:$0xff] }
  0xac   : > { %674 = vadd.xlane.f32.xlu0 %v673_v5  ;;  %v411_v5 = vld [vmem:[%s4202_s9 + $0x3c0] sm:$0xff]  ;;  %v730_v12 = vadd.f32 %v414_v4, %v413_v3  ;;  %v438_v3 = vld [vmem:[%s4202_s9 + $0x498] sm:$0xff] }
  0xad   : > { %680 = vadd.xlane.f32.xlu2 %v679_v6  ;;  %v412_v6 = vld [vmem:[%s4202_s9 + $0x3c8] sm:$0xff]  ;;  %v435_v4 = vld [vmem:[%s4202_s9 + $0x480] sm:$0xff] }
  0xae   : > { %v4312_v13 = vpop.xlane.xlu1 %554 }
  0xaf   : > { %v4314_v14 = vpop.xlane.xlu0 %548 }
  0xb0   : > { %v4316_v15 = vpop.xlane.xlu2 %560 }
  0xb3   : > { %686 = vadd.xlane.f32.xlu1 %v685_v16  ;;  %v727_v16 = vadd.f32 %v412_v6, %v411_v5  ;;  %v436_v5 = vld [vmem:[%s4202_s9 + $0x488] sm:$0xff]  ;;  %v439_v6 = vld [vmem:[%s4202_s9 + $0x4a0] sm:$0xff] }
  0xb4   : > { %683 = vadd.xlane.f32.xlu0 %v682_v17  ;;  %v733_v17 = vadd.f32 %v416_v8, %v415_v7  ;;  %v440_v7 = vld [vmem:[%s4202_s9 + $0x4a8] sm:$0xff] }
  0xb5   : > { %689 = vadd.xlane.f32.xlu2 %v688_v18  ;;  %v419_v18 = vld [vmem:[%s4202_s9 + $0x400] sm:$0xff] }
  0xb6   : > { %v4324_v25 = vpop.xlane.xlu1 %557 }
  0xb7   : > { %v4326_v26 = vpop.xlane.xlu0 %551 }
  0xb8   : > { %v4328_v27 = vpop.xlane.xlu2 %563 }
  0xbb   : > { %695 = vadd.xlane.f32.xlu1 %v694_v28 }
  0xbc   : > { %692 = vadd.xlane.f32.xlu0 %v691_v29 }
  0xbd   : > { %698 = vadd.xlane.f32.xlu2 %v697_v30  ;;  %v739_v30 = vadd.f32 %v420_v19, %v419_v18  ;;  %v763_v18 = vadd.f32 %v436_v5, %v435_v4  ;;  %v769_v19 = vadd.f32 %v440_v7, %v439_v6  ;;  %v454_v4 = vld [vmem:[%s4202_s9 + $0x518] sm:$0xff]  ;;  %v457_v5 = vld [vmem:[%s4202_s9 + $0x530] sm:$0xff] }
  0xbe   : > { %v4336_v37 = vpop.xlane.xlu1 %569  ;;  %v458_v6 = vld [vmem:[%s4202_s9 + $0x538] sm:$0xff] }
  0xbf   : > { %v4338_v38 = vpop.xlane.xlu0 %566  ;;  %v796_v21 = vadd.f32 %v458_v6, %v457_v5 }
  0xc0   : > { %v4340_v39 = vpop.xlane.xlu2 %572 }
  0xc3   : > { %704 = vadd.xlane.f32.xlu1 %v703_v40  ;;  %v427_v40 = vld [vmem:[%s4202_s9 + $0x440] sm:$0xff] }
  0xc4   : > { %701 = vadd.xlane.f32.xlu0 %v700_v41  ;;  %v428_v41 = vld [vmem:[%s4202_s9 + $0x448] sm:$0xff] }
  0xc5   : > { %707 = vadd.xlane.f32.xlu2 %v706_v42  ;;  %v751_v47 = vadd.f32 %v428_v41, %v427_v40  ;;  %v449_v41 = vld [vmem:[%s4202_s9 + $0x4f0] sm:$0xff] }
  0xc6   : > { %v4348_v49 = vpop.xlane.xlu1 %578 }
  0xc7   : > { %v4350_v50 = vpop.xlane.xlu0 %575 }
  0xc8   : > { %v4352_v51 = vpop.xlane.xlu2 %581 }
  0xcb   : > { %713 = vadd.xlane.f32.xlu1 %v712_v52  ;;  %v432_v52 = vld [vmem:[%s4202_s9 + $0x468] sm:$0xff] }
  0xcc   : > { %710 = vadd.xlane.f32.xlu0 %v709_v53  ;;  %v429_v53 = vld [vmem:[%s4202_s9 + $0x450] sm:$0xff]  ;;  %v757_v60 = vadd.f32 %v432_v52, %v431_v48  ;;  %v451_v48 = vld [vmem:[%s4202_s9 + $0x500] sm:$0xff]  ;;  %v452_v52 = vld [vmem:[%s4202_s9 + $0x508] sm:$0xff] }
  0xcd   : > { %716 = vadd.xlane.f32.xlu2 %v715_v54  ;;  %v430_v54 = vld [vmem:[%s4202_s9 + $0x458] sm:$0xff] }
  0xce   : > { %v4360_v61 = vpop.xlane.xlu1 %587 }
  0xcf   : > { %v4362_v62 = vpop.xlane.xlu0 %584 }
  0xd0   : > { %v4364_v63 = vpop.xlane.xlu2 %590 }
  0xd1   : > { %6161 = vst [vmem:[#allocation15_spill] sm:$0xff] %v4364_v63 }
  0xd3   : > { %722 = vadd.xlane.f32.xlu1 %v721_v0  ;;  %v754_v0 = vadd.f32 %v430_v54, %v429_v53 }
  0xd4   : > { %719 = vadd.xlane.f32.xlu0 %v718_v1  ;;  %v760_v1 = vadd.f32 %v434_v56, %v433_v55 }
  0xd5   : > { %725 = vadd.xlane.f32.xlu2 %v724_v2  ;;  %v437_v2 = vld [vmem:[%s4202_s9 + $0x490] sm:$0xff] }
  0xd6   : > { %v4372_v9 = vpop.xlane.xlu1 %596 }
  0xd7   : > { %6162 = vst [vmem:[#allocation16_spill] sm:$0xff] %v4372_v9  ;;  %v4374_v10 = vpop.xlane.xlu0 %593 }
  0xd8   : > { %6163 = vst [vmem:[#allocation17_spill] sm:$0xff] %v4374_v10  ;;  %v4376_v11 = vpop.xlane.xlu2 %599 }
  0xd9   : > { %6164 = vst [vmem:[#allocation18_spill] sm:$0xff] %v4376_v11 }
  0xdb   : > { %731 = vadd.xlane.f32.xlu1 %v730_v12 }
  0xdc   : > { %728 = vadd.xlane.f32.xlu0 %v727_v16 }
  0xdd   : > { %734 = vadd.xlane.f32.xlu2 %v733_v17  ;;  %v766_v17 = vadd.f32 %v438_v3, %v437_v2  ;;  %v456_v2 = vld [vmem:[%s4202_s9 + $0x528] sm:$0xff]  ;;  %v453_v3 = vld [vmem:[%s4202_s9 + $0x510] sm:$0xff] }
  0xde   : > { %v4384_v24 = vpop.xlane.xlu1 %605  ;;  %v790_v20 = vadd.f32 %v454_v4, %v453_v3 }
  0xdf   : > { %6165 = vst [vmem:[#allocation19_spill] sm:$0xff] %v4384_v24  ;;  %v4386_v28 = vpop.xlane.xlu0 %602 }
  0xe0   : > { %6166 = vst [vmem:[#allocation20_spill] sm:$0xff] %v4386_v28  ;;  %v4388_v29 = vpop.xlane.xlu2 %608 }
  0xe1   : > { %6167 = vst [vmem:[#allocation21_spill] sm:$0xff] %v4388_v29 }
  0xe3   : > { %740 = vadd.xlane.f32.xlu1 %v739_v30  ;;  %v445_v30 = vld [vmem:[%s4202_s9 + $0x4d0] sm:$0xff] }
  0xe4   : > { %737 = vadd.xlane.f32.xlu0 %v736_v31  ;;  %v446_v31 = vld [vmem:[%s4202_s9 + $0x4d8] sm:$0xff] }
  0xe5   : > { %743 = vadd.xlane.f32.xlu2 %v742_v32  ;;  %v778_v40 = vadd.f32 %v446_v31, %v445_v30  ;;  %v459_v30 = vld [vmem:[%s4202_s9 + $0x540] sm:$0xff]  ;;  %v460_v31 = vld [vmem:[%s4202_s9 + $0x548] sm:$0xff] }
  0xe6   : > { %v4396_v42 = vpop.xlane.xlu1 %614 }
  0xe7   : > { %6168 = vst [vmem:[#allocation22_spill] sm:$0xff] %v4396_v42  ;;  %v4398_v43 = vpop.xlane.xlu0 %611 }
  0xe8   : > { %6169 = vst [vmem:[#allocation23_spill] sm:$0xff] %v4398_v43  ;;  %v4400_v44 = vpop.xlane.xlu2 %617 }
  0xe9   : > { %6170 = vst [vmem:[#allocation24_spill] sm:$0xff] %v4400_v44  ;;  %v494_v44 = vld [vmem:[%s4202_s9 + $0x658] sm:$0xff] }
  0xeb   : > { %749 = vadd.xlane.f32.xlu1 %v748_v45  ;;  %v450_v45 = vld [vmem:[%s4202_s9 + $0x4f8] sm:$0xff] }
  0xec   : > { %746 = vadd.xlane.f32.xlu0 %v745_v46  ;;  %v447_v46 = vld [vmem:[%s4202_s9 + $0x4e0] sm:$0xff]  ;;  %v784_v56 = vadd.f32 %v450_v45, %v449_v41 }
  0xed   : > { %752 = vadd.xlane.f32.xlu2 %v751_v47  ;;  %v448_v47 = vld [vmem:[%s4202_s9 + $0x4e8] sm:$0xff] }
  0xee   : > { %v4408_v57 = vpop.xlane.xlu1 %623 }
  0xef   : > { %6171 = vst [vmem:[#allocation25_spill] sm:$0xff] %v4408_v57  ;;  %v4410_v58 = vpop.xlane.xlu0 %620  ;;  %v488_v57 = vld [vmem:[%s4202_s9 + $0x628] sm:$0xff] }
  0xf0   : > { %6172 = vst [vmem:[#allocation26_spill] sm:$0xff] %v4410_v58  ;;  %v4412_v59 = vpop.xlane.xlu2 %626  ;;  %v493_v58 = vld [vmem:[%s4202_s9 + $0x650] sm:$0xff] }
  0xf1   : > { %6173 = vst [vmem:[#allocation27_spill] sm:$0xff] %v4412_v59  ;;  %v487_v59 = vld [vmem:[%s4202_s9 + $0x620] sm:$0xff] }
  0xf3   : > { %758 = vadd.xlane.f32.xlu1 %v757_v60  ;;  %v781_v60 = vadd.f32 %v448_v47, %v447_v46  ;;  %v802_v46 = vadd.f32 %v462_v23, %v461_v22  ;;  %v799_v47 = vadd.f32 %v460_v31, %v459_v30  ;;  %v474_v22 = vld [vmem:[%s4202_s9 + $0x5b8] sm:$0xff]  ;;  %v471_v23 = vld [vmem:[%s4202_s9 + $0x5a0] sm:$0xff]  ;;  %v472_v30 = vld [vmem:[%s4202_s9 + $0x5a8] sm:$0xff] }
  0xf4   : > { %755 = vadd.xlane.f32.xlu0 %v754_v0  ;;  %v787_v0 = vadd.f32 %v452_v52, %v451_v48  ;;  %v467_v52 = vld [vmem:[%s4202_s9 + $0x580] sm:$0xff] }
  0xf5   : > { %761 = vadd.xlane.f32.xlu2 %v760_v1  ;;  %v455_v1 = vld [vmem:[%s4202_s9 + $0x520] sm:$0xff] }
  0xf6   : > { %v4420_v8 = vpop.xlane.xlu1 %632  ;;  %v475_v31 = vld [vmem:[%s4202_s9 + $0x5c0] sm:$0xff] }
  0xf7   : > { %6174 = vst [vmem:[#allocation28_spill] sm:$0xff] %v4420_v8  ;;  %v4422_v12 = vpop.xlane.xlu0 %629 }
  0xf8   : > { %6175 = vst [vmem:[#allocation29_spill] sm:$0xff] %v4422_v12  ;;  %v4424_v16 = vpop.xlane.xlu2 %635  ;;  %v484_v12 = vld [vmem:[%s4202_s9 + $0x608] sm:$0xff] }
  0xf9   : > { %6176 = vst [vmem:[#allocation30_spill] sm:$0xff] %v4424_v16  ;;  %v483_v16 = vld [vmem:[%s4202_s9 + $0x600] sm:$0xff] }
  0xfb   : > { %767 = vadd.xlane.f32.xlu1 %v766_v17 }
  0xfc   : > { %764 = vadd.xlane.f32.xlu0 %v763_v18 }
  0xfd   : > { %770 = vadd.xlane.f32.xlu2 %v769_v19  ;;  %v793_v19 = vadd.f32 %v456_v2, %v455_v1  ;;  %v469_v1 = vld [vmem:[%s4202_s9 + $0x590] sm:$0xff]  ;;  %v470_v2 = vld [vmem:[%s4202_s9 + $0x598] sm:$0xff] }
  0xfe   : > { %v4432_v32 = vpop.xlane.xlu1 %641 }
  0xff   : > { %6177 = vst [vmem:[#allocation31_spill] sm:$0xff] %v4432_v32  ;;  %v4434_v33 = vpop.xlane.xlu0 %638  ;;  %v6144_v32 = vlaneseq }
 0x100   : > { %6178 = vst [vmem:[#allocation32_spill] sm:$0xff] %v4434_v33  ;;  %v4436_v34 = vpop.xlane.xlu2 %644 }
 0x103   : > { %776 = vadd.xlane.f32.xlu1 %v775_v35  ;;  %v463_v35 = vld [vmem:[%s4202_s9 + $0x560] sm:$0xff] }
 0x104   : > { %773 = vadd.xlane.f32.xlu0 %v772_v36  ;;  %v464_v36 = vld [vmem:[%s4202_s9 + $0x568] sm:$0xff] }
 0x105   : > { %779 = vadd.xlane.f32.xlu2 %v778_v40  ;;  %v805_v48 = vadd.f32 %v464_v36, %v463_v35  ;;  %v476_v35 = vld [vmem:[%s4202_s9 + $0x5c8] sm:$0xff] }
 0x106   : > { %v4444_v53 = vpop.xlane.xlu1 %650 }
 0x107   : > { %v4446_v54 = vpop.xlane.xlu0 %647 }
 0x108   : > { %v4448_v55 = vpop.xlane.xlu2 %653 }
 0x10b   : > { %785 = vadd.xlane.f32.xlu1 %v784_v56  ;;  %v468_v56 = vld [vmem:[%s4202_s9 + $0x588] sm:$0xff] }
 0x10c   : > { %782 = vadd.xlane.f32.xlu0 %v781_v60  ;;  %v465_v60 = vld [vmem:[%s4202_s9 + $0x570] sm:$0xff]  ;;  %v811_v6 = vadd.f32 %v468_v56, %v467_v52  ;;  %v817_v52 = vadd.f32 %v472_v30, %v471_v23  ;;  %v823_v56 = vadd.f32 %v476_v35, %v475_v31  ;;  %v4505_v31 = vand.u32 127, %v6144_v32 }
 0x10d   : > { %788 = vadd.xlane.f32.xlu2 %v787_v0  ;;  %v466_v0 = vld [vmem:[%s4202_s9 + $0x578] sm:$0xff] }
 0x10e   : > { %v4456_v7 = vpop.xlane.xlu1 %659  ;;  %v4511_v8 = vadd.s32 4294967288, %v4505_v31  ;;  %v4528_v32 = vadd.s32 4294967264, %v4505_v31 }
 0x10f   : > { %v4458_v17 = vpop.xlane.xlu0 %656 }
 0x110   : > { %v4460_v18 = vpop.xlane.xlu2 %662 }
 0x113   : > { %794 = vadd.xlane.f32.xlu1 %v793_v19  ;;  %v808_v19 = vadd.f32 %v466_v0, %v465_v60  ;;  %v479_v60 = vld [vmem:[%s4202_s9 + $0x5e0] sm:$0xff]  ;;  %v480_v0 = vld [vmem:[%s4202_s9 + $0x5e8] sm:$0xff] }
 0x114   : > { %791 = vadd.xlane.f32.xlu0 %v790_v20  ;;  %v814_v20 = vadd.f32 %v470_v2, %v469_v1  ;;  %v477_v1 = vld [vmem:[%s4202_s9 + $0x5d0] sm:$0xff]  ;;  %v478_v2 = vld [vmem:[%s4202_s9 + $0x5d8] sm:$0xff] }
 0x115   : > { %797 = vadd.xlane.f32.xlu2 %v796_v21  ;;  %v473_v21 = vld [vmem:[%s4202_s9 + $0x5b0] sm:$0xff]  ;;  %v826_v23 = vadd.f32 %v478_v2, %v477_v1 }
 0x116   : > { %v4468_v40 = vpop.xlane.xlu1 %668 }
 0x117   : > { %v4470_v41 = vpop.xlane.xlu0 %665 }
 0x118   : > { %v4472_v45 = vpop.xlane.xlu2 %671 }
 0x11b   : > { %803 = vadd.xlane.f32.xlu1 %v802_v46 }
 0x11c   : > { %800 = vadd.xlane.f32.xlu0 %v799_v47 }
 0x11d   : > { %806 = vadd.xlane.f32.xlu2 %v805_v48  ;;  %v820_v48 = vadd.f32 %v474_v22, %v473_v21  ;;  %v829_v22 = vadd.f32 %v480_v0, %v479_v60 }
 0x11e   : > { %v4480_v3 = vpop.xlane.xlu1 %677 }
 0x11f   : > { %v4482_v4 = vpop.xlane.xlu0 %674 }
 0x120   : > { %v4484_v5 = vpop.xlane.xlu2 %680 }
 0x123   : > { %812 = vadd.xlane.f32.xlu1 %v811_v6  ;;  %v481_v6 = vld [vmem:[%s4202_s9 + $0x5f0] sm:$0xff] }
 0x124   : > { %809 = vadd.xlane.f32.xlu0 %v808_v19  ;;  %v482_v19 = vld [vmem:[%s4202_s9 + $0x5f8] sm:$0xff] }
 0x125   : > { %815 = vadd.xlane.f32.xlu2 %v814_v20  ;;  %v832_v30 = vadd.f32 %v482_v19, %v481_v6 }
 0x126   : > { %v4492_v36 = vpop.xlane.xlu1 %686 }
 0x127   : > { %6179 = vst [vmem:[#allocation33_spill] sm:$0xff] %v4492_v36  ;;  %v4494_v46 = vpop.xlane.xlu0 %683 }
 0x128   : > { %v4496_v47 = vpop.xlane.xlu2 %689 }
 0x129   : > { %6180 = vst [vmem:[#allocation34_spill] sm:$0xff] %v4496_v47 }
 0x12b   : > { %821 = vadd.xlane.f32.xlu1 %v820_v48 }
 0x12c   : > { %818 = vadd.xlane.f32.xlu0 %v817_v52  ;;  %v485_v52 = vld [vmem:[%s4202_s9 + $0x610] sm:$0xff] }
 0x12d   : > { %824 = vadd.xlane.f32.xlu2 %v823_v56  ;;  %v486_v56 = vld [vmem:[%s4202_s9 + $0x618] sm:$0xff] }
 0x12e   : > { %v696_v20 = vpop.xlane.xlu1 %695  ;;  %v838_v19 = vadd.f32 %v486_v56, %v485_v52 }
 0x12f   : > { %v693_v33 = vpop.xlane.xlu0 %692  ;;  %v980_v35 = vmul.f32 0.00390625, %v696_v20  ;;  %v4519_v20 = vadd.s32 4294967280, %v4505_v31 }
 0x130   : > { %v699_v21 = vpop.xlane.xlu2 %698  ;;  %v979_v48 = vmul.f32 0.00390625, %v693_v33 }
 0x131   : > { %v981_v60 = vmul.f32 0.00390625, %v699_v21  ;;  %v1391_v1 = vperm.slane %v980_v35, %v4511_v8  ;;  %v4522_v21 = vadd.s32 4294967272, %v4505_v31 }
 0x132   : > { %v1390_v2 = vperm.slane %v979_v48, %v4505_v31 }
 0x133   : > { %830 = vadd.xlane.f32.xlu1 %v829_v22  ;;  %v1393_v35 = vperm.slane %v981_v60, %v4519_v20 }
 0x134   : > { %827 = vadd.xlane.f32.xlu0 %v826_v23  ;;  %v835_v23 = vadd.f32 %v484_v12, %v483_v16  ;;  %v1392_v52 = vsel %vm1270_vm0, %v1391_v1, %v1390_v2  ;;  %v492_v12 = vld [vmem:[%s4202_s9 + $0x648] sm:$0xff]  ;;  %v4539_v2 = vadd.s32 4294967256, %v4505_v31 }
 0x135   : > { %833 = vadd.xlane.f32.xlu2 %v832_v30  ;;  %v841_v30 = vadd.f32 %v488_v57, %v487_v59  ;;  %v489_v57 = vld [vmem:[%s4202_s9 + $0x630] sm:$0xff]  ;;  %v491_v59 = vld [vmem:[%s4202_s9 + $0x640] sm:$0xff]  ;;  %v1394_v60 = vsel %vm1274_vm1, %v1393_v35, %v1392_v52  ;;  %v850_v35 = vadd.f32 %v494_v44, %v493_v58  ;;  %v496_v44 = vld [vmem:[%s4202_s9 + $0x668] sm:$0xff] }
 0x136   : > { %v705_v0 = vpop.xlane.xlu1 %704  ;;  %v497_v58 = vld [vmem:[%s4202_s9 + $0x670] sm:$0xff] }
 0x137   : > { %v702_v6 = vpop.xlane.xlu0 %701  ;;  %v983_v48 = vmul.f32 0.00390625, %v705_v0 }
 0x138   : > { %v708_v33 = vpop.xlane.xlu2 %707  ;;  %v982_v22 = vmul.f32 0.00390625, %v702_v6  ;;  %v490_v6 = vld [vmem:[%s4202_s9 + $0x638] sm:$0xff] }
 0x139   : > { %v984_v16 = vmul.f32 0.00390625, %v708_v33  ;;  %v1397_v0 = vperm.slane %v983_v48, %v4528_v32  ;;  %v4543_v33 = vadd.s32 4294967248, %v4505_v31  ;;  %v844_v43 = vadd.f32 %v490_v6, %v489_v57  ;;  %v498_v57 = vld [vmem:[%s4202_s9 + $0x678] sm:$0xff] }
 0x13a   : > { %v1395_v56 = vperm.slane %v982_v22, %v4522_v21  ;;  %v856_v24 = vadd.f32 %v498_v57, %v497_v58  ;;  %v501_v57 = vld [vmem:[%s4202_s9 + $0x690] sm:$0xff] }
 0x13b   : > { %839 = vadd.xlane.f32.xlu1 %v838_v19  ;;  %v1399_v48 = vperm.slane %v984_v16, %v4539_v2 }
 0x13c   : > { %836 = vadd.xlane.f32.xlu0 %v835_v23  ;;  %v1396_v19 = vsel %vm1278_vm2, %v1395_v56, %v1394_v60 }
 0x13d   : > { %842 = vadd.xlane.f32.xlu2 %v841_v30  ;;  %v847_v30 = vadd.f32 %v492_v12, %v491_v59  ;;  %v1398_v29 = vsel %vm1282_vm3, %v1397_v0, %v1396_v19  ;;  %v4549_v59 = vadd.s32 4294967240, %v4505_v31  ;;  %v495_v12 = vld [vmem:[%s4202_s9 + $0x660] sm:$0xff] }
 0x13e   : > { %v714_v1 = vpop.xlane.xlu1 %713  ;;  %v1400_v16 = vsel %vm1286_vm4, %v1399_v48, %v1398_v29  ;;  %v499_v0 = vld [vmem:[%s4202_s9 + $0x680] sm:$0xff]  ;;  %v1074_v29 = vld [vmem:[%s6138_s1 + $0x78] sm:$0xff] }
 0x13f   : > { %v711_v22 = vpop.xlane.xlu0 %710  ;;  %v986_v52 = vmul.f32 0.00390625, %v714_v1  ;;  %v500_v1 = vld [vmem:[%s4202_s9 + $0x688] sm:$0xff]  ;;  %1646 = vmatpush.msra.mxu2 %v1074_v29  ;;  %v1071_v29 = vld [vmem:[%s6138_s1 + $0x60] sm:$0xff] }
 0x140   : > { %v717_v23 = vpop.xlane.xlu2 %716  ;;  %v985_v42 = vmul.f32 0.00390625, %v711_v22  ;;  %v859_v11 = vadd.f32 %v500_v1, %v499_v0  ;;  %v502_v1 = vld [vmem:[%s4202_s9 + $0x698] sm:$0xff] }
 0x141   : > { %v987_v60 = vmul.f32 0.00390625, %v717_v23  ;;  %v1403_v6 = vperm.slane %v986_v52, %v4549_v59 }
 0x142   : > { %v1401_v56 = vperm.slane %v985_v42, %v4543_v33  ;;  %v4560_v42 = vadd.s32 4294967232, %v4505_v31 }
 0x143   : > { %848 = vadd.xlane.f32.xlu1 %v847_v30 }
 0x144   : > { %845 = vadd.xlane.f32.xlu0 %v844_v43  ;;  %v1402_v19 = vsel %vm1290_vm5, %v1401_v56, %v1400_v16  ;;  %v4564_v43 = vadd.s32 4294967224, %v4505_v31  ;;  %v1405_v48 = vperm.slane %v987_v60, %v4560_v42  ;;  %v1072_v16 = vld [vmem:[%s6138_s1 + $0x68] sm:$0xff] }
 0x145   : > { %851 = vadd.xlane.f32.xlu2 %v850_v35  ;;  %v853_v35 = vadd.f32 %v496_v44, %v495_v12  ;;  %v1404_v56 = vsel %vm6152_vm6, %v1403_v6, %v1402_v19  ;;  %v1073_v12 = vld [vmem:[%s6138_s1 + $0x70] sm:$0xff]  ;;  %v4575_v44 = vadd.s32 4294967216, %v4505_v31  ;;  %v504_v19 = vld [vmem:[%s4202_s9 + $0x6a8] sm:$0xff] }
 0x146   : > { %v723_v22 = vpop.xlane.xlu1 %722  ;;  %1647 = vmatpush.msra.mxu2 %v1073_v12  ;;  %v1406_v6 = vsel %vm6153_vm7, %v1405_v48, %v1404_v56  ;;  %v931_v48 = vmul.f32 0.00390625, %v4314_v14 }
 0x147   : > { %v720_v23 = vpop.xlane.xlu0 %719  ;;  %v989_v52 = vmul.f32 0.00390625, %v723_v22  ;;  %v4588_v22 = vadd.s32 4294967208, %v4505_v31 }
 0x148   : > { %v726_v30 = vpop.xlane.xlu2 %725  ;;  %v988_v28 = vmul.f32 0.00390625, %v720_v23  ;;  %v505_v23 = vld [vmem:[%s4202_s9 + $0x6b0] sm:$0xff]  ;;  %1648 = vmatpush.msra.mxu2 %v1072_v16  ;;  %v1070_v16 = vld [vmem:[%s6138_s1 + $0x58] sm:$0xff] }
 0x149   : > { %v990_v60 = vmul.f32 0.00390625, %v726_v30  ;;  %v1409_v0 = vperm.slane %v989_v52, %v4575_v44  ;;  %v506_v30 = vld [vmem:[%s4202_s9 + $0x6b8] sm:$0xff]  ;;  %v4599_v52 = vadd.s32 4294967200, %v4505_v31 }
 0x14a   : > { %v1407_v58 = vperm.slane %v988_v28, %v4564_v43  ;;  %v503_v28 = vld [vmem:[%s4202_s9 + $0x6a0] sm:$0xff]  ;;  %1649 = vmatpush.msra.mxu2 %v1071_v29  ;;  %v868_v10 = vadd.f32 %v506_v30, %v505_v23  ;;  %v1068_v29 = vld [vmem:[%s6138_s1 + $0x48] sm:$0xff] }
 0x14b   : > { %857 = vadd.xlane.f32.xlu1 %v856_v24  ;;  %v1411_v56 = vperm.slane %v990_v60, %v4588_v22  ;;  %v865_v9 = vadd.f32 %v504_v19, %v503_v28  ;;  %v1069_v60 = vld [vmem:[%s6138_s1 + $0x50] sm:$0xff]  ;;  %v963_v28 = vmul.f32 0.00390625, %v4436_v34  ;;  %v964_v19 = vmul.f32 0.00390625, %v4446_v54  ;;  %v507_v30 = vld [vmem:[%s4202_s9 + $0x6c0] sm:$0xff]  ;;  %v508_v54 = vld [vmem:[%s4202_s9 + $0x6c8] sm:$0xff] }
 0x14c   : > { %854 = vadd.xlane.f32.xlu0 %v853_v35  ;;  %v1408_v24 = vsel %vm6150_vm8, %v1407_v58, %v1406_v6  ;;  %v932_v35 = vmul.f32 0.00390625, %v4326_v26  ;;  %v862_v6 = vadd.f32 %v502_v1, %v501_v57  ;;  %1650 = vmatpush.msra.mxu2 %v1070_v16  ;;  %v4611_v1 = vadd.s32 4294967192, %v4505_v31  ;;  %v512_v16 = vld [vmem:[%s4202_s9 + $0x6e8] sm:$0xff] }
 0x14d   : > { %860 = vadd.xlane.f32.xlu2 %v859_v11  ;;  %v1410_v14 = vsel %vm6149_vm9, %v1409_v0, %v1408_v24  ;;  %v871_v36 = vadd.f32 %v508_v54, %v507_v30 }
 0x14e   : > { %v732_v11 = vpop.xlane.xlu1 %731  ;;  %v1269_v57 = vperm.slane %v932_v35, %v4511_v8  ;;  %6181 = vst [vmem:[#allocation35_spill] sm:$0xff] %v4611_v1  ;;  %v1412_v24 = vsel %vm6147_vm10, %v1411_v56, %v1410_v14  ;;  %1651 = vmatpush.msra.mxu2 %v1069_v60  ;;  %v1267_v35 = vperm.slane %v931_v48, %v4505_v31  ;;  %v510_v56 = vld [vmem:[%s4202_s9 + $0x6d8] sm:$0xff]  ;;  %v1067_v48 = vld [vmem:[%s6138_s1 + $0x40] sm:$0xff]  ;;  %v934_v14 = vmul.f32 0.00390625, %v4324_v25 }
 0x14f   : > { %v729_v12 = vpop.xlane.xlu0 %728  ;;  %v992_v26 = vmul.f32 0.00390625, %v732_v11  ;;  %v509_v11 = vld [vmem:[%s4202_s9 + $0x6d0] sm:$0xff]  ;;  %v1359_v60 = vperm.slane %v963_v28, %v4505_v31  ;;  %v1066_v25 = vld [vmem:[%s6138_s1 + $0x38] sm:$0xff] }
 0x150   : > { %v735_v58 = vpop.xlane.xlu2 %734  ;;  %v991_v47 = vmul.f32 0.00390625, %v729_v12  ;;  %v4629_v12 = vadd.s32 4294967184, %v4505_v31  ;;  %1652 = vmatpush.msra.mxu2 %v1068_v29 }
 0x151   : > { %v993_v23 = vmul.f32 0.00390625, %v735_v58  ;;  %v511_v58 = vld [vmem:[%s4202_s9 + $0x6e0] sm:$0xff] }
 0x152   : > { %v1413_v0 = vperm.slane %v991_v47, %v4599_v52  ;;  %v1415_v47 = vperm.slane %v992_v26, %v4611_v1  ;;  %v874_v1 = vadd.f32 %v510_v56, %v509_v11  ;;  %1653 = vmatpush.msra.mxu2 %v1067_v48  ;;  %v1065_v11 = vld [vmem:[%s6138_s1 + $0x30] sm:$0xff]  ;;  %v1277_v56 = vperm.slane %v934_v14, %v4522_v21  ;;  %v515_v48 = vld [vmem:[%s4202_s9 + $0x700] sm:$0xff]  ;;  %v516_v14 = vld [vmem:[%s4202_s9 + $0x708] sm:$0xff] }
 0x153   : > { %866 = vadd.xlane.f32.xlu1 %v865_v9  ;;  %v933_v9 = vmul.f32 0.00390625, %v4312_v13  ;;  %v965_v13 = vmul.f32 0.00390625, %v4444_v53  ;;  %v877_v53 = vadd.f32 %v512_v16, %v511_v58  ;;  %v1064_v58 = vld [vmem:[%s6138_s1 + $0x28] sm:$0xff]  ;;  %v514_v16 = vld [vmem:[%s4202_s9 + $0x6f8] sm:$0xff] }
 0x154   : > { %v1414_v34 = vsel %vm6148_vm11, %v1413_v0, %v1412_v24  ;;  %863 = vadd.xlane.f32.xlu0 %v862_v6  ;;  %v4639_v6 = vadd.s32 4294967176, %v4505_v31  ;;  %v1360_v0 = vperm.slane %v964_v19, %v4511_v8  ;;  %v1417_v24 = vperm.slane %v993_v23, %v4629_v12  ;;  %1654 = vmatpush.msra.mxu2 %v1066_v25 }
 0x155   : > { %869 = vadd.xlane.f32.xlu2 %v868_v10  ;;  %v1271_v10 = vsel %vm1270_vm0, %v1269_v57, %v1267_v35  ;;  %v1416_v57 = vsel %vm1318_vm12, %v1415_v47, %v1414_v34  ;;  %v1273_v28 = vperm.slane %v933_v9, %v4519_v20  ;;  %v935_v19 = vmul.f32 0.00390625, %v4316_v15  ;;  %v513_v9 = vld [vmem:[%s4202_s9 + $0x6f0] sm:$0xff] }
 0x156   : > { %v741_v26 = vpop.xlane.xlu1 %740  ;;  %v966_v23 = vmul.f32 0.00390625, %v4448_v55  ;;  %v1362_v30 = vperm.slane %v965_v13, %v4519_v20  ;;  %v967_v47 = vmul.f32 0.00390625, %v4458_v17  ;;  %v1361_v55 = vsel %vm1270_vm0, %v1360_v0, %v1359_v60  ;;  %1655 = vmatpush.msra.mxu2 %v1065_v11  ;;  %v517_v60 = vld [vmem:[%s4202_s9 + $0x710] sm:$0xff]  ;;  %v518_v0 = vld [vmem:[%s4202_s9 + $0x718] sm:$0xff] }
 0x157   : > { %v738_v29 = vpop.xlane.xlu0 %737  ;;  %v1275_v15 = vsel %vm1274_vm1, %v1273_v28, %v1271_v10  ;;  %v1418_v54 = vsel %vm1322_vm13, %v1417_v24, %v1416_v57  ;;  %v936_v17 = vmul.f32 0.00390625, %v4328_v27  ;;  %v937_v13 = vmul.f32 0.00390625, %v4338_v38  ;;  %v1063_v24 = vld [vmem:[%s6138_s1 + $0x20] sm:$0xff] }
 0x158   : > { %v744_v63 = vpop.xlane.xlu2 %743  ;;  %v994_v35 = vmul.f32 0.00390625, %v738_v29  ;;  %1656 = vmatpush.msra.mxu2 %v1064_v58  ;;  %v1279_v27 = vsel %vm1278_vm2, %v1277_v56, %v1275_v15  ;;  %v968_v29 = vmul.f32 0.00390625, %v4456_v7  ;;  %v1366_v25 = vperm.slane %v967_v47, %v4528_v32 }
 0x159   : > { %v1281_v38 = vperm.slane %v935_v19, %v4528_v32  ;;  %v883_v11 = vadd.f32 %v516_v14, %v515_v48  ;;  %v1285_v56 = vperm.slane %v936_v17, %v4539_v2  ;;  %v880_v15 = vadd.f32 %v514_v16, %v513_v9 }
 0x15a   : > { %v1419_v34 = vperm.slane %v994_v35, %v4639_v6  ;;  %v995_v35 = vmul.f32 0.00390625, %v741_v26  ;;  %1657 = vmatpush.msra.mxu2 %v1063_v24  ;;  %v886_v7 = vadd.f32 %v518_v0, %v517_v60  ;;  %v938_v19 = vmul.f32 0.00390625, %v4336_v37  ;;  %v1060_v37 = vld [vmem:[%s6138_s1 + $0x8] sm:$0xff]  ;;  %v521_v60 = vld [vmem:[%s4202_s9 + $0x730] sm:$0xff]  ;;  %v522_v0 = vld [vmem:[%s4202_s9 + $0x738] sm:$0xff] }
 0x15b   : > { %875 = vadd.xlane.f32.xlu1 %v874_v1  ;;  %v1364_v1 = vperm.slane %v966_v23, %v4522_v21  ;;  %v1283_v47 = vsel %vm1282_vm3, %v1281_v38, %v1279_v27  ;;  %v969_v58 = vmul.f32 0.00390625, %v4460_v18  ;;  %v970_v17 = vmul.f32 0.00390625, %v4470_v41  ;;  %v1059_v41 = vld [vmem:[%s6138_s1] sm:$0xff]  ;;  %v524_v38 = vld [vmem:[%s4202_s9 + $0x748] sm:$0xff] }
 0x15c   : > { %872 = vadd.xlane.f32.xlu0 %v871_v36  ;;  %v4671_v10 = vsel %vm1326_vm14, %v1419_v34, %v1418_v54  ;;  %v1363_v36 = vsel %vm1274_vm1, %v1362_v30, %v1361_v55  ;;  %v1062_v34 = vld [vmem:[%s6138_s1 + $0x18] sm:$0xff]  ;;  %v1061_v55 = vld [vmem:[%s6138_s1 + $0x10] sm:$0xff]  ;;  %v1368_v54 = vperm.slane %v968_v29, %v4539_v2  ;;  %v1421_v16 = vperm.slane %v995_v35, %v4505_v31 }
 0x15d   : > { %878 = vadd.xlane.f32.xlu2 %v877_v53  ;;  %v996_v53 = vmul.f32 0.00390625, %v744_v63  ;;  %v1289_v63 = vperm.slane %v937_v13, %v4543_v33  ;;  %v1365_v26 = vsel %vm1278_vm2, %v1364_v1, %v1363_v36  ;;  %1658 = vmatpush.msra.mxu2 %v1062_v34  ;;  %v519_v13 = vld [vmem:[%s4202_s9 + $0x720] sm:$0xff]  ;;  %v1287_v1 = vsel %vm1286_vm4, %v1285_v56, %v1283_v47 }
 0x15e   : > { %v750_v57 = vpop.xlane.xlu1 %749  ;;  %v1367_v9 = vsel %vm1282_vm3, %v1366_v25, %v1365_v26  ;;  %v1293_v24 = vperm.slane %v938_v19, %v4549_v59  ;;  %v939_v36 = vmul.f32 0.00390625, %v4340_v39  ;;  %v940_v29 = vmul.f32 0.00390625, %v4350_v50  ;;  %v520_v25 = vld [vmem:[%s4202_s9 + $0x728] sm:$0xff] }
 0x15f   : > { %v747_v28 = vpop.xlane.xlu0 %746  ;;  %v1422_v48 = vperm.slane %v996_v53, %v4511_v8  ;;  %v998_v14 = vmul.f32 0.00390625, %v750_v57  ;;  %1659 = vmatpush.msra.mxu2 %v1061_v55  ;;  %v1291_v27 = vsel %vm1290_vm5, %v1289_v63, %v1287_v1  ;;  %v523_v57 = vld [vmem:[%s4202_s9 + $0x740] sm:$0xff]  ;;  %v1369_v35 = vsel %vm1286_vm4, %v1368_v54, %v1367_v9 }
 0x160   : > { %v753_v23 = vpop.xlane.xlu2 %752  ;;  %v997_v30 = vmul.f32 0.00390625, %v747_v28  ;;  %v1370_v53 = vperm.slane %v969_v58, %v4543_v33  ;;  %v971_v28 = vmul.f32 0.00390625, %v4468_v40  ;;  %v1372_v56 = vperm.slane %v970_v17, %v4549_v59  ;;  %v527_v1 = vld [vmem:[%s4202_s9 + $0x760] sm:$0xff] }
 0x161   : > { %1660 = vmatpush.msra.mxu2 %v1060_v37  ;;  %v1426_v39 = vperm.slane %v998_v14, %v4522_v21  ;;  %v889_v63 = vadd.f32 %v520_v25, %v519_v13  ;;  %v895_v26 = vadd.f32 %v524_v38, %v523_v57  ;;  %v1295_v55 = vsel %vm6152_vm6, %v1293_v24, %v1291_v27  ;;  %v526_v27 = vld [vmem:[%s4202_s9 + $0x758] sm:$0xff] }
 0x162   : > { %v1424_v18 = vperm.slane %v997_v30, %v4519_v20  ;;  %v1423_v30 = vsel %vm1270_vm0, %v1422_v48, %v1421_v16  ;;  %v1297_v40 = vperm.slane %v939_v36, %v4560_v42  ;;  %v1301_v54 = vperm.slane %v940_v29, %v4564_v43  ;;  %v529_v36 = vld [vmem:[%s4202_s9 + $0x770] sm:$0xff]  ;;  %v530_v29 = vld [vmem:[%s4202_s9 + $0x778] sm:$0xff] }
 0x163   : > { %884 = vadd.xlane.f32.xlu1 %v883_v11  ;;  %v999_v11 = vmul.f32 0.00390625, %v753_v23  ;;  %1661 = vmatpush.msra.mxu2 %v1059_v41  ;;  %v941_v23 = vmul.f32 0.00390625, %v4348_v49  ;;  %v972_v9 = vmul.f32 0.00390625, %v4472_v45  ;;  %v1371_v17 = vsel %vm1290_vm5, %v1370_v53, %v1369_v35  ;;  %v525_v45 = vld [vmem:[%s4202_s9 + $0x750] sm:$0xff] }
 0x164   : > { %881 = vadd.xlane.f32.xlu0 %v880_v15  ;;  %v1425_v47 = vsel %vm1274_vm1, %v1424_v18, %v1423_v30  ;;  %v1374_v16 = vperm.slane %v971_v28, %v4560_v42  ;;  %v1373_v49 = vsel %vm6152_vm6, %v1372_v56, %v1371_v17  ;;  %v973_v13 = vmul.f32 0.00390625, %v4482_v4  ;;  %v528_v18 = vld [vmem:[%s4202_s9 + $0x768] sm:$0xff] }
 0x165   : > { %887 = vadd.xlane.f32.xlu2 %v886_v7  ;;  %v892_v7 = vadd.f32 %v522_v0, %v521_v60  ;;  %v1428_v58 = vperm.slane %v999_v11, %v4528_v32  ;;  %v1427_v48 = vsel %vm1278_vm2, %v1426_v39, %v1425_v47  ;;  %v1299_v60 = vsel %vm6153_vm7, %v1297_v40, %v1295_v55 }
 0x166   : > { %v759_v34 = vpop.xlane.xlu1 %758  ;;  %v1305_v0 = vperm.slane %v941_v23, %v4575_v44  ;;  %v942_v41 = vmul.f32 0.00390625, %v4352_v51  ;;  %v1303_v25 = vsel %vm6150_vm8, %v1301_v54, %v1299_v60  ;;  %v1376_v57 = vperm.slane %v972_v9, %v4564_v43  ;;  %v1089_v54 = vld [vmem:[%s6138_s1 + $0xf0] sm:$0xff]  ;;  %v536_v60 = vld [vmem:[%s4202_s9 + $0x7a8] sm:$0xff] }
 0x167   : > { %v756_v15 = vpop.xlane.xlu0 %755  ;;  %v1001_v37 = vmul.f32 0.00390625, %v759_v34  ;;  %v1429_v4 = vsel %vm1282_vm3, %v1428_v58, %v1427_v48  ;;  %v1375_v53 = vsel %vm6153_vm7, %v1374_v16, %v1373_v49  ;;  %v974_v28 = vmul.f32 0.00390625, %v4480_v3  ;;  %v533_v48 = vld [vmem:[%s4202_s9 + $0x790] sm:$0xff]  ;;  %v1088_v49 = vld [vmem:[%s6138_s1 + $0xe8] sm:$0xff] }
 0x168   : > { %v762_v50 = vpop.xlane.xlu2 %761  ;;  %v1000_v19 = vmul.f32 0.00390625, %v756_v15  ;;  %v901_v56 = vadd.f32 %v528_v18, %v527_v1  ;;  %v1378_v30 = vperm.slane %v973_v13, %v4575_v44  ;;  %v898_v15 = vadd.f32 %v526_v27, %v525_v45  ;;  %v535_v18 = vld [vmem:[%s4202_s9 + $0x7a0] sm:$0xff] }
 0x169   : > { %v1002_v24 = vmul.f32 0.00390625, %v762_v50  ;;  %v1432_v38 = vperm.slane %v1001_v37, %v4543_v33  ;;  %v904_v50 = vadd.f32 %v530_v29, %v529_v36  ;;  %v1307_v47 = vsel %vm6149_vm9, %v1305_v0, %v1303_v25 }
 0x16a   : > { %v1430_v14 = vperm.slane %v1000_v19, %v4539_v2  ;;  %v1309_v3 = vperm.slane %v942_v41, %v4588_v22  ;;  %v975_v55 = vmul.f32 0.00390625, %v4484_v5  ;;  %v1377_v9 = vsel %vm6150_vm8, %v1376_v57, %v1375_v53  ;;  %v532_v5 = vld [vmem:[%s4202_s9 + $0x788] sm:$0xff] }
 0x16b   : > { %893 = vadd.xlane.f32.xlu1 %v892_v7  ;;  %v1090_v7 = vld [vmem:[%s6138_s1 + $0xf8] sm:$0xff]  ;;  %v1434_v19 = vperm.slane %v1002_v24, %v4549_v59  ;;  %v1380_v58 = vperm.slane %v974_v28, %v4588_v22  ;;  %v976_v37 = vmul.f32 0.00390625, %v4494_v46  ;;  %v1379_v17 = vsel %vm6149_vm9, %v1378_v30, %v1377_v9  ;;  %v6183_v57 = vld [vmem:[#allocation35_spill] sm:$0xff] }
 0x16c   : > { %890 = vadd.xlane.f32.xlu0 %v889_v63  ;;  %v1431_v11 = vsel %vm1286_vm4, %v1430_v14, %v1429_v4  ;;  %1666 = vmatpush.msra.mxu3 %v1090_v7  ;;  %v534_v14 = vld [vmem:[%s4202_s9 + $0x798] sm:$0xff]  ;;  %v1311_v13 = vsel %vm6147_vm10, %v1309_v3, %v1307_v47  ;;  %v944_v46 = vmul.f32 0.00390625, %v4360_v61  ;;  %v1382_v41 = vperm.slane %v975_v55, %v4599_v52  ;;  %v1087_v61 = vld [vmem:[%s6138_s1 + $0xe0] sm:$0xff] }
 0x16d   : > { %896 = vadd.xlane.f32.xlu2 %v895_v26  ;;  %v943_v26 = vmul.f32 0.00390625, %v4362_v62  ;;  %v1433_v40 = vsel %vm1290_vm5, %v1432_v38, %v1431_v11  ;;  %v531_v62 = vld [vmem:[%s4202_s9 + $0x780] sm:$0xff]  ;;  %v6182_v24 = vld [vmem:[#allocation33_spill] sm:$0xff]  ;;  %v1381_v25 = vsel %vm6147_vm10, %v1380_v58, %v1379_v17  ;;  %v1384_v4 = vperm.slane %v976_v37, %v6183_v57 }
 0x16e   : > { %v768_v35 = vpop.xlane.xlu1 %767  ;;  %1667 = vmatpush.msra.mxu3 %v1089_v54  ;;  %v1435_v45 = vsel %vm6152_vm6, %v1434_v19, %v1433_v40  ;;  %v977_v27 = vmul.f32 0.00390625, %v6182_v24  ;;  %v907_v53 = vadd.f32 %v532_v5, %v531_v62  ;;  %v910_v28 = vadd.f32 %v534_v14, %v533_v48  ;;  %v1086_v30 = vld [vmem:[%s6138_s1 + $0xd8] sm:$0xff]  ;;  %v537_v37 = vld [vmem:[%s4202_s9 + $0x7b0] sm:$0xff]  ;;  %v540_v48 = vld [vmem:[%s4202_s9 + $0x7c8] sm:$0xff] }
 0x16f   : > { %v765_v51 = vpop.xlane.xlu0 %764  ;;  %v1004_v63 = vmul.f32 0.00390625, %v768_v35  ;;  %v1313_v0 = vperm.slane %v943_v26, %v4599_v52  ;;  %v6185_v7 = vld [vmem:[#allocation17_spill] sm:$0xff]  ;;  %v1383_v19 = vsel %vm6148_vm11, %v1382_v41, %v1381_v25  ;;  %v6186_v26 = vld [vmem:[#allocation34_spill] sm:$0xff]  ;;  %v1084_v14 = vld [vmem:[%s6138_s1 + $0xc8] sm:$0xff] }
 0x170   : > { %v771_v34 = vpop.xlane.xlu2 %770  ;;  %v1003_v39 = vmul.f32 0.00390625, %v765_v51  ;;  %1668 = vmatpush.msra.mxu3 %v1088_v49  ;;  %v4802_v47 = vmul.f32 0.00390625, %v6185_v7  ;;  %v978_v55 = vmul.f32 0.00390625, %v6186_v26  ;;  %v1385_v9 = vsel %vm1318_vm12, %v1384_v4, %v1383_v19  ;;  %v538_v62 = vld [vmem:[%s4202_s9 + $0x7b8] sm:$0xff]  ;;  %v1083_v24 = vld [vmem:[%s6138_s1 + $0xc0] sm:$0xff]  ;;  %v545_v19 = vld [vmem:[%s4202_s9 + $0x7f0] sm:$0xff] }
 0x171   : > { %v1005_v16 = vmul.f32 0.00390625, %v771_v34  ;;  %v1438_v1 = vperm.slane %v1004_v63, %v4564_v43  ;;  %v1386_v63 = vperm.slane %v977_v27, %v4629_v12  ;;  %v1315_v54 = vsel %vm6148_vm11, %v1313_v0, %v1311_v13  ;;  %v1080_v26 = vld [vmem:[%s6138_s1 + $0xa8] sm:$0xff] }
 0x172   : > { %v1436_v23 = vperm.slane %v1003_v39, %v4560_v42  ;;  %1669 = vmatpush.msra.mxu3 %v1087_v61  ;;  %v1317_v39 = vperm.slane %v944_v46, %v6183_v57  ;;  %v541_v46 = vld [vmem:[%s4202_s9 + $0x7d0] sm:$0xff]  ;;  %v916_v25 = vadd.f32 %v538_v62, %v537_v37 }
 0x173   : > { %902 = vadd.xlane.f32.xlu1 %v901_v56  ;;  %v1440_v11 = vperm.slane %v1005_v16, %v4575_v44  ;;  %v913_v56 = vadd.f32 %v536_v60, %v535_v18  ;;  %v539_v16 = vld [vmem:[%s4202_s9 + $0x7c0] sm:$0xff]  ;;  %v1325_v18 = vperm.slane %v4802_v47, %v4639_v6  ;;  %v1388_v60 = vperm.slane %v978_v55, %v4639_v6  ;;  %v6191_v62 = vld [vmem:[#allocation20_spill] sm:$0xff] }
 0x174   : > { %899 = vadd.xlane.f32.xlu0 %v898_v15  ;;  %v1437_v36 = vsel %vm6153_vm7, %v1436_v23, %v1435_v45  ;;  %v6184_v15 = vld [vmem:[#allocation15_spill] sm:$0xff]  ;;  %1670 = vmatpush.msra.mxu3 %v1086_v30  ;;  %v1085_v23 = vld [vmem:[%s6138_s1 + $0xd0] sm:$0xff]  ;;  %v542_v45 = vld [vmem:[%s4202_s9 + $0x7d8] sm:$0xff]  ;;  %v1387_v41 = vsel %vm1322_vm13, %v1386_v63, %v1385_v9  ;;  %v919_v4 = vadd.f32 %v540_v48, %v539_v16 }
 0x175   : > { %905 = vadd.xlane.f32.xlu2 %v904_v50  ;;  %v945_v50 = vmul.f32 0.00390625, %v6184_v15  ;;  %v1439_v3 = vsel %vm6150_vm8, %v1438_v1, %v1437_v36  ;;  %v1319_v1 = vsel %vm1318_vm12, %v1317_v39, %v1315_v54  ;;  %vm4851_vm8 = vmneg %vm6151_vm15  ;;  %v546_v63 = vld [vmem:[%s4202_s9 + $0x7f8] sm:$0xff]  ;;  %v543_v9 = vld [vmem:[%s4202_s9 + $0x7e0] sm:$0xff]  ;;  %vm6202_vm15 = vcmask 654912  }
 0x176   : > { %v777_v29 = vpop.xlane.xlu1 %776  ;;  %1671 = vmatpush.msra.mxu3 %v1085_v23  ;;  %v1441_v5 = vsel %vm6149_vm9, %v1440_v11, %v1439_v3  ;;  %vm1485_vm9 = vcmask 1043459   ;;  %v6190_v55 = vld [vmem:[#allocation18_spill] sm:$0xff] }
 0x177   : > { %v774_v38 = vpop.xlane.xlu0 %773  ;;  %v1007_v51 = vmul.f32 0.00390625, %v777_v29  ;;  %v1321_v49 = vperm.slane %v945_v50, %v4629_v12  ;;  %v6189_v50 = vld [vmem:[#allocation16_spill] sm:$0xff]  ;;  %v1079_v48 = vld [vmem:[%s6138_s1 + $0xa0] sm:$0xff] }
 0x178   : > { %v780_v35 = vpop.xlane.xlu2 %779  ;;  %v1006_v34 = vmul.f32 0.00390625, %v774_v38  ;;  %1672 = vmatpush.msra.mxu3 %v1084_v14  ;;  %v947_v7 = vmul.f32 0.00390625, %v6189_v50 }
 0x179   : > { %v1008_v58 = vmul.f32 0.00390625, %v780_v35  ;;  %v1444_v17 = vperm.slane %v1007_v51, %v4599_v52  ;;  %v1323_v30 = vsel %vm1322_vm13, %v1321_v49, %v1319_v1 }
 0x17a   : > { %v1442_v40 = vperm.slane %v1006_v34, %v4588_v22  ;;  %1673 = vmatpush.msra.mxu3 %v1083_v24  ;;  %v4843_v34 = vsel %vm1326_vm14, %v1388_v60, %v1387_v41  ;;  %v1327_v47 = vsel %vm1326_vm14, %v1325_v18, %v1323_v30  ;;  %v1328_v41 = vperm.slane %v947_v7, %v4505_v31  ;;  %v1075_v30 = vld [vmem:[%s6138_s1 + $0x80] sm:$0xff] }
 0x17b   : > { %911 = vadd.xlane.f32.xlu1 %v910_v28  ;;  %v1446_v27 = vperm.slane %v1008_v58, %v6183_v57  ;;  %v1082_v28 = vld [vmem:[%s6138_s1 + $0xb8] sm:$0xff]  ;;  %v544_v58 = vld [vmem:[%s4202_s9 + $0x7e8] sm:$0xff] }
 0x17c   : > { %908 = vadd.xlane.f32.xlu0 %v907_v53  ;;  %v1443_v13 = vsel %vm6147_vm10, %v1442_v40, %v1441_v5  ;;  %v922_v53 = vadd.f32 %v542_v45, %v541_v46  ;;  %1674 = vmatpush.msra.mxu3 %v1082_v28  ;;  %vm1483_vm10 = vcmask 1042434   ;;  %v948_v40 = vmul.f32 0.00390625, %v6190_v55  ;;  %v1106_v45 = vld [vmem:[%s6138_s1 + $0x178] sm:$0xff]  ;;  %v6194_v7 = vld [vmem:[#allocation23_spill] sm:$0xff] }
 0x17d   : > { %914 = vadd.xlane.f32.xlu2 %v913_v56  ;;  %v1445_v38 = vsel %vm6148_vm11, %v1444_v17, %v1443_v13  ;;  %v1081_v56 = vld [vmem:[%s6138_s1 + $0xb0] sm:$0xff]  ;;  %vm1588_vm11 = vcmask 1041409   ;;  %v1484_v54 = vsel %vm1483_vm10, %v4843_v34, %v1327_v47  ;;  %v949_v5 = vmul.f32 0.00390625, %v6191_v62  ;;  %1606 = vmatpush.msra.mxu0 %v1106_v45 }
 0x17e   : > { %v786_v0 = vpop.xlane.xlu1 %785  ;;  %v1447_v39 = vsel %vm1318_vm12, %v1446_v27, %v1445_v38  ;;  %1675 = vmatpush.msra.mxu3 %v1081_v56  ;;  %v1598_v37 = vsel %vm1588_vm11, %v4843_v34, %v1327_v47  ;;  %v928_v46 = vadd.f32 %v546_v63, %v545_v19  ;;  %v925_v60 = vadd.f32 %v544_v58, %v543_v9  ;;  %v6192_v27 = vld [vmem:[#allocation19_spill] sm:$0xff]  ;;  %v6195_v58 = vld [vmem:[#allocation22_spill] sm:$0xff] }
 0x17f   : > { %v1010_v36 = vmul.f32 0.00390625, %v786_v0  ;;  %v783_v29 = vpop.xlane.xlu0 %782  ;;  %v1078_v0 = vld [vmem:[%s6138_s1 + $0x98] sm:$0xff]  ;;  %v1329_v24 = vperm.slane %v948_v40, %v4511_v8  ;;  %v1104_v38 = vld [vmem:[%s6138_s1 + $0x168] sm:$0xff]  ;;  %v1103_v56 = vld [vmem:[%s6138_s1 + $0x160] sm:$0xff]  ;;  %v952_v47 = vmul.f32 0.00390625, %v6194_v7 }
 0x180   : > { %v789_v61 = vpop.xlane.xlu2 %788  ;;  %v1009_v35 = vmul.f32 0.00390625, %v783_v29  ;;  %1676 = vmatpush.msra.mxu3 %v1080_v26  ;;  %v1105_v29 = vld [vmem:[%s6138_s1 + $0x170] sm:$0xff] }
 0x181   : > { %v1450_v11 = vperm.slane %v1010_v36, %v4639_v6  ;;  %v1011_v1 = vmul.f32 0.00390625, %v789_v61  ;;  %v950_v36 = vmul.f32 0.00390625, %v6192_v27  ;;  %v1331_v61 = vperm.slane %v949_v5, %v4519_v20  ;;  %1607 = vmatpush.msra.mxu0 %v1105_v29 }
 0x182   : > { %v1448_v51 = vperm.slane %v1009_v35, %v4629_v12  ;;  %1677 = vmatpush.msra.mxu3 %v1079_v48  ;;  %v6193_v35 = vld [vmem:[#allocation21_spill] sm:$0xff] }
 0x183   : > { %920 = vadd.xlane.f32.xlu1 %v919_v4  ;;  %v1452_v28 = vperm.slane %v1011_v1, %v4505_v31  ;;  %1608 = vmatpush.msra.mxu0 %v1104_v38  ;;  %v1333_v50 = vperm.slane %v950_v36, %v4522_v21  ;;  %v1101_v48 = vld [vmem:[%s6138_s1 + $0x150] sm:$0xff] }
 0x184   : > { %917 = vadd.xlane.f32.xlu0 %v916_v25  ;;  %v1449_v3 = vsel %vm1322_vm13, %v1448_v51, %v1447_v39  ;;  %1678 = vmatpush.msra.mxu3 %v1078_v0  ;;  %v1077_v25 = vld [vmem:[%s6138_s1 + $0x90] sm:$0xff]  ;;  %v1076_v51 = vld [vmem:[%s6138_s1 + $0x88] sm:$0xff]  ;;  %v1330_v39 = vsel %vm1270_vm0, %v1329_v24, %v1328_v41  ;;  %v6197_v24 = vld [vmem:[#allocation26_spill] sm:$0xff] }
 0x185   : > { %923 = vadd.xlane.f32.xlu2 %v922_v53  ;;  %v4865_v23 = vsel %vm1326_vm14, %v1450_v11, %v1449_v3  ;;  %v951_v53 = vmul.f32 0.00390625, %v6193_v35  ;;  %v1332_v3 = vsel %vm1274_vm1, %v1331_v61, %v1330_v39  ;;  %1609 = vmatpush.msra.mxu0 %v1103_v56  ;;  %v955_v27 = vmul.f32 0.00390625, %v6197_v24  ;;  %v1099_v61 = vld [vmem:[%s6138_s1 + $0x140] sm:$0xff] }
 0x186   : > { %v795_v17 = vpop.xlane.xlu1 %794  ;;  %v1486_v16 = vsel %vm1485_vm9, %v4865_v23, %v1484_v54  ;;  %v4881_v14 = vsel %vm1483_vm10, %v4865_v23, %v1598_v37  ;;  %1679 = vmatpush.msra.mxu3 %v1077_v25  ;;  %v1102_v54 = vld [vmem:[%s6138_s1 + $0x158] sm:$0xff]  ;;  %v953_v37 = vmul.f32 0.00390625, %v6195_v58 }
 0x187   : > { %3356 = vmatmul.msk.f32.vlgmr.msra.gmra.mxu2 %vm4851_vm8, %v1486_v16  ;;  %v792_v49 = vpop.xlane.xlu0 %791  ;;  %v1013_v4 = vmul.f32 0.00390625, %v795_v17  ;;  %v1335_v9 = vperm.slane %v951_v53, %v4528_v32  ;;  %1610 = vmatpush.msra.mxu0 %v1102_v54  ;;  %v1334_v17 = vsel %vm1278_vm2, %v1333_v50, %v1332_v3  ;;  %v1337_v16 = vperm.slane %v952_v47, %v4539_v2  ;;  %v6198_v53 = vld [vmem:[#allocation25_spill] sm:$0xff] }
 0x188   : > { %v798_v13 = vpop.xlane.xlu2 %797  ;;  %v1012_v18 = vmul.f32 0.00390625, %v792_v49  ;;  %1680 = vmatpush.msra.mxu3 %v1076_v51  ;;  %v1339_v41 = vperm.slane %v953_v37, %v4543_v33  ;;  %v1343_v50 = vperm.slane %v955_v27, %v4560_v42  ;;  %v6200_v58 = vld [vmem:[#allocation29_spill] sm:$0xff] }
 0x189   : > { %v1014_v19 = vmul.f32 0.00390625, %v798_v13  ;;  %v1455_v26 = vperm.slane %v1013_v4, %v4519_v20  ;;  %1611 = vmatpush.msra.mxu0 %v1101_v48  ;;  %v1336_v0 = vsel %vm1282_vm3, %v1335_v9, %v1334_v17  ;;  %v958_v37 = vmul.f32 0.00390625, %v6200_v58  ;;  %v1094_v27 = vld [vmem:[%s6138_s1 + $0x118] sm:$0xff] }
 0x18a   : > { %v1453_v11 = vperm.slane %v1012_v18, %v4511_v8  ;;  %1681 = vmatpush.msra.mxu3 %v1075_v30  ;;  %v1338_v36 = vsel %vm1286_vm4, %v1337_v16, %v1336_v0  ;;  %v1098_v30 = vld [vmem:[%s6138_s1 + $0x138] sm:$0xff] }
 0x18b   : > { %929 = vadd.xlane.f32.xlu1 %v928_v46  ;;  %v1457_v49 = vperm.slane %v1014_v19, %v4522_v21  ;;  %v6196_v46 = vld [vmem:[#allocation24_spill] sm:$0xff]  ;;  %v1340_v39 = vsel %vm1290_vm5, %v1339_v41, %v1338_v36  ;;  %v1349_v0 = vperm.slane %v958_v37, %v4588_v22 }
 0x18c   : > { %926 = vadd.xlane.f32.xlu0 %v925_v60  ;;  %v1454_v62 = vsel %vm1270_vm0, %v1453_v11, %v1452_v28  ;;  %v954_v45 = vmul.f32 0.00390625, %v6196_v46  ;;  %v1100_v60 = vld [vmem:[%s6138_s1 + $0x148] sm:$0xff]  ;;  %v956_v28 = vmul.f32 0.00390625, %v6198_v53  ;;  %v1097_v19 = vld [vmem:[%s6138_s1 + $0x130] sm:$0xff] }
 0x18d   : > { %v1456_v1 = vsel %vm1274_vm1, %v1455_v26, %v1454_v62  ;;  %1612 = vmatpush.msra.mxu0 %v1100_v60  ;;  %v1096_v62 = vld [vmem:[%s6138_s1 + $0x128] sm:$0xff] }
 0x18e   : > { %v804_v63 = vpop.xlane.xlu1 %803  ;;  %v1458_v25 = vsel %vm1278_vm2, %v1457_v49, %v1456_v1  ;;  %v1341_v35 = vperm.slane %v954_v45, %v4549_v59  ;;  %v1345_v9 = vperm.slane %v956_v28, %v4564_v43  ;;  %v1095_v49 = vld [vmem:[%s6138_s1 + $0x120] sm:$0xff]  ;;  %v6201_v46 = vld [vmem:[#allocation28_spill] sm:$0xff] }
 0x18f   : > { %v801_v55 = vpop.xlane.xlu0 %800  ;;  %v1016_v13 = vmul.f32 0.00390625, %v804_v63  ;;  %1613 = vmatpush.msra.mxu0 %v1099_v61  ;;  %v6199_v63 = vld [vmem:[#allocation27_spill] sm:$0xff]  ;;  %v959_v45 = vmul.f32 0.00390625, %v6201_v46 }
 0x190   : > { %v807_v40 = vpop.xlane.xlu2 %806  ;;  %v1015_v5 = vmul.f32 0.00390625, %v801_v55  ;;  %v957_v26 = vmul.f32 0.00390625, %v6199_v63  ;;  %v1342_v54 = vsel %vm6152_vm6, %v1341_v35, %v1340_v39  ;;  %v1093_v35 = vld [vmem:[%s6138_s1 + $0x110] sm:$0xff] }
 0x191   : > { %v1017_v29 = vmul.f32 0.00390625, %v807_v40  ;;  %v1461_v4 = vperm.slane %v1016_v13, %v4539_v2  ;;  %1614 = vmatpush.msra.mxu0 %v1098_v30  ;;  %v1351_v28 = vperm.slane %v959_v45, %v4599_v52 }
 0x192   : > { %v1459_v18 = vperm.slane %v1015_v5, %v4528_v32  ;;  %v1344_v5 = vsel %vm6153_vm7, %v1343_v50, %v1342_v54  ;;  %v1347_v13 = vperm.slane %v957_v26, %v4575_v44  ;;  %v1092_v50 = vld [vmem:[%s6138_s1 + $0x108] sm:$0xff] }
 0x193   : > { %v1463_v47 = vperm.slane %v1017_v29, %v4543_v33  ;;  %1615 = vmatpush.msra.mxu0 %v1097_v19  ;;  %v1346_v60 = vsel %vm6202_vm15, %v1345_v9, %v1344_v5  ;;  %vm6204_vm15 = vcmask 720512   ;;  %v6208_v19 = vld [vmem:[#allocation31_spill] sm:$0xff] }
 0x194   : > { %v1460_v11 = vsel %vm1282_vm3, %v1459_v18, %v1458_v25  ;;  %v6203_v25 = vld [vmem:[#allocation30_spill] sm:$0xff]  ;;  %v1348_v53 = vsel %vm6204_vm15, %v1347_v13, %v1346_v60  ;;  %v962_v63 = vmul.f32 0.00390625, %v6208_v19  ;;  %v1137_v13 = vld [vmem:[%s6138_s1 + $0x270] sm:$0xff] }
 0x195   : > { %v1462_v55 = vsel %vm1286_vm4, %v1461_v4, %v1460_v11  ;;  %1616 = vmatpush.msra.mxu0 %v1096_v62  ;;  %v960_v4 = vmul.f32 0.00390625, %v6203_v25  ;;  %v6205_v11 = vld [vmem:[#allocation32_spill] sm:$0xff]  ;;  %v1134_v25 = vld [vmem:[%s6138_s1 + $0x258] sm:$0xff]  ;;  %v1131_v19 = vld [vmem:[%s6138_s1 + $0x240] sm:$0xff] }
 0x196   : > { %v813_v38 = vpop.xlane.xlu1 %812  ;;  %v1464_v16 = vsel %vm1290_vm5, %v1463_v47, %v1462_v55  ;;  %v1091_v55 = vld [vmem:[%s6138_s1 + $0x100] sm:$0xff]  ;;  %v1357_v45 = vperm.slane %v962_v63, %v4639_v6 }
 0x197   : > { %v810_v51 = vpop.xlane.xlu0 %809  ;;  %v1019_v3 = vmul.f32 0.00390625, %v813_v38  ;;  %1617 = vmatpush.msra.mxu0 %v1095_v49  ;;  %v1119_v63 = vld [vmem:[%s6138_s1 + $0x1e0] sm:$0xff] }
 0x198   : > { %v816_v56 = vpop.xlane.xlu2 %815  ;;  %v1018_v7 = vmul.f32 0.00390625, %v810_v51  ;;  %v961_v51 = vmul.f32 0.00390625, %v6205_v11 }
 0x199   : > { %v1020_v17 = vmul.f32 0.00390625, %v816_v56  ;;  %v1467_v48 = vperm.slane %v1019_v3, %v4560_v42  ;;  %1618 = vmatpush.msra.mxu0 %v1094_v27  ;;  %v1353_v3 = vperm.slane %v960_v4, %v6183_v57 }
 0x19a   : > { %v1465_v40 = vperm.slane %v1018_v7, %v4549_v59  ;;  %v1355_v9 = vperm.slane %v961_v51, %v4629_v12 }
 0x19b   : > { %v1469_v36 = vperm.slane %v1020_v17, %v4564_v43  ;;  %1619 = vmatpush.msra.mxu0 %v1093_v35 }
 0x19c   : > { %v1466_v1 = vsel %vm6152_vm6, %v1465_v40, %v1464_v16  ;;  %vm6206_vm6 = vcmask 786112   ;;  %v1138_v40 = vld [vmem:[%s6138_s1 + $0x278] sm:$0xff] }
 0x19d   : > { %v1468_v38 = vsel %vm6153_vm7, %v1467_v48, %v1466_v1  ;;  %v1350_v30 = vsel %vm6206_vm6, %v1349_v0, %v1348_v53  ;;  %vm6207_vm7 = vcmask 654912   ;;  %1620 = vmatpush.msra.mxu0 %v1092_v50  ;;  %vm6209_vm6 = vcmask 851712   ;;  %v1121_v50 = vld [vmem:[%s6138_s1 + $0x1f0] sm:$0xff] }
 0x19e   : > { %v822_v18 = vpop.xlane.xlu1 %821  ;;  %v1470_v7 = vsel %vm6207_vm7, %v1469_v36, %v1468_v38  ;;  %v1352_v54 = vsel %vm6209_vm6, %v1351_v28, %v1350_v30  ;;  %vm6210_vm7 = vcmask 786112   ;;  %v1135_v36 = vld [vmem:[%s6138_s1 + $0x260] sm:$0xff]  ;;  %v1122_v30 = vld [vmem:[%s6138_s1 + $0x1f8] sm:$0xff] }
 0x19f   : > { %v819_v41 = vpop.xlane.xlu0 %818  ;;  %v1022_v29 = vmul.f32 0.00390625, %v822_v18  ;;  %1621 = vmatpush.msra.mxu0 %v1091_v55  ;;  %v1354_v46 = vsel %vm1318_vm12, %v1353_v3, %v1352_v54  ;;  %1626 = vmatpush.msra.mxu1 %v1122_v30  ;;  %v1120_v3 = vld [vmem:[%s6138_s1 + $0x1e8] sm:$0xff] }
 0x1a0   : > { %v825_v24 = vpop.xlane.xlu2 %824  ;;  %v1021_v61 = vmul.f32 0.00390625, %v819_v41  ;;  %v1356_v18 = vsel %vm1322_vm13, %v1355_v9, %v1354_v46  ;;  %v1136_v41 = vld [vmem:[%s6138_s1 + $0x268] sm:$0xff] }
 0x1a1   : > { %v1023_v39 = vmul.f32 0.00390625, %v825_v24  ;;  %v1473_v47 = vperm.slane %v1022_v29, %v4588_v22  ;;  %1686 = vmatpush.msrb.mxu0 %v1138_v40  ;;  %v1358_v29 = vsel %vm1326_vm14, %v1357_v45, %v1356_v18  ;;  %1627 = vmatpush.msra.mxu1 %v1121_v50  ;;  %v1127_v18 = vld [vmem:[%s6138_s1 + $0x220] sm:$0xff]  ;;  %v1124_v30 = vld [vmem:[%s6138_s1 + $0x208] sm:$0xff] }
 0x1a2   : > { %v1471_v56 = vperm.slane %v1021_v61, %v4575_v44  ;;  %v1487_v35 = vsel %vm1483_vm10, %v4671_v10, %v1358_v29  ;;  %v1601_v53 = vsel %vm1588_vm11, %v4671_v10, %v1358_v29 }
 0x1a3   : > { %v1475_v37 = vperm.slane %v1023_v39, %v4599_v52  ;;  %1687 = vmatpush.msrb.mxu0 %v1137_v13  ;;  %v1133_v39 = vld [vmem:[%s6138_s1 + $0x250] sm:$0xff]  ;;  %1628 = vmatpush.msra.mxu1 %v1120_v3 }
 0x1a4   : > { %v1472_v26 = vsel %vm6204_vm15, %v1471_v56, %v1470_v7  ;;  %vm6211_vm15 = vmmov %vm6209_vm6  ;;  %v1132_v7 = vld [vmem:[%s6138_s1 + $0x248] sm:$0xff]  ;;  %vm6213_vm6 = vcmask 589312  }
 0x1a5   : > { %v1474_v16 = vsel %vm6210_vm7, %v1473_v47, %v1472_v26  ;;  %1688 = vmatpush.msrb.mxu0 %v1136_v41  ;;  %v1130_v26 = vld [vmem:[%s6138_s1 + $0x238] sm:$0xff]  ;;  %1629 = vmatpush.msra.mxu1 %v1119_v63  ;;  %v1115_v41 = vld [vmem:[%s6138_s1 + $0x1c0] sm:$0xff]  ;;  %vm6214_vm7 = vcmask 654912  }
 0x1a6   : > { %v831_v58 = vpop.xlane.xlu1 %830  ;;  %v1476_v24 = vsel %vm6211_vm15, %v1475_v37, %v1474_v16  ;;  %v1117_v16 = vld [vmem:[%s6138_s1 + $0x1d0] sm:$0xff]  ;;  %vm6215_vm15 = vcmask 720512  }
 0x1a7   : > { %v1025_v62 = vmul.f32 0.00390625, %v831_v58  ;;  %v828_v5 = vpop.xlane.xlu0 %827  ;;  %1689 = vmatpush.msrb.mxu0 %v1135_v36 }
 0x1a8   : > { %v834_v17 = vpop.xlane.xlu2 %833  ;;  %v1024_v48 = vmul.f32 0.00390625, %v828_v5  ;;  %v1118_v5 = vld [vmem:[%s6138_s1 + $0x1d8] sm:$0xff] }
 0x1a9   : > { %v1026_v49 = vmul.f32 0.00390625, %v834_v17  ;;  %v1479_v1 = vperm.slane %v1025_v62, %v4629_v12  ;;  %1690 = vmatpush.msrb.mxu0 %v1134_v25  ;;  %v1129_v17 = vld [vmem:[%s6138_s1 + $0x230] sm:$0xff]  ;;  %1630 = vmatpush.msra.mxu1 %v1118_v5 }
 0x1aa   : > { %v1477_v60 = vperm.slane %v1024_v48, %v6183_v57  ;;  %v1128_v48 = vld [vmem:[%s6138_s1 + $0x228] sm:$0xff] }
 0x1ab   : > { %v1481_v0 = vperm.slane %v1026_v49, %v4639_v6  ;;  %1691 = vmatpush.msrb.mxu0 %v1133_v39  ;;  %1631 = vmatpush.msra.mxu1 %v1117_v16  ;;  %v1109_v16 = vld [vmem:[%s6138_s1 + $0x190] sm:$0xff] }
 0x1ac   : > { %v1478_v27 = vsel %vm1318_vm12, %v1477_v60, %v1476_v24  ;;  %v1126_v24 = vld [vmem:[%s6138_s1 + $0x218] sm:$0xff] }
 0x1ad   : > { %v1480_v61 = vsel %vm1322_vm13, %v1479_v1, %v1478_v27  ;;  %1692 = vmatpush.msrb.mxu0 %v1132_v7  ;;  %v1116_v1 = vld [vmem:[%s6138_s1 + $0x1c8] sm:$0xff] }
 0x1ae   : > { %v840_v4 = vpop.xlane.xlu1 %839  ;;  %v5035_v38 = vsel %vm1326_vm14, %v1481_v0, %v1480_v61  ;;  %1632 = vmatpush.msra.mxu1 %v1116_v1  ;;  %v1112_v7 = vld [vmem:[%s6138_s1 + $0x1a8] sm:$0xff] }
 0x1af   : > { %v837_v28 = vpop.xlane.xlu0 %836  ;;  %v1488_v51 = vsel %vm1485_vm9, %v5035_v38, %v1487_v35  ;;  %v5045_v56 = vsel %vm1483_vm10, %v5035_v38, %v1601_v53  ;;  %v1028_v15 = vmul.f32 0.00390625, %v840_v4  ;;  %1693 = vmatpush.msrb.mxu0 %v1131_v19  ;;  %v1114_v35 = vld [vmem:[%s6138_s1 + $0x1b8] sm:$0xff]  ;;  %v1125_v53 = vld [vmem:[%s6138_s1 + $0x210] sm:$0xff] }
 0x1b0   : > { %v843_v11 = vpop.xlane.xlu2 %842  ;;  %3358 = vmatmul.msk.f32.vlgmr.msra.gmra.mxu3 %vm4851_vm8, %v1488_v51  ;;  %v1027_v47 = vmul.f32 0.00390625, %v837_v28  ;;  %1633 = vmatpush.msra.mxu1 %v1115_v41  ;;  %v1113_v51 = vld [vmem:[%s6138_s1 + $0x1b0] sm:$0xff]  ;;  %vm6212_vm8 = vcmask 523712   ;;  %v1154_v41 = vld [vmem:[%s6138_s1 + $0x2f8] sm:$0xff] }
 0x1b1   : > { %v1029_v40 = vmul.f32 0.00390625, %v843_v11  ;;  %1694 = vmatpush.msrb.mxu0 %v1130_v26  ;;  %v1527_v58 = vperm.slane %v1028_v15, %v4511_v8  ;;  %v1123_v15 = vld [vmem:[%s6138_s1 + $0x200] sm:$0xff] }
 0x1b2   : > { %v1526_v37 = vperm.slane %v1027_v47, %v4505_v31  ;;  %1634 = vmatpush.msra.mxu1 %v1114_v35  ;;  %v1111_v26 = vld [vmem:[%s6138_s1 + $0x1a0] sm:$0xff]  ;;  %v1152_v35 = vld [vmem:[%s6138_s1 + $0x2e8] sm:$0xff] }
 0x1b3   : > { %1695 = vmatpush.msrb.mxu0 %v1129_v17  ;;  %v1529_v49 = vperm.slane %v1029_v40, %v4519_v20 }
 0x1b4   : > { %v1528_v46 = vsel %vm1270_vm0, %v1527_v58, %v1526_v37  ;;  %1635 = vmatpush.msra.mxu1 %v1113_v51  ;;  %v1110_v58 = vld [vmem:[%s6138_s1 + $0x198] sm:$0xff]  ;;  %v1151_v51 = vld [vmem:[%s6138_s1 + $0x2e0] sm:$0xff] }
 0x1b5   : > { %1696 = vmatpush.msrb.mxu0 %v1128_v48  ;;  %v1530_v27 = vsel %vm1274_vm1, %v1529_v49, %v1528_v46  ;;  %v1108_v49 = vld [vmem:[%s6138_s1 + $0x188] sm:$0xff] }
 0x1b6   : > { %v849_v55 = vpop.xlane.xlu1 %848  ;;  %1636 = vmatpush.msra.mxu1 %v1112_v7 }
 0x1b7   : > { %v846_v54 = vpop.xlane.xlu0 %845  ;;  %v1031_v13 = vmul.f32 0.00390625, %v849_v55  ;;  %1697 = vmatpush.msrb.mxu0 %v1127_v18  ;;  %v1107_v18 = vld [vmem:[%s6138_s1 + $0x180] sm:$0xff] }
 0x1b8   : > { %v852_v9 = vpop.xlane.xlu2 %851  ;;  %v1030_v62 = vmul.f32 0.00390625, %v846_v54  ;;  %1637 = vmatpush.msra.mxu1 %v1111_v26 }
 0x1b9   : > { %v1032_v60 = vmul.f32 0.00390625, %v852_v9  ;;  %v1533_v36 = vperm.slane %v1031_v13, %v4528_v32  ;;  %1698 = vmatpush.msrb.mxu0 %v1126_v24 }
 0x1ba   : > { %v1531_v45 = vperm.slane %v1030_v62, %v4522_v21  ;;  %1638 = vmatpush.msra.mxu1 %v1110_v58 }
 0x1bb   : > { %1699 = vmatpush.msrb.mxu0 %v1125_v53  ;;  %v1535_v28 = vperm.slane %v1032_v60, %v4539_v2 }
 0x1bc   : > { %v1532_v25 = vsel %vm1278_vm2, %v1531_v45, %v1530_v27  ;;  %1639 = vmatpush.msra.mxu1 %v1109_v16  ;;  %v1146_v16 = vld [vmem:[%s6138_s1 + $0x2b8] sm:$0xff] }
 0x1bd   : > { %v1534_v39 = vsel %vm1282_vm3, %v1533_v36, %v1532_v25  ;;  %1700 = vmatpush.msrb.mxu0 %v1124_v30 }
 0x1be   : > { %v858_v0 = vpop.xlane.xlu1 %857  ;;  %v1536_v3 = vsel %vm1286_vm4, %v1535_v28, %v1534_v39  ;;  %1640 = vmatpush.msra.mxu1 %v1108_v49  ;;  %v1144_v49 = vld [vmem:[%s6138_s1 + $0x2a8] sm:$0xff] }
 0x1bf   : > { %v855_v29 = vpop.xlane.xlu0 %854  ;;  %v1034_v11 = vmul.f32 0.00390625, %v858_v0  ;;  %1701 = vmatpush.msrb.mxu0 %v1123_v15  ;;  %v1150_v15 = vld [vmem:[%s6138_s1 + $0x2d8] sm:$0xff] }
 0x1c0   : > { %v861_v61 = vpop.xlane.xlu2 %860  ;;  %v1033_v4 = vmul.f32 0.00390625, %v855_v29  ;;  %1641 = vmatpush.msra.mxu1 %v1107_v18 }
 0x1c1   : > { %v1035_v47 = vmul.f32 0.00390625, %v861_v61  ;;  %v1539_v19 = vperm.slane %v1034_v11, %v4549_v59  ;;  %v1153_v61 = vld [vmem:[%s6138_s1 + $0x2f0] sm:$0xff] }
 0x1c2   : > { %v1537_v50 = vperm.slane %v1033_v4, %v4543_v33  ;;  %1706 = vmatpush.msrb.mxu1 %v1154_v41 }
 0x1c3   : > { %v1541_v37 = vperm.slane %v1035_v47, %v4560_v42 }
 0x1c4   : > { %v1538_v55 = vsel %vm1290_vm5, %v1537_v50, %v1536_v3  ;;  %1707 = vmatpush.msrb.mxu1 %v1153_v61 }
 0x1c5   : > { %v1540_v5 = vsel %vm6212_vm8, %v1539_v19, %v1538_v55  ;;  %vm6216_vm8 = vcmask 786112   ;;  %v1149_v19 = vld [vmem:[%s6138_s1 + $0x2d0] sm:$0xff]  ;;  %v1148_v55 = vld [vmem:[%s6138_s1 + $0x2c8] sm:$0xff] }
 0x1c6   : > { %v867_v63 = vpop.xlane.xlu1 %866  ;;  %v1542_v13 = vsel %vm6213_vm6, %v1541_v37, %v1540_v5  ;;  %1708 = vmatpush.msrb.mxu1 %v1152_v35  ;;  %vm6217_vm6 = vcmask 851712  }
 0x1c7   : > { %v864_v40 = vpop.xlane.xlu0 %863  ;;  %v1037_v62 = vmul.f32 0.00390625, %v867_v63 }
 0x1c8   : > { %v870_v54 = vpop.xlane.xlu2 %869  ;;  %v1036_v9 = vmul.f32 0.00390625, %v864_v40  ;;  %1709 = vmatpush.msrb.mxu1 %v1151_v51 }
 0x1c9   : > { %v1038_v48 = vmul.f32 0.00390625, %v870_v54  ;;  %v1545_v46 = vperm.slane %v1037_v62, %v4575_v44 }
 0x1ca   : > { %v1543_v17 = vperm.slane %v1036_v9, %v4564_v43  ;;  %1710 = vmatpush.msrb.mxu1 %v1150_v15  ;;  %v1147_v9 = vld [vmem:[%s6138_s1 + $0x2c0] sm:$0xff] }
 0x1cb   : > { %v1547_v24 = vperm.slane %v1038_v48, %v4588_v22 }
 0x1cc   : > { %v1544_v45 = vsel %vm6214_vm7, %v1543_v17, %v1542_v13  ;;  %1711 = vmatpush.msrb.mxu1 %v1149_v19  ;;  %vm1595_vm7 = vcmask 1042432  }
 0x1cd   : > { %v1546_v29 = vsel %vm6215_vm15, %v1545_v46, %v1544_v45 }
 0x1ce   : > { %v876_v1 = vpop.xlane.xlu1 %875  ;;  %v1548_v53 = vsel %vm6216_vm8, %v1547_v24, %v1546_v29  ;;  %1712 = vmatpush.msrb.mxu1 %v1148_v55  ;;  %v1141_v29 = vld [vmem:[%s6138_s1 + $0x290] sm:$0xff] }
 0x1cf   : > { %v873_v60 = vpop.xlane.xlu0 %872  ;;  %v1040_v36 = vmul.f32 0.00390625, %v876_v1  ;;  %v1143_v1 = vld [vmem:[%s6138_s1 + $0x2a0] sm:$0xff] }
 0x1d0   : > { %v879_v0 = vpop.xlane.xlu2 %878  ;;  %v1039_v27 = vmul.f32 0.00390625, %v873_v60  ;;  %1713 = vmatpush.msrb.mxu1 %v1147_v9  ;;  %v1589_v60 = vsel %vm1588_vm11, %v4865_v23, %v4843_v34 }
 0x1d1   : > { %v1041_v4 = vmul.f32 0.00390625, %v879_v0  ;;  %v1551_v28 = vperm.slane %v1040_v36, %v6183_v57 }
 0x1d2   : > { %v1549_v25 = vperm.slane %v1039_v27, %v4599_v52  ;;  %1714 = vmatpush.msrb.mxu1 %v1146_v16 }
 0x1d3   : > { %v1553_v39 = vperm.slane %v1041_v4, %v4629_v12 }
 0x1d4   : > { %v1550_v11 = vsel %vm6217_vm6, %v1549_v25, %v1548_v53  ;;  %v1139_v53 = vld [vmem:[%s6138_s1 + $0x280] sm:$0xff] }
 0x1d5   : > { %v1552_v3 = vsel %vm1318_vm12, %v1551_v28, %v1550_v11 }
 0x1d6   : > { %v885_v30 = vpop.xlane.xlu1 %884  ;;  %v1554_v26 = vsel %vm1322_vm13, %v1553_v39, %v1552_v3 }
 0x1d7   : > { %v882_v50 = vpop.xlane.xlu0 %881  ;;  %v1043_v62 = vmul.f32 0.00390625, %v885_v30 }
 0x1d8   : > { %v888_v7 = vpop.xlane.xlu2 %887  ;;  %v1042_v47 = vmul.f32 0.00390625, %v882_v50 }
 0x1d9   : > { %v1044_v37 = vmul.f32 0.00390625, %v888_v7  ;;  %v1557_v46 = vperm.slane %v1043_v62, %v4505_v31 }
 0x1da   : > { %v1555_v63 = vperm.slane %v1042_v47, %v4639_v6 }
 0x1db   : > { %v1558_v13 = vperm.slane %v1044_v37, %v4511_v8 }
 0x1dc   : > { %v1556_v40 = vsel %vm1326_vm14, %v1555_v63, %v1554_v26 }
 0x1dd   : > { %v1600_v54 = vsel %vm1485_vm9, %v1556_v40, %v4881_v14  ;;  %v1145_v14 = vld [vmem:[%s6138_s1 + $0x2b0] sm:$0xff]  ;;  %v1590_v0 = vsel %vm1483_vm10, %v1556_v40, %v1589_v60  ;;  %v1559_v31 = vsel %vm1270_vm0, %v1558_v13, %v1557_v46  ;;  %vm6218_vm0 = vcmask 523712  }
 0x1de   : > { %1622 = vmatmul.f32.vlgmr.msra.gmra.mxu0 %v1600_v54  ;;  %v894_v58 = vpop.xlane.xlu1 %893  ;;  %1715 = vmatpush.msrb.mxu1 %v1145_v14 }
 0x1df   : > { %v891_v5 = vpop.xlane.xlu0 %890  ;;  %v1046_v45 = vmul.f32 0.00390625, %v894_v58 }
 0x1e0   : > { %v897_v17 = vpop.xlane.xlu2 %896  ;;  %v1045_v48 = vmul.f32 0.00390625, %v891_v5  ;;  %1716 = vmatpush.msrb.mxu1 %v1144_v49 }
 0x1e1   : > { %v1047_v41 = vmul.f32 0.00390625, %v897_v17  ;;  %v1562_v24 = vperm.slane %v1046_v45, %v4522_v21  ;;  %v1140_v21 = vld [vmem:[%s6138_s1 + $0x288] sm:$0xff] }
 0x1e2   : > { %v1560_v18 = vperm.slane %v1045_v48, %v4519_v20  ;;  %1717 = vmatpush.msrb.mxu1 %v1143_v1  ;;  %v1142_v20 = vld [vmem:[%s6138_s1 + $0x298] sm:$0xff] }
 0x1e3   : > { %v1564_v61 = vperm.slane %v1047_v41, %v4528_v32 }
 0x1e4   : > { %v1561_v34 = vsel %vm1274_vm1, %v1560_v18, %v1559_v31  ;;  %1718 = vmatpush.msrb.mxu1 %v1142_v20  ;;  %vm6219_vm1 = vcmask 589312  }
 0x1e5   : > { %v1563_v4 = vsel %vm1278_vm2, %v1562_v24, %v1561_v34  ;;  %vm6220_vm2 = vcmask 654912   ;;  %v1162_v34 = vld [vmem:[#allocation7 + $0x30] sm:$0xff] }
 0x1e6   : > { %3359 = vmatmul.msk.f32.vlgmr.msrb.gmra.mxu0 %vm1595_vm7, %v1590_v0  ;;  %v903_v8 = vpop.xlane.xlu1 %902  ;;  %1719 = vmatpush.msrb.mxu1 %v1141_v29  ;;  %v1565_v11 = vsel %vm1282_vm3, %v1564_v61, %v1563_v4  ;;  %vm6221_vm3 = vmmov %vm6215_vm15  ;;  %v1161_v29 = vld [vmem:[#allocation7 + $0x28] sm:$0xff]  ;;  %v1159_v4 = vld [vmem:[#allocation7 + $0x18] sm:$0xff] }
 0x1e7   : > { %v900_v27 = vpop.xlane.xlu0 %899  ;;  %v1049_v25 = vmul.f32 0.00390625, %v903_v8  ;;  %1775 = vmatpush.msrb.mxu2 %v1162_v34 }
 0x1e8   : > { %v906_v36 = vpop.xlane.xlu2 %905  ;;  %v1048_v23 = vmul.f32 0.00390625, %v900_v27  ;;  %1720 = vmatpush.msrb.mxu1 %v1140_v21  ;;  %v1156_v21 = vld [vmem:[#allocation7] sm:$0xff] }
 0x1e9   : > { %v1050_v28 = vmul.f32 0.00390625, %v906_v36  ;;  %v1568_v32 = vperm.slane %v1049_v25, %v4543_v33  ;;  %v1158_v25 = vld [vmem:[#allocation7 + $0x10] sm:$0xff] }
 0x1ea   : > { %v1566_v35 = vperm.slane %v1048_v23, %v4539_v2  ;;  %1721 = vmatpush.msrb.mxu1 %v1139_v53  ;;  %v1163_v23 = vld [vmem:[#allocation7 + $0x38] sm:$0xff] }
 0x1eb   : > { %v1570_v15 = vperm.slane %v1050_v28, %v4549_v59  ;;  %1795 = vmatpush.msrb.mxu3 %v1163_v23 }
 0x1ec   : > { %v1567_v30 = vsel %vm1286_vm4, %v1566_v35, %v1565_v11  ;;  %vm6222_vm4 = vmmov %vm6216_vm8  ;;  %v1157_v35 = vld [vmem:[#allocation7 + $0x8] sm:$0xff] }
 0x1ed   : > { %v1569_v47 = vsel %vm1290_vm5, %v1568_v32, %v1567_v30  ;;  %vm6223_vm5 = vmmov %vm6217_vm6  ;;  %1796 = vmatpush.msrb.mxu3 %v1161_v29 }
 0x1ee   : > { %v912_v51 = vpop.xlane.xlu1 %911  ;;  %v1571_v63 = vsel %vm6218_vm0, %v1570_v15, %v1569_v47 }
 0x1ef   : > { %v909_v39 = vpop.xlane.xlu0 %908  ;;  %v1052_v2 = vmul.f32 0.00390625, %v912_v51  ;;  %1838 = vmatpush.msra.mxu3 %v1159_v4 }
 0x1f0   : > { %v915_v50 = vpop.xlane.xlu2 %914  ;;  %v1051_v7 = vmul.f32 0.00390625, %v909_v39 }
 0x1f1   : > { %v1053_v19 = vmul.f32 0.00390625, %v915_v50  ;;  %v1574_v26 = vperm.slane %v1052_v2, %v4564_v43  ;;  %1839 = vmatpush.msra.mxu3 %v1157_v35 }
 0x1f2   : > { %v1572_v3 = vperm.slane %v1051_v7, %v4560_v42 }
 0x1f3   : > { %v1576_v54 = vperm.slane %v1053_v19, %v4575_v44 }
 0x1f4   : > { %v1573_v33 = vsel %vm6219_vm1, %v1572_v3, %v1571_v63  ;;  %v1166_v63 = vld [vmem:[#allocation7 + $0x50] sm:$0xff] }
 0x1f5   : > { %v1575_v59 = vsel %vm6220_vm2, %v1574_v26, %v1573_v33  ;;  %v1167_v26 = vld [vmem:[#allocation7 + $0x58] sm:$0xff]  ;;  %v1164_v33 = vld [vmem:[#allocation7 + $0x40] sm:$0xff] }
 0x1f6   : > { %v921_v55 = vpop.xlane.xlu1 %920  ;;  %v1577_v42 = vsel %vm6221_vm3, %v1576_v54, %v1575_v59 }
 0x1f7   : > { %v918_v40 = vpop.xlane.xlu0 %917  ;;  %v1055_v58 = vmul.f32 0.00390625, %v921_v55  ;;  %v1165_v55 = vld [vmem:[#allocation7 + $0x48] sm:$0xff] }
 0x1f8   : > { %v1054_v9 = vmul.f32 0.00390625, %v918_v40  ;;  %v924_v37 = vpop.xlane.xlu2 %923 }
 0x1f9   : > { %v1056_v5 = vmul.f32 0.00390625, %v924_v37  ;;  %v1580_v17 = vperm.slane %v1055_v58, %v4599_v52 }
 0x1fa   : > { %v1578_v62 = vperm.slane %v1054_v9, %v4588_v22 }
 0x1fb   : > { %v1582_v48 = vperm.slane %v1056_v5, %v6183_v57  ;;  %v1591_v57 = vsel %vm1588_vm11, %v5035_v38, %v4671_v10  ;;  %v1160_v38 = vld [vmem:[#allocation7 + $0x20] sm:$0xff] }
 0x1fc   : > { %v1579_v43 = vsel %vm6222_vm4, %v1578_v62, %v1577_v42  ;;  %1776 = vmatpush.msrb.mxu2 %v1160_v38  ;;  %v6225_v42 = vlaneseq }
 0x1fd   : > { %v1581_v44 = vsel %vm6223_vm5, %v1580_v17, %v1579_v43 }
 0x1fe   : > { %v930_v16 = vpop.xlane.xlu1 %929  ;;  %v1583_v22 = vsel %vm1318_vm12, %v1582_v48, %v1581_v44  ;;  %1818 = vmatpush.msra.mxu2 %v1158_v25  ;;  %v5263_v17 = vshrl.u32 %v6225_v42, 7  ;;  %v1168_v48 = vld [vmem:[#allocation8] sm:$0x3] }
 0x1ff   : > { %v927_v14 = vpop.xlane.xlu0 %926  ;;  %v1058_v49 = vmul.f32 0.00390625, %v930_v16  ;;  %v1890_v44 = vperm.slane %v1168_v48, 0 }
 0x200   : > { %v1057_v13 = vmul.f32 0.00390625, %v927_v14  ;;  %1819 = vmatpush.msra.mxu2 %v1156_v21  ;;  %3458 = vset.pattern.permute.xlu2 %v5263_v17  ;;  %v5267_v43 = vadd.s32 64, %v5263_v17  ;;  %v5270_v16 = vadd.s32 16, %v5263_v17  ;;  %v5283_v35 = vadd.s32 40, %v5263_v17 }
 0x201   : > { %v1586_v46 = vperm.slane %v1058_v49, %v4639_v6 }
 0x202   : > { %v1584_v45 = vperm.slane %v1057_v13, %v4629_v12  ;;  %3465 = vset.pattern.permute.xlu0 %v5267_v43  ;;  %3459 = vset.pattern.permute.xlu1 %v5270_v16  ;;  %v1891_v13 = vperm.slane %v1168_v48, 1  ;;  %v3595_v48 = vld [vmem:[%s4202_s9 + $0x38] sm:$0xff] }
 0x204   : > { %v1585_v1 = vsel %vm1322_vm13, %v1584_v45, %v1583_v22  ;;  %vm1758_vm13 = vcmask 130048  }
 0x205   : > { %v1587_v52 = vsel %vm1326_vm14, %v1586_v46, %v1585_v1  ;;  %vm6224_vm14 = vcmask 1040384  }
 0x206   : > { %v1603_v18 = vsel %vm1485_vm9, %v1587_v52, %v5045_v56  ;;  %v1592_v60 = vsel %vm1483_vm10, %v1587_v52, %v1591_v57  ;;  %v3579_v56 = vld [vmem:[#allocation5] ss:$0 sm:$0xff] }
 0x207   : > { %1642 = vmatmul.f32.vlgmr.msra.gmra.mxu1 %v1603_v18 }
 0x20a   : > { %v1663_v41 = vpop.f32.mrf.mxu2 }
 0x20f   : > { %3360 = vmatmul.msk.f32.vlgmr.msrb.gmra.mxu1 %vm1595_vm7, %v1592_v60 }
 0x233   : > { %v1683_v31 = vpop.f32.mrf.mxu3 }
 0x25b   : > { %v1623_v6 = vpop.f32.mrf.mxu0 }
 0x263   : > { %v1703_v24 = vpop.f32.mrf.mxu0 }
 0x284   : > { %v1643_v12 = vpop.f32.mrf.mxu1 }
 0x285   : > { %v1644_v0 = vadd.f32 %v1643_v12, %v1623_v6 }
 0x287   : > { %v1664_v8 = vadd.f32 %v1663_v41, %v1644_v0 }
 0x289   : > { %v1684_v36 = vadd.f32 %v1683_v31, %v1664_v8 }
 0x28c   : > { %v1723_v27 = vpop.f32.mrf.mxu1 }
 0x28d   : > { %v1724_v20 = vadd.f32 %v1723_v27, %v1703_v24 }
 0x28f   : > { %v1726_v10 = vadd.f32 %v1724_v20, %v1684_v36 }
 0x291   : > { %v1730_v61 = vadd.f32 %v3579_v56, %v1726_v10 }
 0x293   : > { %v3361_v53 = vmul.f32 -1.442695, %v1730_v61 }
 0x295   : > { %3580 = vpow2.f32 %v3361_v53 }
 0x29b   : > { %v3581_v28 = vpop.eup %3580 }
 0x29c   : > { %v1734_v11 = vadd.f32 1.0, %v3581_v28  ;;  %v5286_v28 = vadd.s32 24, %v5263_v17 }
 0x29e   : > { %3582 = vrcp.f32 %v1734_v11  ;;  %v1746_v39 = vand.u32 2147483648, %v1734_v11  ;;  %v1744_v7 = vand.u32 2147483647, %v1734_v11  ;;  %vm1740_vm10 = vweird.f32 %v1734_v11 }
 0x2a0   : > { %v1747_v2 = vor.u32 1.1754944e-38, %v1746_v39  ;;  %vm1745_vm12 = vcmp.eq.f32.partialorder %v1744_v7, 8.507059e+37  ;;  %v5303_v7 = vadd.s32 32, %v5263_v17 }
 0x2a4   : > { %v3583_v32 = vpop.eup %3582 }
 0x2a5   : > { %v1736_v51 = vmul.f32 %v3583_v32, %v1734_v11  ;;  %vm1741_vm9 = vweird.f32 %v3583_v32 }
 0x2a6   : > { %vm1742_vm11 = vmor %vm1740_vm10, %vm1741_vm9 }
 0x2a7   : > { %v1737_v30 = vsub.f32 1.0, %v1736_v51 }
 0x2a9   : > { %v1738_v50 = vmul.f32 %v3583_v32, %v1737_v30 }
 0x2ab   : > { %v1739_v15 = vadd.f32 %v3583_v32, %v1738_v50  ;;  %v5300_v50 = vadd.s32 56, %v5263_v17 }
 0x2ad   : > { %v1743_v47 = vsel %vm1742_vm11, %v3583_v32, %v1739_v15  ;;  %v5312_v15 = vadd.s32 80, %v5263_v17 }
 0x2ae   : > { %v1748_v3 = vsel %vm1745_vm12, %v1747_v2, %v1743_v47  ;;  %v5315_v2 = vadd.s32 48, %v5263_v17  ;;  %v5324_v47 = vadd.s32 120, %v5263_v17 }
 0x2af   : > { %v1750_v19 = vmul.f32 %v1748_v3, %v1730_v61  ;;  %v5327_v3 = vadd.s32 96, %v5263_v17 }
 0x2b1   : > { %3362 = vmatmul.msk.f32.vlgmr.msrb.gmra.mxu2 %vm1758_vm13, %v1750_v19  ;;  %3363 = vmatmul.msk.f32.vlgmr.msrb.gmra.mxu3 %vm1758_vm13, %v1750_v19  ;;  %v1752_v40 = vrot.slane %v1750_v19, 7  ;;  %v1755_v9 = vrot.slane %v1750_v19, 1  ;;  %v5330_v19 = vadd.s32 72, %v5263_v17 }
 0x2b2   : > { %1861 = vmatpush.msrb.mxu2 %v1166_v63  ;;  %1881 = vmatpush.msrb.mxu3 %v1167_v26  ;;  %v5339_v63 = vadd.s32 88, %v5263_v17 }
 0x2b3   : > { %v1754_v54 = vsel %vm6224_vm14, 0.0, %v1752_v40  ;;  %v1757_v58 = vsel %vm1595_vm7, %v1755_v9, 0.0 }
 0x2b4   : > { %1862 = vmatpush.msrb.mxu2 %v1164_v33  ;;  %1882 = vmatpush.msrb.mxu3 %v1165_v55  ;;  %v5351_v33 = vadd.s32 8, %v5263_v17  ;;  %v5354_v55 = vadd.s32 112, %v5263_v17 }
 0x2b9   : > { %3364 = vmatmul.msk.f32.vlgmr.msra.gmra.mxu2 %vm1758_vm13, %v1754_v54  ;;  %3365 = vmatmul.msk.f32.vlgmr.msra.gmra.mxu3 %vm1758_vm13, %v1754_v54  ;;  %v3592_v54 = vld [vmem:[%s4202_s9] sm:$0xff] }
 0x2c1   : > { %3366 = vmatmul.msk.f32.vlgmr.msrb.gmra.mxu2 %vm1758_vm13, %v1757_v58  ;;  %3367 = vmatmul.msk.f32.vlgmr.msrb.gmra.mxu3 %vm1758_vm13, %v1757_v58  ;;  %v3593_v58 = vld [vmem:[%s4202_s9 + $0x8] sm:$0xff] }
 0x334   : > { %v1778_v37 = vpop.f32.mrf.mxu2  ;;  %v1798_v59 = vpop.f32.mrf.mxu3 }
 0x33c   : > { %v1821_v62 = vpop.f32.mrf.mxu2  ;;  %v1841_v5 = vpop.f32.mrf.mxu3 }
 0x33d   : > { %v1822_v14 = vadd.f32 %v1821_v62, %v1778_v37  ;;  %v1842_v49 = vadd.f32 %v1841_v5, %v1798_v59  ;;  %v3594_v5 = vld [vmem:[%s4202_s9 + $0x30] sm:$0xff] }
 0x344   : > { %v1864_v46 = vpop.f32.mrf.mxu2  ;;  %v1884_v45 = vpop.f32.mrf.mxu3 }
 0x345   : > { %v1887_v22 = vadd.f32 %v1864_v46, %v1822_v14  ;;  %v1888_v1 = vadd.f32 %v1884_v45, %v1842_v49  ;;  %v3597_v45 = vld [vmem:[%s4202_s9 + $0x88] sm:$0xff] }
 0x347   : > { %v1894_v52 = vadd.f32 %v1890_v44, %v1887_v22  ;;  %v1895_v18 = vadd.f32 %v1891_v13, %v1888_v1  ;;  %v3596_v13 = vld [vmem:[%s4202_s9 + $0x80] sm:$0xff] }
 0x348   : > { %v3598_v1 = vld [vmem:[%s4202_s9 + $0x20] sm:$0xff] }
 0x349   : > { %v3368_v57 = vmul.f32 -1.442695, %v1894_v52  ;;  %v3369_v60 = vmul.f32 -1.442695, %v1895_v18  ;;  %v3599_v18 = vld [vmem:[%s4202_s9 + $0x28] sm:$0xff] }
 0x34b   : > { %3584 = vpow2.f32 %v3368_v57 }
 0x34c   : > { %3586 = vpow2.f32 %v3369_v60 }
 0x351   : > { %v3585_v6 = vpop.eup %3584 }
 0x352   : > { %v3587_v12 = vpop.eup %3586  ;;  %v1902_v0 = vadd.f32 1.0, %v3585_v6  ;;  %v3600_v6 = vld [vmem:[%s4202_s9 + $0x40] sm:$0xff] }
 0x353   : > { %v1903_v41 = vadd.f32 1.0, %v3587_v12 }
 0x354   : > { %3588 = vrcp.f32 %v1902_v0  ;;  %v1915_v36 = vand.u32 2147483648, %v1902_v0  ;;  %v1913_v56 = vand.u32 2147483647, %v1902_v0  ;;  %vm1909_vm8 = vweird.f32 %v1902_v0 }
 0x355   : > { %3590 = vrcp.f32 %v1903_v41  ;;  %v1930_v53 = vand.u32 2147483648, %v1903_v41  ;;  %vm1924_vm1 = vweird.f32 %v1903_v41  ;;  %v1928_v11 = vand.u32 2147483647, %v1903_v41 }
 0x356   : > { %v1916_v10 = vor.u32 1.1754944e-38, %v1915_v36  ;;  %vm1914_vm7 = vcmp.eq.f32.partialorder %v1913_v56, 8.507059e+37 }
 0x357   : > { %v1931_v51 = vor.u32 1.1754944e-38, %v1930_v53  ;;  %vm1929_vm3 = vcmp.eq.f32.partialorder %v1928_v11, 8.507059e+37  ;;  %v3607_v53 = vld [vmem:[%s4202_s9 + $0x68] sm:$0xff] }
 0x35a   : > { %v3589_v8 = vpop.eup %3588 }
 0x35b   : > { %v1905_v31 = vmul.f32 %v3589_v8, %v1902_v0  ;;  %v3591_v24 = vpop.eup %3590  ;;  %vm1910_vm15 = vweird.f32 %v3589_v8  ;;  %v3601_v0 = vld [vmem:[%s4202_s9 + $0x48] sm:$0xff] }
 0x35c   : > { %v1920_v34 = vmul.f32 %v3591_v24, %v1903_v41  ;;  %vm1911_vm6 = vmor %vm1909_vm8, %vm1910_vm15  ;;  %vm1925_vm0 = vweird.f32 %v3591_v24 }
 0x35d   : > { %v1906_v27 = vsub.f32 1.0, %v1905_v31  ;;  %vm1926_vm2 = vmor %vm1924_vm1, %vm1925_vm0 }
 0x35e   : > { %v1921_v29 = vsub.f32 1.0, %v1920_v34  ;;  %v3604_v34 = vld [vmem:[%s4202_s9 + $0x50] sm:$0xff] }
 0x35f   : > { %v1907_v20 = vmul.f32 %v3589_v8, %v1906_v27  ;;  %v3602_v27 = vld [vmem:[%s4202_s9 + $0x300] sm:$0xff] }
 0x360   : > { %v1922_v21 = vmul.f32 %v3591_v24, %v1921_v29 }
 0x361   : > { %v1908_v23 = vadd.f32 %v3589_v8, %v1907_v20  ;;  %v3603_v20 = vld [vmem:[%s4202_s9 + $0x308] sm:$0xff] }
 0x362   : > { %v1923_v4 = vadd.f32 %v3591_v24, %v1922_v21  ;;  %v3606_v21 = vld [vmem:[%s4202_s9 + $0x60] sm:$0xff] }
 0x363   : > { %v1912_v38 = vsel %vm1911_vm6, %v3589_v8, %v1908_v23 }
 0x364   : > { %v5274_v61 = vsel %vm1914_vm7, %v1916_v10, %v1912_v38  ;;  %v1927_v32 = vsel %vm1926_vm2, %v3591_v24, %v1923_v4  ;;  %v3605_v10 = vld [vmem:[%s4202_s9 + $0x58] sm:$0xff] }
 0x365   : > { %v5277_v25 = vperm.slane %v5274_v61, 0  ;;  %v5291_v30 = vsel %vm1929_vm3, %v1931_v51, %v1927_v32  ;;  %v5345_v26 = vperm.slane %v5274_v61, 2 }
 0x366   : > { %v5294_v39 = vperm.slane %v5291_v30, 1  ;;  %v5362_v59 = vperm.slane %v5291_v30, 0  ;;  %v5397_v8 = vperm.slane %v5291_v30, 2 }
 0x367   : > { %1987 = vperm.xlu0 %3465, %v5277_v25   ;;  %1951 = vperm.xlu1 %3459, %v5277_v25  }
 0x368   : > { %1939 = vperm.xlu2 %3458, %v5277_v25  }
 0x36f   : > { %3498 = vset.pattern.permute.xlu0 %v5263_v17  ;;  %3462 = vset.pattern.permute.xlu1 %v5283_v35 }
 0x370   : > { %3460 = vset.pattern.permute.xlu2 %v5286_v28 }
 0x377   : > { %2230 = vperm.xlu0 %3498, %v5294_v39   ;;  %1969 = vperm.xlu1 %3462, %v5277_v25  }
 0x378   : > { %1957 = vperm.xlu2 %3460, %v5277_v25  }
 0x37f   : > { %3503 = vset.pattern.permute.xlu0 %v5283_v35  ;;  %3464 = vset.pattern.permute.xlu1 %v5300_v50 }
 0x380   : > { %3461 = vset.pattern.permute.xlu2 %v5303_v7 }
 0x387   : > { %2260 = vperm.xlu0 %3503, %v5294_v39   ;;  %1981 = vperm.xlu1 %3464, %v5277_v25  }
 0x388   : > { %1963 = vperm.xlu2 %3461, %v5277_v25  }
 0x38f   : > { %3508 = vset.pattern.permute.xlu0 %v5312_v15  ;;  %3467 = vset.pattern.permute.xlu1 %v5312_v15 }
 0x390   : > { %3463 = vset.pattern.permute.xlu2 %v5315_v2 }
 0x397   : > { %2290 = vperm.xlu0 %3508, %v5294_v39   ;;  %1999 = vperm.xlu1 %3467, %v5277_v25  }
 0x398   : > { %1975 = vperm.xlu2 %3463, %v5277_v25  }
 0x39f   : > { %3513 = vset.pattern.permute.xlu0 %v5324_v47  ;;  %3469 = vset.pattern.permute.xlu1 %v5327_v3 }
 0x3a0   : > { %3466 = vset.pattern.permute.xlu2 %v5330_v19 }
 0x3a7   : > { %2320 = vperm.xlu0 %3513, %v5294_v39   ;;  %2011 = vperm.xlu1 %3469, %v5277_v25  }
 0x3a8   : > { %1993 = vperm.xlu2 %3466, %v5277_v25  }
 0x3af   : > { %3518 = vset.pattern.permute.xlu0 %v5303_v7  ;;  %3471 = vset.pattern.permute.xlu1 %v5324_v47 }
 0x3b0   : > { %3468 = vset.pattern.permute.xlu2 %v5339_v63 }
 0x3b7   : > { %2351 = vperm.xlu0 %3518, %v5345_v26   ;;  %2029 = vperm.xlu1 %3471, %v5277_v25  }
 0x3b8   : > { %2005 = vperm.xlu2 %3468, %v5277_v25  }
 0x3bf   : > { %3523 = vset.pattern.permute.xlu0 %v5330_v19  ;;  %3473 = vset.pattern.permute.xlu1 %v5351_v33 }
 0x3c0   : > { %3470 = vset.pattern.permute.xlu2 %v5354_v55 }
 0x3c2   : > { %v1940_v40 = vpop.permute.xlu2 %1939 }
 0x3c3   : > { %v2710_v9 = vmul.f32 %v3592_v54, %v1940_v40  ;;  %v2711_v37 = vmul.f32 %v3593_v58, %v1940_v40  ;;  %v3608_v40 = vld [vmem:[%s4202_s9 + $0x350] sm:$0xff] }
 0x3c5   : > { %2966 = vst [vmem:[%s5366_s15] sm:$0xff] %v2710_v9  ;;  %v3609_v9 = vld [vmem:[%s4202_s9 + $0x358] sm:$0xff] }
 0x3c6   : > { %2967 = vst [vmem:[%s5366_s15 + $0x8] sm:$0xff] %v2711_v37  ;;  %v3610_v37 = vld [vmem:[%s4202_s9 + $0x70] sm:$0xff] }
 0x3c7   : > { %2381 = vperm.xlu0 %3523, %v5345_v26   ;;  %2042 = vperm.xlu1 %3473, %v5362_v59  }
 0x3c8   : > { %2023 = vperm.xlu2 %3470, %v5277_v25  }
 0x3cf   : > { %3528 = vset.pattern.permute.xlu0 %v5354_v55  ;;  %3475 = vset.pattern.permute.xlu1 %v5303_v7 }
 0x3d0   : > { %3472 = vset.pattern.permute.xlu2 %v5263_v17 }
 0x3d2   : > { %v1958_v62 = vpop.permute.xlu2 %1957 }
 0x3d3   : > { %v2716_v42 = vmul.f32 %v3594_v5, %v1958_v62  ;;  %v2717_v14 = vmul.f32 %v3595_v48, %v1958_v62  ;;  %v3611_v5 = vld [vmem:[%s4202_s9 + $0x78] sm:$0xff]  ;;  %v5427_v48 = vadd.s32 104, %v5263_v17 }
 0x3d5   : > { %2972 = vst [vmem:[%s5366_s15 + $0x30] sm:$0xff] %v2716_v42 }
 0x3d6   : > { %2973 = vst [vmem:[%s5366_s15 + $0x38] sm:$0xff] %v2717_v14 }
 0x3d7   : > { %2411 = vperm.xlu0 %3528, %v5345_v26   ;;  %2060 = vperm.xlu1 %3475, %v5362_v59  }
 0x3d8   : > { %2036 = vperm.xlu2 %3472, %v5362_v59  }
 0x3d9   : > { %v1988_v49 = vpop.permute.xlu0 %1987  ;;  %v1952_v44 = vpop.permute.xlu1 %1951 }
 0x3da   : > { %v2726_v46 = vmul.f32 %v3596_v13, %v1988_v49  ;;  %v2727_v22 = vmul.f32 %v3597_v45, %v1988_v49  ;;  %v2714_v52 = vmul.f32 %v3598_v1, %v1952_v44  ;;  %v2715_v57 = vmul.f32 %v3599_v18, %v1952_v44  ;;  %v3612_v49 = vld [vmem:[%s4202_s9 + $0x90] sm:$0xff]  ;;  %v3613_v13 = vld [vmem:[%s4202_s9 + $0x98] sm:$0xff]  ;;  %v3614_v1 = vld [vmem:[%s4202_s9 + $0x3a0] sm:$0xff] }
 0x3db   : > { %v3615_v18 = vld [vmem:[%s4202_s9 + $0x3a8] sm:$0xff] }
 0x3dc   : > { %2982 = vst [vmem:[%s5366_s15 + $0x80] sm:$0xff] %v2726_v46 }
 0x3dd   : > { %2983 = vst [vmem:[%s5366_s15 + $0x88] sm:$0xff] %v2727_v22 }
 0x3de   : > { %2970 = vst [vmem:[%s5366_s15 + $0x20] sm:$0xff] %v2714_v52 }
 0x3df   : > { %2971 = vst [vmem:[%s5366_s15 + $0x28] sm:$0xff] %v2715_v57  ;;  %3533 = vset.pattern.permute.xlu0 %v5286_v28  ;;  %3477 = vset.pattern.permute.xlu1 %v5315_v2 }
 0x3e0   : > { %3474 = vset.pattern.permute.xlu2 %v5286_v28 }
 0x3e2   : > { %v1964_v60 = vpop.permute.xlu2 %1963 }
 0x3e3   : > { %v2718_v12 = vmul.f32 %v3600_v6, %v1964_v60  ;;  %v2719_v41 = vmul.f32 %v3601_v0, %v1964_v60  ;;  %v3616_v60 = vld [vmem:[%s4202_s9 + $0xa0] sm:$0xff] }
 0x3e5   : > { %2974 = vst [vmem:[%s5366_s15 + $0x40] sm:$0xff] %v2718_v12  ;;  %v3617_v12 = vld [vmem:[%s4202_s9 + $0xa8] sm:$0xff] }
 0x3e6   : > { %2975 = vst [vmem:[%s5366_s15 + $0x48] sm:$0xff] %v2719_v41 }
 0x3e7   : > { %2442 = vperm.xlu0 %3533, %v5397_v8   ;;  %2072 = vperm.xlu1 %3477, %v5362_v59  }
 0x3e8   : > { %2054 = vperm.xlu2 %3474, %v5362_v59  }
 0x3e9   : > { %v2231_v31 = vpop.permute.xlu0 %2230  ;;  %v1970_v24 = vpop.permute.xlu1 %1969 }
 0x3ea   : > { %v2806_v36 = vmul.f32 %v3602_v27, %v2231_v31  ;;  %v2807_v56 = vmul.f32 %v3603_v20, %v2231_v31  ;;  %v2720_v23 = vmul.f32 %v3604_v34, %v1970_v24  ;;  %v2721_v38 = vmul.f32 %v3605_v10, %v1970_v24  ;;  %v3618_v31 = vld [vmem:[%s4202_s9 + $0xb0] sm:$0xff]  ;;  %v3619_v27 = vld [vmem:[%s4202_s9 + $0xb8] sm:$0xff] }
 0x3eb   : > { %v3620_v34 = vld [vmem:[%s4202_s9 + $0x3f0] sm:$0xff]  ;;  %v3621_v10 = vld [vmem:[%s4202_s9 + $0x3f8] sm:$0xff] }
 0x3ec   : > { %3062 = vst [vmem:[%s5366_s15 + $0x300] sm:$0xff] %v2806_v36 }
 0x3ed   : > { %3063 = vst [vmem:[%s5366_s15 + $0x308] sm:$0xff] %v2807_v56 }
 0x3ee   : > { %2976 = vst [vmem:[%s5366_s15 + $0x50] sm:$0xff] %v2720_v23 }
 0x3ef   : > { %2977 = vst [vmem:[%s5366_s15 + $0x58] sm:$0xff] %v2721_v38  ;;  %3538 = vset.pattern.permute.xlu0 %v5267_v43  ;;  %3479 = vset.pattern.permute.xlu1 %v5330_v19 }
 0x3f0   : > { %3476 = vset.pattern.permute.xlu2 %v5283_v35 }
 0x3f2   : > { %v1976_v29 = vpop.permute.xlu2 %1975 }
 0x3f3   : > { %v2722_v4 = vmul.f32 %v3606_v21, %v1976_v29  ;;  %v2723_v11 = vmul.f32 %v3607_v53, %v1976_v29  ;;  %v3622_v29 = vld [vmem:[%s4202_s9 + $0xc0] sm:$0xff] }
 0x3f5   : > { %2978 = vst [vmem:[%s5366_s15 + $0x60] sm:$0xff] %v2722_v4  ;;  %v3623_v4 = vld [vmem:[%s4202_s9 + $0xc8] sm:$0xff] }
 0x3f6   : > { %2979 = vst [vmem:[%s5366_s15 + $0x68] sm:$0xff] %v2723_v11 }
 0x3f7   : > { %2472 = vperm.xlu0 %3538, %v5397_v8   ;;  %2090 = vperm.xlu1 %3479, %v5362_v59  }
 0x3f8   : > { %2066 = vperm.xlu2 %3476, %v5362_v59  }
 0x3f9   : > { %v2261_v32 = vpop.permute.xlu0 %2260  ;;  %v1982_v51 = vpop.permute.xlu1 %1981 }
 0x3fa   : > { %v2816_v54 = vmul.f32 %v3608_v40, %v2261_v32  ;;  %v2817_v58 = vmul.f32 %v3609_v9, %v2261_v32  ;;  %v2724_v62 = vmul.f32 %v3610_v37, %v1982_v51  ;;  %v2725_v42 = vmul.f32 %v3611_v5, %v1982_v51  ;;  %v3624_v32 = vld [vmem:[%s4202_s9 + $0xe0] sm:$0xff]  ;;  %v3625_v40 = vld [vmem:[%s4202_s9 + $0xe8] sm:$0xff] }
 0x3fb   : > { %v5475_v9 = vperm.slane %v5274_v61, 1  ;;  %v3626_v5 = vld [vmem:[%s4202_s9 + $0x440] sm:$0xff] }
 0x3fc   : > { %3072 = vst [vmem:[%s5366_s15 + $0x350] sm:$0xff] %v2816_v54 }
 0x3fd   : > { %3073 = vst [vmem:[%s5366_s15 + $0x358] sm:$0xff] %v2817_v58  ;;  %v5478_v58 = vperm.slane %v5274_v61, 3 }
 0x3fe   : > { %2980 = vst [vmem:[%s5366_s15 + $0x70] sm:$0xff] %v2724_v62 }
 0x3ff   : > { %2981 = vst [vmem:[%s5366_s15 + $0x78] sm:$0xff] %v2725_v42  ;;  %3539 = vset.pattern.permute.xlu0 %v5427_v48  ;;  %3481 = vset.pattern.permute.xlu1 %v5339_v63 }
 0x400   : > { %3478 = vset.pattern.permute.xlu2 %v5267_v43 }
 0x402   : > { %v1994_v14 = vpop.permute.xlu2 %1993 }
 0x403   : > { %v2728_v44 = vmul.f32 %v3612_v49, %v1994_v14  ;;  %v2729_v46 = vmul.f32 %v3613_v13, %v1994_v14  ;;  %v3627_v14 = vld [vmem:[%s4202_s9 + $0x448] sm:$0xff]  ;;  %v3628_v49 = vld [vmem:[%s4202_s9 + $0xf0] sm:$0xff]  ;;  %v3629_v13 = vld [vmem:[%s4202_s9 + $0xf8] sm:$0xff] }
 0x405   : > { %2984 = vst [vmem:[%s5366_s15 + $0x90] sm:$0xff] %v2728_v44 }
 0x406   : > { %2985 = vst [vmem:[%s5366_s15 + $0x98] sm:$0xff] %v2729_v46 }
 0x407   : > { %2017 = vperm.xlu0 %3539, %v5277_v25   ;;  %2102 = vperm.xlu1 %3481, %v5362_v59  }
 0x408   : > { %2084 = vperm.xlu2 %3478, %v5362_v59  }
 0x409   : > { %v2291_v45 = vpop.permute.xlu0 %2290  ;;  %v2000_v22 = vpop.permute.xlu1 %1999 }
 0x40a   : > { %v2826_v52 = vmul.f32 %v3614_v1, %v2291_v45  ;;  %v2827_v57 = vmul.f32 %v3615_v18, %v2291_v45  ;;  %v2730_v6 = vmul.f32 %v3616_v60, %v2000_v22  ;;  %v2731_v0 = vmul.f32 %v3617_v12, %v2000_v22  ;;  %v3630_v22 = vld [vmem:[%s4202_s9 + $0x100] sm:$0xff] }
 0x40c   : > { %3082 = vst [vmem:[%s5366_s15 + $0x3a0] sm:$0xff] %v2826_v52  ;;  %v3631_v52 = vld [vmem:[%s4202_s9 + $0x108] sm:$0xff] }
 0x40d   : > { %3083 = vst [vmem:[%s5366_s15 + $0x3a8] sm:$0xff] %v2827_v57 }
 0x40e   : > { %2986 = vst [vmem:[%s5366_s15 + $0xa0] sm:$0xff] %v2730_v6  ;;  %v3632_v6 = vld [vmem:[%s4202_s9 + $0x490] sm:$0xff] }
 0x40f   : > { %2987 = vst [vmem:[%s5366_s15 + $0xa8] sm:$0xff] %v2731_v0  ;;  %2502 = vperm.xlu0 %3539, %v5397_v8   ;;  %3483 = vset.pattern.permute.xlu1 %v5354_v55  ;;  %v3633_v0 = vld [vmem:[%s4202_s9 + $0x498] sm:$0xff] }
 0x410   : > { %3480 = vset.pattern.permute.xlu2 %v5312_v15 }
 0x412   : > { %v2006_v41 = vpop.permute.xlu2 %2005 }
 0x413   : > { %v2732_v24 = vmul.f32 %v3618_v31, %v2006_v41  ;;  %v2733_v36 = vmul.f32 %v3619_v27, %v2006_v41  ;;  %v3634_v31 = vld [vmem:[%s4202_s9 + $0x110] sm:$0xff]  ;;  %v3635_v27 = vld [vmem:[%s4202_s9 + $0x118] sm:$0xff] }
 0x415   : > { %2988 = vst [vmem:[%s5366_s15 + $0xb0] sm:$0xff] %v2732_v24 }
 0x416   : > { %2989 = vst [vmem:[%s5366_s15 + $0xb8] sm:$0xff] %v2733_v36 }
 0x417   : > { %3544 = vset.pattern.permute.xlu0 %v5270_v16  ;;  %2120 = vperm.xlu1 %3483, %v5362_v59  }
 0x418   : > { %2096 = vperm.xlu2 %3480, %v5362_v59  }
 0x419   : > { %v2321_v20 = vpop.permute.xlu0 %2320  ;;  %v2012_v56 = vpop.permute.xlu1 %2011 }
 0x41a   : > { %v2836_v23 = vmul.f32 %v3620_v34, %v2321_v20  ;;  %v2837_v38 = vmul.f32 %v3621_v10, %v2321_v20  ;;  %v2734_v21 = vmul.f32 %v3622_v29, %v2012_v56  ;;  %v2735_v53 = vmul.f32 %v3623_v4, %v2012_v56  ;;  %v3636_v56 = vld [vmem:[%s4202_s9 + $0x130] sm:$0xff] }
 0x41c   : > { %3092 = vst [vmem:[%s5366_s15 + $0x3f0] sm:$0xff] %v2836_v23  ;;  %v3637_v23 = vld [vmem:[%s4202_s9 + $0x138] sm:$0xff] }
 0x41d   : > { %3093 = vst [vmem:[%s5366_s15 + $0x3f8] sm:$0xff] %v2837_v38 }
 0x41e   : > { %2990 = vst [vmem:[%s5366_s15 + $0xc0] sm:$0xff] %v2734_v21  ;;  %v3638_v21 = vld [vmem:[%s4202_s9 + $0x4e0] sm:$0xff] }
 0x41f   : > { %2991 = vst [vmem:[%s5366_s15 + $0xc8] sm:$0xff] %v2735_v53  ;;  %2048 = vperm.xlu0 %3544, %v5362_v59   ;;  %3485 = vset.pattern.permute.xlu1 %v5263_v17  ;;  %v3639_v53 = vld [vmem:[%s4202_s9 + $0x4e8] sm:$0xff] }
 0x420   : > { %3482 = vset.pattern.permute.xlu2 %v5427_v48 }
 0x422   : > { %v2024_v11 = vpop.permute.xlu2 %2023 }
 0x423   : > { %v2738_v51 = vmul.f32 %v3624_v32, %v2024_v11  ;;  %v2739_v54 = vmul.f32 %v3625_v40, %v2024_v11  ;;  %v3640_v32 = vld [vmem:[%s4202_s9 + $0x140] sm:$0xff]  ;;  %v3641_v40 = vld [vmem:[%s4202_s9 + $0x148] sm:$0xff] }
 0x425   : > { %2994 = vst [vmem:[%s5366_s15 + $0xe0] sm:$0xff] %v2738_v51 }
 0x426   : > { %2995 = vst [vmem:[%s5366_s15 + $0xe8] sm:$0xff] %v2739_v54 }
 0x427   : > { %2533 = vperm.xlu0 %3544, %v5478_v58   ;;  %2133 = vperm.xlu1 %3485, %v5475_v9  }
 0x428   : > { %2114 = vperm.xlu2 %3482, %v5362_v59  }
 0x429   : > { %v2352_v37 = vpop.permute.xlu0 %2351  ;;  %v2030_v62 = vpop.permute.xlu1 %2029 }
 0x42a   : > { %v2846_v42 = vmul.f32 %v3626_v5, %v2352_v37  ;;  %v2847_v61 = vmul.f32 %v3627_v14, %v2352_v37  ;;  %v2740_v44 = vmul.f32 %v3628_v49, %v2030_v62  ;;  %v2741_v46 = vmul.f32 %v3629_v13, %v2030_v62  ;;  %v3642_v62 = vld [vmem:[%s4202_s9 + $0x150] sm:$0xff]  ;;  %v3645_v13 = vld [vmem:[%s4202_s9 + $0x538] sm:$0xff] }
 0x42b   : > { %v3644_v49 = vld [vmem:[%s4202_s9 + $0x530] sm:$0xff] }
 0x42c   : > { %3102 = vst [vmem:[%s5366_s15 + $0x440] sm:$0xff] %v2846_v42  ;;  %v3643_v42 = vld [vmem:[%s4202_s9 + $0x158] sm:$0xff] }
 0x42d   : > { %3103 = vst [vmem:[%s5366_s15 + $0x448] sm:$0xff] %v2847_v61 }
 0x42e   : > { %2996 = vst [vmem:[%s5366_s15 + $0xf0] sm:$0xff] %v2740_v44 }
 0x42f   : > { %2997 = vst [vmem:[%s5366_s15 + $0xf8] sm:$0xff] %v2741_v46  ;;  %3549 = vset.pattern.permute.xlu0 %v5300_v50  ;;  %3487 = vset.pattern.permute.xlu1 %v5286_v28 }
 0x430   : > { %3484 = vset.pattern.permute.xlu2 %v5324_v47 }
 0x432   : > { %v2037_v45 = vpop.permute.xlu2 %2036 }
 0x433   : > { %v2742_v1 = vmul.f32 %v3630_v22, %v2037_v45  ;;  %v2743_v18 = vmul.f32 %v3631_v52, %v2037_v45  ;;  %v3646_v45 = vld [vmem:[%s4202_s9 + $0x160] sm:$0xff] }
 0x435   : > { %2998 = vst [vmem:[%s5366_s15 + $0x100] sm:$0xff] %v2742_v1  ;;  %v3647_v1 = vld [vmem:[%s4202_s9 + $0x168] sm:$0xff] }
 0x436   : > { %2999 = vst [vmem:[%s5366_s15 + $0x108] sm:$0xff] %v2743_v18 }
 0x437   : > { %2078 = vperm.xlu0 %3549, %v5362_v59   ;;  %2151 = vperm.xlu1 %3487, %v5475_v9  }
 0x438   : > { %2126 = vperm.xlu2 %3484, %v5362_v59  }
 0x439   : > { %v2382_v57 = vpop.permute.xlu0 %2381  ;;  %v2043_v60 = vpop.permute.xlu1 %2042 }
 0x43a   : > { %v2856_v12 = vmul.f32 %v3632_v6, %v2382_v57  ;;  %v2857_v41 = vmul.f32 %v3633_v0, %v2382_v57  ;;  %v2744_v24 = vmul.f32 %v3634_v31, %v2043_v60  ;;  %v2745_v36 = vmul.f32 %v3635_v27, %v2043_v60  ;;  %v3648_v57 = vld [vmem:[%s4202_s9 + $0x180] sm:$0xff]  ;;  %v3649_v6 = vld [vmem:[%s4202_s9 + $0x188] sm:$0xff] }
 0x43b   : > { %v3650_v31 = vld [vmem:[%s4202_s9 + $0x580] sm:$0xff]  ;;  %v3651_v27 = vld [vmem:[%s4202_s9 + $0x588] sm:$0xff] }
 0x43c   : > { %3112 = vst [vmem:[%s5366_s15 + $0x490] sm:$0xff] %v2856_v12 }
 0x43d   : > { %3113 = vst [vmem:[%s5366_s15 + $0x498] sm:$0xff] %v2857_v41 }
 0x43e   : > { %3000 = vst [vmem:[%s5366_s15 + $0x110] sm:$0xff] %v2744_v24 }
 0x43f   : > { %3001 = vst [vmem:[%s5366_s15 + $0x118] sm:$0xff] %v2745_v36  ;;  %2563 = vperm.xlu0 %3549, %v5478_v58   ;;  %3489 = vset.pattern.permute.xlu1 %v5283_v35 }
 0x440   : > { %3486 = vset.pattern.permute.xlu2 %v5270_v16 }
 0x442   : > { %v2055_v20 = vpop.permute.xlu2 %2054 }
 0x443   : > { %v2748_v34 = vmul.f32 %v3636_v56, %v2055_v20  ;;  %v2749_v10 = vmul.f32 %v3637_v23, %v2055_v20  ;;  %v3652_v20 = vld [vmem:[%s4202_s9 + $0x190] sm:$0xff] }
 0x445   : > { %3004 = vst [vmem:[%s5366_s15 + $0x130] sm:$0xff] %v2748_v34  ;;  %v3653_v34 = vld [vmem:[%s4202_s9 + $0x198] sm:$0xff] }
 0x446   : > { %3005 = vst [vmem:[%s5366_s15 + $0x138] sm:$0xff] %v2749_v10  ;;  %v3654_v10 = vld [vmem:[%s4202_s9 + $0x1a0] sm:$0xff] }
 0x447   : > { %3554 = vset.pattern.permute.xlu0 %v5327_v3  ;;  %2163 = vperm.xlu1 %3489, %v5475_v9  }
 0x448   : > { %2145 = vperm.xlu2 %3486, %v5475_v9  }
 0x449   : > { %v2412_v38 = vpop.permute.xlu0 %2411  ;;  %v2061_v29 = vpop.permute.xlu1 %2060 }
 0x44a   : > { %v2866_v4 = vmul.f32 %v3638_v21, %v2412_v38  ;;  %v2867_v11 = vmul.f32 %v3639_v53, %v2412_v38  ;;  %v2750_v51 = vmul.f32 %v3640_v32, %v2061_v29  ;;  %v2751_v54 = vmul.f32 %v3641_v40, %v2061_v29  ;;  %v3655_v29 = vld [vmem:[%s4202_s9 + $0x1a8] sm:$0xff]  ;;  %v3656_v32 = vld [vmem:[%s4202_s9 + $0xd0] sm:$0xff]  ;;  %v3657_v40 = vld [vmem:[%s4202_s9 + $0xd8] sm:$0xff] }
 0x44c   : > { %3122 = vst [vmem:[%s5366_s15 + $0x4e0] sm:$0xff] %v2866_v4  ;;  %v5571_v4 = vperm.slane %v5291_v30, 3 }
 0x44d   : > { %3123 = vst [vmem:[%s5366_s15 + $0x4e8] sm:$0xff] %v2867_v11 }
 0x44e   : > { %3006 = vst [vmem:[%s5366_s15 + $0x140] sm:$0xff] %v2750_v51 }
 0x44f   : > { %3007 = vst [vmem:[%s5366_s15 + $0x148] sm:$0xff] %v2751_v54  ;;  %2108 = vperm.xlu0 %3554, %v5362_v59   ;;  %3491 = vset.pattern.permute.xlu1 %v5267_v43  ;;  %v3658_v54 = vld [vmem:[%s4202_s9 + $0x1b0] sm:$0xff] }
 0x450   : > { %3488 = vset.pattern.permute.xlu2 %v5303_v7 }
 0x452   : > { %v2067_v37 = vpop.permute.xlu2 %2066 }
 0x453   : > { %v2752_v5 = vmul.f32 %v3642_v62, %v2067_v37  ;;  %v2753_v14 = vmul.f32 %v3643_v42, %v2067_v37  ;;  %v3659_v62 = vld [vmem:[%s4202_s9 + $0x1b8] sm:$0xff] }
 0x455   : > { %3008 = vst [vmem:[%s5366_s15 + $0x150] sm:$0xff] %v2752_v5 }
 0x456   : > { %3009 = vst [vmem:[%s5366_s15 + $0x158] sm:$0xff] %v2753_v14  ;;  %v3660_v14 = vld [vmem:[%s4202_s9 + $0x5d0] sm:$0xff] }
 0x457   : > { %2593 = vperm.xlu0 %3554, %v5478_v58   ;;  %2181 = vperm.xlu1 %3491, %v5475_v9  }
 0x458   : > { %2157 = vperm.xlu2 %3488, %v5475_v9  }
 0x459   : > { %v2443_v59 = vpop.permute.xlu0 %2442  ;;  %v2073_v61 = vpop.permute.xlu1 %2072 }
 0x45a   : > { %v2876_v44 = vmul.f32 %v3644_v49, %v2443_v59  ;;  %v2877_v46 = vmul.f32 %v3645_v13, %v2443_v59  ;;  %v2754_v22 = vmul.f32 %v3646_v45, %v2073_v61  ;;  %v2755_v52 = vmul.f32 %v3647_v1, %v2073_v61  ;;  %v3661_v61 = vld [vmem:[%s4202_s9 + $0x5d8] sm:$0xff]  ;;  %v3662_v13 = vld [vmem:[%s4202_s9 + $0x1d0] sm:$0xff] }
 0x45b   : > { %v3663_v45 = vld [vmem:[%s4202_s9 + $0x1d8] sm:$0xff] }
 0x45c   : > { %3132 = vst [vmem:[%s5366_s15 + $0x530] sm:$0xff] %v2876_v44 }
 0x45d   : > { %3133 = vst [vmem:[%s5366_s15 + $0x538] sm:$0xff] %v2877_v46 }
 0x45e   : > { %3010 = vst [vmem:[%s5366_s15 + $0x160] sm:$0xff] %v2754_v22 }
 0x45f   : > { %3011 = vst [vmem:[%s5366_s15 + $0x168] sm:$0xff] %v2755_v52  ;;  %3559 = vset.pattern.permute.xlu0 %v5351_v33  ;;  %3493 = vset.pattern.permute.xlu1 %v5312_v15  ;;  %v3664_v52 = vld [vmem:[%s4202_s9 + $0x1e0] sm:$0xff] }
 0x460   : > { %3490 = vset.pattern.permute.xlu2 %v5300_v50 }
 0x462   : > { %v2085_v18 = vpop.permute.xlu2 %2084 }
 0x463   : > { %v2758_v60 = vmul.f32 %v3648_v57, %v2085_v18  ;;  %v2759_v12 = vmul.f32 %v3649_v6, %v2085_v18  ;;  %v3665_v57 = vld [vmem:[%s4202_s9 + $0x1e8] sm:$0xff] }
 0x465   : > { %3014 = vst [vmem:[%s5366_s15 + $0x180] sm:$0xff] %v2758_v60 }
 0x466   : > { %3015 = vst [vmem:[%s5366_s15 + $0x188] sm:$0xff] %v2759_v12  ;;  %v3666_v12 = vld [vmem:[%s4202_s9 + $0x120] sm:$0xff] }
 0x467   : > { %1945 = vperm.xlu0 %3559, %v5277_v25   ;;  %2193 = vperm.xlu1 %3493, %v5475_v9  }
 0x468   : > { %2175 = vperm.xlu2 %3490, %v5475_v9  }
 0x469   : > { %v2473_v0 = vpop.permute.xlu0 %2472  ;;  %v2091_v41 = vpop.permute.xlu1 %2090 }
 0x46a   : > { %v2886_v24 = vmul.f32 %v3650_v31, %v2473_v0  ;;  %v2887_v36 = vmul.f32 %v3651_v27, %v2473_v0  ;;  %v2760_v56 = vmul.f32 %v3652_v20, %v2091_v41  ;;  %v2761_v23 = vmul.f32 %v3653_v34, %v2091_v41  ;;  %v3667_v41 = vld [vmem:[%s4202_s9 + $0x128] sm:$0xff]  ;;  %v3668_v27 = vld [vmem:[%s4202_s9 + $0x1f0] sm:$0xff]  ;;  %v3669_v20 = vld [vmem:[%s4202_s9 + $0x1f8] sm:$0xff] }
 0x46c   : > { %3142 = vst [vmem:[%s5366_s15 + $0x580] sm:$0xff] %v2886_v24 }
 0x46d   : > { %3143 = vst [vmem:[%s5366_s15 + $0x588] sm:$0xff] %v2887_v36 }
 0x46e   : > { %3016 = vst [vmem:[%s5366_s15 + $0x190] sm:$0xff] %v2760_v56 }
 0x46f   : > { %3017 = vst [vmem:[%s5366_s15 + $0x198] sm:$0xff] %v2761_v23  ;;  %2139 = vperm.xlu0 %3559, %v5475_v9   ;;  %3495 = vset.pattern.permute.xlu1 %v5427_v48 }
 0x470   : > { %3492 = vset.pattern.permute.xlu2 %v5330_v19 }
 0x472   : > { %v2097_v25 = vpop.permute.xlu2 %2096 }
 0x473   : > { %v2762_v38 = vmul.f32 %v3654_v10, %v2097_v25  ;;  %v2763_v21 = vmul.f32 %v3655_v29, %v2097_v25  ;;  %v3670_v25 = vld [vmem:[%s4202_s9 + $0x620] sm:$0xff] }
 0x475   : > { %3018 = vst [vmem:[%s5366_s15 + $0x1a0] sm:$0xff] %v2762_v38  ;;  %v3671_v38 = vld [vmem:[%s4202_s9 + $0x628] sm:$0xff] }
 0x476   : > { %3019 = vst [vmem:[%s5366_s15 + $0x1a8] sm:$0xff] %v2763_v21  ;;  %v3672_v21 = vld [vmem:[%s4202_s9 + $0x200] sm:$0xff] }
 0x477   : > { %2624 = vperm.xlu0 %3559, %v5571_v4   ;;  %2211 = vperm.xlu1 %3495, %v5475_v9  }
 0x478   : > { %2187 = vperm.xlu2 %3492, %v5475_v9  }
 0x479   : > { %v2018_v53 = vpop.permute.xlu0 %2017  ;;  %v2103_v11 = vpop.permute.xlu1 %2102 }
 0x47a   : > { %v2736_v51 = vmul.f32 %v3656_v32, %v2018_v53  ;;  %v2737_v30 = vmul.f32 %v3657_v40, %v2018_v53  ;;  %v2764_v37 = vmul.f32 %v3658_v54, %v2103_v11  ;;  %v2765_v5 = vmul.f32 %v3659_v62, %v2103_v11  ;;  %v3673_v11 = vld [vmem:[%s4202_s9 + $0x208] sm:$0xff]  ;;  %v3674_v40 = vld [vmem:[%s4202_s9 + $0x220] sm:$0xff] }
 0x47b   : > { %v3675_v54 = vld [vmem:[%s4202_s9 + $0x228] sm:$0xff] }
 0x47c   : > { %2992 = vst [vmem:[%s5366_s15 + $0xd0] sm:$0xff] %v2736_v51 }
 0x47d   : > { %2993 = vst [vmem:[%s5366_s15 + $0xd8] sm:$0xff] %v2737_v30 }
 0x47e   : > { %3020 = vst [vmem:[%s5366_s15 + $0x1b0] sm:$0xff] %v2764_v37 }
 0x47f   : > { %3021 = vst [vmem:[%s5366_s15 + $0x1b8] sm:$0xff] %v2765_v5  ;;  %3564 = vset.pattern.permute.xlu0 %v5315_v2  ;;  %3497 = vset.pattern.permute.xlu1 %v5324_v47  ;;  %v3676_v5 = vld [vmem:[%s4202_s9 + $0x170] sm:$0xff] }
 0x480   : > { %3494 = vset.pattern.permute.xlu2 %v5327_v3 }
 0x481   : > { %v2503_v42 = vpop.permute.xlu0 %2502 }
 0x482   : > { %v2896_v59 = vmul.f32 %v3660_v14, %v2503_v42  ;;  %v2897_v49 = vmul.f32 %v3661_v61, %v2503_v42  ;;  %v2115_v44 = vpop.permute.xlu2 %2114  ;;  %v3677_v14 = vld [vmem:[%s4202_s9 + $0x178] sm:$0xff]  ;;  %v3678_v61 = vld [vmem:[%s4202_s9 + $0x230] sm:$0xff] }
 0x483   : > { %v2768_v46 = vmul.f32 %v3662_v13, %v2115_v44  ;;  %v2769_v22 = vmul.f32 %v3663_v45, %v2115_v44  ;;  %v3679_v44 = vld [vmem:[%s4202_s9 + $0x238] sm:$0xff]  ;;  %v3680_v45 = vld [vmem:[%s4202_s9 + $0x670] sm:$0xff] }
 0x484   : > { %3152 = vst [vmem:[%s5366_s15 + $0x5d0] sm:$0xff] %v2896_v59 }
 0x485   : > { %3153 = vst [vmem:[%s5366_s15 + $0x5d8] sm:$0xff] %v2897_v49 }
 0x486   : > { %3024 = vst [vmem:[%s5366_s15 + $0x1d0] sm:$0xff] %v2768_v46 }
 0x487   : > { %3025 = vst [vmem:[%s5366_s15 + $0x1d8] sm:$0xff] %v2769_v22  ;;  %2169 = vperm.xlu0 %3564, %v5475_v9   ;;  %2223 = vperm.xlu1 %3497, %v5475_v9  }
 0x488   : > { %2205 = vperm.xlu2 %3494, %v5475_v9  }
 0x489   : > { %v2121_v1 = vpop.permute.xlu1 %2120 }
 0x48a   : > { %v2770_v18 = vmul.f32 %v3664_v52, %v2121_v1  ;;  %v2771_v60 = vmul.f32 %v3665_v57, %v2121_v1  ;;  %v3681_v1 = vld [vmem:[%s4202_s9 + $0x678] sm:$0xff]  ;;  %v3682_v57 = vld [vmem:[%s4202_s9 + $0x240] sm:$0xff] }
 0x48c   : > { %3026 = vst [vmem:[%s5366_s15 + $0x1e0] sm:$0xff] %v2770_v18 }
 0x48d   : > { %3027 = vst [vmem:[%s5366_s15 + $0x1e8] sm:$0xff] %v2771_v60 }
 0x48f   : > { %2654 = vperm.xlu0 %3564, %v5571_v4   ;;  %3500 = vset.pattern.permute.xlu1 %v5270_v16 }
 0x490   : > { %3496 = vset.pattern.permute.xlu2 %v5354_v55 }
 0x491   : > { %v2049_v6 = vpop.permute.xlu0 %2048 }
 0x492   : > { %v2746_v0 = vmul.f32 %v3666_v12, %v2049_v6  ;;  %v2747_v31 = vmul.f32 %v3667_v41, %v2049_v6  ;;  %v2127_v24 = vpop.permute.xlu2 %2126  ;;  %v3683_v6 = vld [vmem:[%s4202_s9 + $0x248] sm:$0xff]  ;;  %v3684_v41 = vld [vmem:[%s4202_s9 + $0x250] sm:$0xff] }
 0x493   : > { %v2772_v36 = vmul.f32 %v3668_v27, %v2127_v24  ;;  %v2773_v56 = vmul.f32 %v3669_v20, %v2127_v24  ;;  %v3685_v24 = vld [vmem:[%s4202_s9 + $0x258] sm:$0xff]  ;;  %v3686_v20 = vld [vmem:[%s4202_s9 + $0x1c0] sm:$0xff] }
 0x494   : > { %3002 = vst [vmem:[%s5366_s15 + $0x120] sm:$0xff] %v2746_v0 }
 0x495   : > { %3003 = vst [vmem:[%s5366_s15 + $0x128] sm:$0xff] %v2747_v31 }
 0x496   : > { %3028 = vst [vmem:[%s5366_s15 + $0x1f0] sm:$0xff] %v2772_v36 }
 0x497   : > { %3029 = vst [vmem:[%s5366_s15 + $0x1f8] sm:$0xff] %v2773_v56  ;;  %3569 = vset.pattern.permute.xlu0 %v5339_v63  ;;  %2242 = vperm.xlu1 %3500, %v5294_v39  }
 0x498   : > { %2217 = vperm.xlu2 %3496, %v5475_v9  }
 0x499   : > { %v2534_v34 = vpop.permute.xlu0 %2533  ;;  %v2134_v23 = vpop.permute.xlu1 %2133 }
 0x49a   : > { %v2906_v10 = vmul.f32 %v3670_v25, %v2534_v34  ;;  %v2907_v29 = vmul.f32 %v3671_v38, %v2534_v34  ;;  %v2774_v53 = vmul.f32 %v3672_v21, %v2134_v23  ;;  %v2775_v32 = vmul.f32 %v3673_v11, %v2134_v23  ;;  %v3687_v34 = vld [vmem:[%s4202_s9 + $0x1c8] sm:$0xff] }
 0x49c   : > { %3162 = vst [vmem:[%s5366_s15 + $0x620] sm:$0xff] %v2906_v10  ;;  %v3688_v10 = vld [vmem:[%s4202_s9 + $0x270] sm:$0xff] }
 0x49d   : > { %3163 = vst [vmem:[%s5366_s15 + $0x628] sm:$0xff] %v2907_v29  ;;  %v3689_v29 = vld [vmem:[%s4202_s9 + $0x278] sm:$0xff] }
 0x49e   : > { %3030 = vst [vmem:[%s5366_s15 + $0x200] sm:$0xff] %v2774_v53 }
 0x49f   : > { %3031 = vst [vmem:[%s5366_s15 + $0x208] sm:$0xff] %v2775_v32  ;;  %2199 = vperm.xlu0 %3569, %v5475_v9   ;;  %3502 = vset.pattern.permute.xlu1 %v5303_v7  ;;  %v3690_v32 = vld [vmem:[%s4202_s9 + $0x6c0] sm:$0xff] }
 0x4a0   : > { %3499 = vset.pattern.permute.xlu2 %v5351_v33 }
 0x4a2   : > { %v2146_v51 = vpop.permute.xlu2 %2145 }
 0x4a3   : > { %v2778_v30 = vmul.f32 %v3674_v40, %v2146_v51  ;;  %v2779_v37 = vmul.f32 %v3675_v54, %v2146_v51  ;;  %v3691_v40 = vld [vmem:[%s4202_s9 + $0x6c8] sm:$0xff]  ;;  %v3692_v54 = vld [vmem:[%s4202_s9 + $0x280] sm:$0xff] }
 0x4a5   : > { %3034 = vst [vmem:[%s5366_s15 + $0x220] sm:$0xff] %v2778_v30 }
 0x4a6   : > { %3035 = vst [vmem:[%s5366_s15 + $0x228] sm:$0xff] %v2779_v37 }
 0x4a7   : > { %2684 = vperm.xlu0 %3569, %v5571_v4   ;;  %2254 = vperm.xlu1 %3502, %v5294_v39  }
 0x4a8   : > { %2236 = vperm.xlu2 %3499, %v5294_v39  }
 0x4a9   : > { %v2079_v9 = vpop.permute.xlu0 %2078  ;;  %v2152_v62 = vpop.permute.xlu1 %2151 }
 0x4aa   : > { %v2756_v42 = vmul.f32 %v3676_v5, %v2079_v9  ;;  %v2757_v59 = vmul.f32 %v3677_v14, %v2079_v9  ;;  %v2780_v49 = vmul.f32 %v3678_v61, %v2152_v62  ;;  %v2781_v13 = vmul.f32 %v3679_v44, %v2152_v62  ;;  %v3693_v9 = vld [vmem:[%s4202_s9 + $0x288] sm:$0xff] }
 0x4ac   : > { %3012 = vst [vmem:[%s5366_s15 + $0x170] sm:$0xff] %v2756_v42  ;;  %v3694_v42 = vld [vmem:[%s4202_s9 + $0x290] sm:$0xff] }
 0x4ad   : > { %3013 = vst [vmem:[%s5366_s15 + $0x178] sm:$0xff] %v2757_v59  ;;  %v3695_v59 = vld [vmem:[%s4202_s9 + $0x298] sm:$0xff] }
 0x4ae   : > { %3036 = vst [vmem:[%s5366_s15 + $0x230] sm:$0xff] %v2780_v49 }
 0x4af   : > { %3037 = vst [vmem:[%s5366_s15 + $0x238] sm:$0xff] %v2781_v13  ;;  %3505 = vset.pattern.permute.xlu1 %v5300_v50  ;;  %3578 = vset.pattern.permute.xlu0 %v5324_v47  ;;  %v3696_v13 = vld [vmem:[%s4202_s9 + $0x10] sm:$0xff] }
 0x4b0   : > { %3501 = vset.pattern.permute.xlu2 %v5286_v28 }
 0x4b1   : > { %v2564_v46 = vpop.permute.xlu0 %2563 }
 0x4b2   : > { %v2916_v22 = vmul.f32 %v3680_v45, %v2564_v46  ;;  %v2917_v52 = vmul.f32 %v3681_v1, %v2564_v46  ;;  %v2158_v18 = vpop.permute.xlu2 %2157  ;;  %v3697_v45 = vld [vmem:[%s4202_s9 + $0x18] sm:$0xff]  ;;  %v3698_v1 = vld [vmem:[%s4202_s9 + $0x2a0] sm:$0xff] }
 0x4b3   : > { %v2782_v60 = vmul.f32 %v3682_v57, %v2158_v18  ;;  %v2783_v12 = vmul.f32 %v3683_v6, %v2158_v18  ;;  %v3699_v18 = vld [vmem:[%s4202_s9 + $0x2a8] sm:$0xff]  ;;  %v3700_v6 = vld [vmem:[%s4202_s9 + $0x210] sm:$0xff] }
 0x4b4   : > { %3172 = vst [vmem:[%s5366_s15 + $0x670] sm:$0xff] %v2916_v22 }
 0x4b5   : > { %3173 = vst [vmem:[%s5366_s15 + $0x678] sm:$0xff] %v2917_v52 }
 0x4b6   : > { %3038 = vst [vmem:[%s5366_s15 + $0x240] sm:$0xff] %v2782_v60 }
 0x4b7   : > { %3039 = vst [vmem:[%s5366_s15 + $0x248] sm:$0xff] %v2783_v12  ;;  %2272 = vperm.xlu1 %3505, %v5294_v39  }
 0x4b8   : > { %2248 = vperm.xlu2 %3501, %v5294_v39  }
 0x4b9   : > { %v2164_v0 = vpop.permute.xlu1 %2163 }
 0x4ba   : > { %v2784_v31 = vmul.f32 %v3684_v41, %v2164_v0  ;;  %v2785_v27 = vmul.f32 %v3685_v24, %v2164_v0  ;;  %v3701_v0 = vld [vmem:[%s4202_s9 + $0x218] sm:$0xff]  ;;  %v3702_v24 = vld [vmem:[%s4202_s9 + $0x2c0] sm:$0xff] }
 0x4bc   : > { %3040 = vst [vmem:[%s5366_s15 + $0x250] sm:$0xff] %v2784_v31 }
 0x4bd   : > { %3041 = vst [vmem:[%s5366_s15 + $0x258] sm:$0xff] %v2785_v27 }
 0x4bf   : > { %3507 = vset.pattern.permute.xlu1 %v5330_v19 }
 0x4c0   : > { %3504 = vset.pattern.permute.xlu2 %v5315_v2 }
 0x4c1   : > { %v2109_v36 = vpop.permute.xlu0 %2108 }
 0x4c2   : > { %v2766_v56 = vmul.f32 %v3686_v20, %v2109_v36  ;;  %v2767_v23 = vmul.f32 %v3687_v34, %v2109_v36  ;;  %v2176_v25 = vpop.permute.xlu2 %2175  ;;  %v3703_v36 = vld [vmem:[%s4202_s9 + $0x2c8] sm:$0xff] }
 0x4c3   : > { %v2788_v38 = vmul.f32 %v3688_v10, %v2176_v25  ;;  %v2789_v21 = vmul.f32 %v3689_v29, %v2176_v25  ;;  %v3705_v10 = vld [vmem:[%s4202_s9 + $0x718] sm:$0xff]  ;;  %v3706_v29 = vld [vmem:[%s4202_s9 + $0x2d0] sm:$0xff] }
 0x4c4   : > { %3022 = vst [vmem:[%s5366_s15 + $0x1c0] sm:$0xff] %v2766_v56 }
 0x4c5   : > { %3023 = vst [vmem:[%s5366_s15 + $0x1c8] sm:$0xff] %v2767_v23  ;;  %v3704_v23 = vld [vmem:[%s4202_s9 + $0x710] sm:$0xff] }
 0x4c6   : > { %3044 = vst [vmem:[%s5366_s15 + $0x270] sm:$0xff] %v2788_v38 }
 0x4c7   : > { %3045 = vst [vmem:[%s5366_s15 + $0x278] sm:$0xff] %v2789_v21  ;;  %2284 = vperm.xlu1 %3507, %v5294_v39  }
 0x4c8   : > { %2266 = vperm.xlu2 %3504, %v5294_v39  }
 0x4c9   : > { %v2594_v53 = vpop.permute.xlu0 %2593  ;;  %v2182_v11 = vpop.permute.xlu1 %2181 }
 0x4ca   : > { %v2926_v51 = vmul.f32 %v3690_v32, %v2594_v53  ;;  %v2927_v30 = vmul.f32 %v3691_v40, %v2594_v53  ;;  %v2790_v37 = vmul.f32 %v3692_v54, %v2182_v11  ;;  %v2791_v62 = vmul.f32 %v3693_v9, %v2182_v11  ;;  %v3707_v53 = vld [vmem:[%s4202_s9 + $0x2d8] sm:$0xff] }
 0x4cc   : > { %3182 = vst [vmem:[%s5366_s15 + $0x6c0] sm:$0xff] %v2926_v51  ;;  %v3708_v51 = vld [vmem:[%s4202_s9 + $0x2e0] sm:$0xff] }
 0x4cd   : > { %3183 = vst [vmem:[%s5366_s15 + $0x6c8] sm:$0xff] %v2927_v30  ;;  %v3709_v30 = vld [vmem:[%s4202_s9 + $0x2e8] sm:$0xff] }
 0x4ce   : > { %3046 = vst [vmem:[%s5366_s15 + $0x280] sm:$0xff] %v2790_v37 }
 0x4cf   : > { %3047 = vst [vmem:[%s5366_s15 + $0x288] sm:$0xff] %v2791_v62  ;;  %3510 = vset.pattern.permute.xlu1 %v5327_v3  ;;  %v3710_v62 = vld [vmem:[%s4202_s9 + $0x260] sm:$0xff] }
 0x4d0   : > { %3506 = vset.pattern.permute.xlu2 %v5267_v43 }
 0x4d2   : > { %v2188_v5 = vpop.permute.xlu2 %2187 }
 0x4d3   : > { %v2792_v14 = vmul.f32 %v3694_v42, %v2188_v5  ;;  %v2793_v61 = vmul.f32 %v3695_v59, %v2188_v5  ;;  %v3711_v42 = vld [vmem:[%s4202_s9 + $0x268] sm:$0xff]  ;;  %v3712_v59 = vld [vmem:[%s4202_s9 + $0x2f0] sm:$0xff] }
 0x4d5   : > { %3048 = vst [vmem:[%s5366_s15 + $0x290] sm:$0xff] %v2792_v14 }
 0x4d6   : > { %3049 = vst [vmem:[%s5366_s15 + $0x298] sm:$0xff] %v2793_v61 }
 0x4d7   : > { %2302 = vperm.xlu1 %3510, %v5294_v39  }
 0x4d8   : > { %2278 = vperm.xlu2 %3506, %v5294_v39  }
 0x4d9   : > { %v1946_v49 = vpop.permute.xlu0 %1945  ;;  %v2194_v44 = vpop.permute.xlu1 %2193 }
 0x4da   : > { %v2712_v46 = vmul.f32 %v3696_v13, %v1946_v49  ;;  %v2713_v22 = vmul.f32 %v3697_v45, %v1946_v49  ;;  %v2794_v52 = vmul.f32 %v3698_v1, %v2194_v44  ;;  %v2795_v57 = vmul.f32 %v3699_v18, %v2194_v44  ;;  %v3713_v49 = vld [vmem:[%s4202_s9 + $0x2f8] sm:$0xff]  ;;  %v3714_v13 = vld [vmem:[%s4202_s9 + $0x760] sm:$0xff]  ;;  %v3715_v45 = vld [vmem:[%s4202_s9 + $0x768] sm:$0xff] }
 0x4dc   : > { %2968 = vst [vmem:[%s5366_s15 + $0x10] sm:$0xff] %v2712_v46 }
 0x4dd   : > { %2969 = vst [vmem:[%s5366_s15 + $0x18] sm:$0xff] %v2713_v22 }
 0x4de   : > { %3050 = vst [vmem:[%s5366_s15 + $0x2a0] sm:$0xff] %v2794_v52  ;;  %v3716_v52 = vld [vmem:[%s4202_s9 + $0x310] sm:$0xff] }
 0x4df   : > { %3051 = vst [vmem:[%s5366_s15 + $0x2a8] sm:$0xff] %v2795_v57  ;;  %3512 = vset.pattern.permute.xlu1 %v5354_v55  ;;  %v3717_v57 = vld [vmem:[%s4202_s9 + $0x318] sm:$0xff] }
 0x4e0   : > { %3509 = vset.pattern.permute.xlu2 %v5339_v63 }
 0x4e1   : > { %v2140_v60 = vpop.permute.xlu0 %2139 }
 0x4e2   : > { %v2776_v12 = vmul.f32 %v3700_v6, %v2140_v60  ;;  %v2777_v41 = vmul.f32 %v3701_v0, %v2140_v60  ;;  %v2206_v31 = vpop.permute.xlu2 %2205 }
 0x4e3   : > { %v2798_v27 = vmul.f32 %v3702_v24, %v2206_v31  ;;  %v2799_v20 = vmul.f32 %v3703_v36, %v2206_v31 }
 0x4e4   : > { %3032 = vst [vmem:[%s5366_s15 + $0x210] sm:$0xff] %v2776_v12  ;;  %v3718_v12 = vld [vmem:[%s4202_s9 + $0x320] sm:$0xff] }
 0x4e5   : > { %3033 = vst [vmem:[%s5366_s15 + $0x218] sm:$0xff] %v2777_v41  ;;  %v3719_v41 = vld [vmem:[%s4202_s9 + $0x328] sm:$0xff] }
 0x4e6   : > { %3054 = vst [vmem:[%s5366_s15 + $0x2c0] sm:$0xff] %v2798_v27  ;;  %v3720_v27 = vld [vmem:[%s4202_s9 + $0x2b0] sm:$0xff] }
 0x4e7   : > { %3055 = vst [vmem:[%s5366_s15 + $0x2c8] sm:$0xff] %v2799_v20  ;;  %2314 = vperm.xlu1 %3512, %v5294_v39   ;;  %v3721_v20 = vld [vmem:[%s4202_s9 + $0x2b8] sm:$0xff] }
 0x4e8   : > { %2296 = vperm.xlu2 %3509, %v5294_v39  }
 0x4e9   : > { %v2625_v56 = vpop.permute.xlu0 %2624  ;;  %v2212_v34 = vpop.permute.xlu1 %2211 }
 0x4ea   : > { %v2936_v25 = vmul.f32 %v3704_v23, %v2625_v56  ;;  %v2937_v38 = vmul.f32 %v3705_v10, %v2625_v56  ;;  %v2800_v21 = vmul.f32 %v3706_v29, %v2212_v34  ;;  %v2801_v11 = vmul.f32 %v3707_v53, %v2212_v34  ;;  %v3722_v23 = vld [vmem:[%s4202_s9 + $0x330] sm:$0xff]  ;;  %v3723_v10 = vld [vmem:[%s4202_s9 + $0x338] sm:$0xff] }
 0x4eb   : > { %v3724_v53 = vld [vmem:[%s4202_s9 + $0x7b0] sm:$0xff] }
 0x4ec   : > { %3192 = vst [vmem:[%s5366_s15 + $0x710] sm:$0xff] %v2936_v25 }
 0x4ed   : > { %3193 = vst [vmem:[%s5366_s15 + $0x718] sm:$0xff] %v2937_v38 }
 0x4ee   : > { %3056 = vst [vmem:[%s5366_s15 + $0x2d0] sm:$0xff] %v2800_v21 }
 0x4ef   : > { %3057 = vst [vmem:[%s5366_s15 + $0x2d8] sm:$0xff] %v2801_v11  ;;  %3515 = vset.pattern.permute.xlu1 %v5351_v33 }
 0x4f0   : > { %3511 = vset.pattern.permute.xlu2 %v5427_v48 }
 0x4f2   : > { %v2218_v32 = vpop.permute.xlu2 %2217 }
 0x4f3   : > { %v2802_v40 = vmul.f32 %v3708_v51, %v2218_v32  ;;  %v2803_v54 = vmul.f32 %v3709_v30, %v2218_v32  ;;  %v3725_v32 = vld [vmem:[%s4202_s9 + $0x7b8] sm:$0xff] }
 0x4f5   : > { %3058 = vst [vmem:[%s5366_s15 + $0x2e0] sm:$0xff] %v2802_v40  ;;  %v3726_v40 = vld [vmem:[%s4202_s9 + $0x340] sm:$0xff] }
 0x4f6   : > { %3059 = vst [vmem:[%s5366_s15 + $0x2e8] sm:$0xff] %v2803_v54  ;;  %v3727_v54 = vld [vmem:[%s4202_s9 + $0x348] sm:$0xff] }
 0x4f7   : > { %2333 = vperm.xlu1 %3515, %v5345_v26  }
 0x4f8   : > { %2308 = vperm.xlu2 %3511, %v5294_v39  }
 0x4f9   : > { %v2170_v37 = vpop.permute.xlu0 %2169  ;;  %v2224_v9 = vpop.permute.xlu1 %2223 }
 0x4fa   : > { %v2786_v5 = vmul.f32 %v3710_v62, %v2170_v37  ;;  %v2787_v14 = vmul.f32 %v3711_v42, %v2170_v37  ;;  %v2804_v61 = vmul.f32 %v3712_v59, %v2224_v9  ;;  %v2805_v44 = vmul.f32 %v3713_v49, %v2224_v9  ;;  %v3728_v62 = vld [vmem:[%s4202_s9 + $0x360] sm:$0xff]  ;;  %v3729_v42 = vld [vmem:[%s4202_s9 + $0x368] sm:$0xff] }
 0x4fc   : > { %3042 = vst [vmem:[%s5366_s15 + $0x260] sm:$0xff] %v2786_v5 }
 0x4fd   : > { %3043 = vst [vmem:[%s5366_s15 + $0x268] sm:$0xff] %v2787_v14 }
 0x4fe   : > { %3060 = vst [vmem:[%s5366_s15 + $0x2f0] sm:$0xff] %v2804_v61  ;;  %v3730_v61 = vld [vmem:[%s4202_s9 + $0x370] sm:$0xff] }
 0x4ff   : > { %3061 = vst [vmem:[%s5366_s15 + $0x2f8] sm:$0xff] %v2805_v44  ;;  %3517 = vset.pattern.permute.xlu1 %v5286_v28  ;;  %v3731_v44 = vld [vmem:[%s4202_s9 + $0x378] sm:$0xff] }
 0x500   : > { %3514 = vset.pattern.permute.xlu2 %v5263_v17 }
 0x501   : > { %v2655_v39 = vpop.permute.xlu0 %2654 }
 0x502   : > { %v2946_v46 = vmul.f32 %v3714_v13, %v2655_v39  ;;  %v2947_v22 = vmul.f32 %v3715_v45, %v2655_v39  ;;  %v2237_v1 = vpop.permute.xlu2 %2236 }
 0x503   : > { %v2808_v18 = vmul.f32 %v3716_v52, %v2237_v1  ;;  %v2809_v60 = vmul.f32 %v3717_v57, %v2237_v1 }
 0x504   : > { %3202 = vst [vmem:[%s5366_s15 + $0x760] sm:$0xff] %v2946_v46  ;;  %v3732_v46 = vld [vmem:[%s4202_s9 + $0x380] sm:$0xff] }
 0x505   : > { %3203 = vst [vmem:[%s5366_s15 + $0x768] sm:$0xff] %v2947_v22  ;;  %v3733_v22 = vld [vmem:[%s4202_s9 + $0x388] sm:$0xff] }
 0x506   : > { %3064 = vst [vmem:[%s5366_s15 + $0x310] sm:$0xff] %v2808_v18  ;;  %v3734_v18 = vld [vmem:[%s4202_s9 + $0x390] sm:$0xff] }
 0x507   : > { %3065 = vst [vmem:[%s5366_s15 + $0x318] sm:$0xff] %v2809_v60  ;;  %2345 = vperm.xlu1 %3517, %v5345_v26   ;;  %v3735_v60 = vld [vmem:[%s4202_s9 + $0x398] sm:$0xff] }
 0x508   : > { %2327 = vperm.xlu2 %3514, %v5345_v26  }
 0x509   : > { %v2243_v6 = vpop.permute.xlu1 %2242 }
 0x50a   : > { %v2810_v0 = vmul.f32 %v3718_v12, %v2243_v6  ;;  %v2811_v31 = vmul.f32 %v3719_v41, %v2243_v6 }
 0x50c   : > { %3066 = vst [vmem:[%s5366_s15 + $0x320] sm:$0xff] %v2810_v0  ;;  %v3736_v0 = vld [vmem:[%s4202_s9 + $0x3b0] sm:$0xff] }
 0x50d   : > { %3067 = vst [vmem:[%s5366_s15 + $0x328] sm:$0xff] %v2811_v31  ;;  %v3737_v31 = vld [vmem:[%s4202_s9 + $0x3b8] sm:$0xff] }
 0x50f   : > { %3520 = vset.pattern.permute.xlu1 %v5315_v2 }
 0x510   : > { %3516 = vset.pattern.permute.xlu2 %v5270_v16 }
 0x511   : > { %v2200_v24 = vpop.permute.xlu0 %2199 }
 0x512   : > { %v2796_v36 = vmul.f32 %v3720_v27, %v2200_v24  ;;  %v2797_v56 = vmul.f32 %v3721_v20, %v2200_v24  ;;  %v2249_v34 = vpop.permute.xlu2 %2248 }
 0x513   : > { %v2812_v25 = vmul.f32 %v3722_v23, %v2249_v34  ;;  %v2813_v38 = vmul.f32 %v3723_v10, %v2249_v34 }
 0x514   : > { %3052 = vst [vmem:[%s5366_s15 + $0x2b0] sm:$0xff] %v2796_v36  ;;  %v3738_v36 = vld [vmem:[%s4202_s9 + $0x3c0] sm:$0xff] }
 0x515   : > { %3053 = vst [vmem:[%s5366_s15 + $0x2b8] sm:$0xff] %v2797_v56  ;;  %v3739_v56 = vld [vmem:[%s4202_s9 + $0x3c8] sm:$0xff] }
 0x516   : > { %3068 = vst [vmem:[%s5366_s15 + $0x330] sm:$0xff] %v2812_v25  ;;  %v3740_v25 = vld [vmem:[%s4202_s9 + $0x3d0] sm:$0xff] }
 0x517   : > { %3069 = vst [vmem:[%s5366_s15 + $0x338] sm:$0xff] %v2813_v38  ;;  %2363 = vperm.xlu1 %3520, %v5345_v26   ;;  %v3741_v38 = vld [vmem:[%s4202_s9 + $0x3d8] sm:$0xff] }
 0x518   : > { %2339 = vperm.xlu2 %3516, %v5345_v26  }
 0x519   : > { %v2685_v29 = vpop.permute.xlu0 %2684  ;;  %v2255_v21 = vpop.permute.xlu1 %2254 }
 0x51a   : > { %v2956_v11 = vmul.f32 %v3724_v53, %v2685_v29  ;;  %v2957_v51 = vmul.f32 %v3725_v32, %v2685_v29  ;;  %v2814_v30 = vmul.f32 %v3726_v40, %v2255_v21  ;;  %v2815_v37 = vmul.f32 %v3727_v54, %v2255_v21  ;;  %v3742_v53 = vld [vmem:[%s4202_s9 + $0x3e0] sm:$0xff]  ;;  %v3743_v32 = vld [vmem:[%s4202_s9 + $0x3e8] sm:$0xff] }
 0x51c   : > { %3212 = vst [vmem:[%s5366_s15 + $0x7b0] sm:$0xff] %v2956_v11 }
 0x51d   : > { %3213 = vst [vmem:[%s5366_s15 + $0x7b8] sm:$0xff] %v2957_v51 }
 0x51e   : > { %3070 = vst [vmem:[%s5366_s15 + $0x340] sm:$0xff] %v2814_v30  ;;  %v3744_v30 = vld [vmem:[%s4202_s9 + $0x400] sm:$0xff] }
 0x51f   : > { %3071 = vst [vmem:[%s5366_s15 + $0x348] sm:$0xff] %v2815_v37  ;;  %3522 = vset.pattern.permute.xlu1 %v5267_v43  ;;  %v3745_v37 = vld [vmem:[%s4202_s9 + $0x408] sm:$0xff] }
 0x520   : > { %3519 = vset.pattern.permute.xlu2 %v5283_v35 }
 0x522   : > { %v2267_v9 = vpop.permute.xlu2 %2266 }
 0x523   : > { %v2818_v5 = vmul.f32 %v3728_v62, %v2267_v9  ;;  %v2819_v14 = vmul.f32 %v3729_v42, %v2267_v9 }
 0x525   : > { %3074 = vst [vmem:[%s5366_s15 + $0x360] sm:$0xff] %v2818_v5  ;;  %v3746_v5 = vld [vmem:[%s4202_s9 + $0x410] sm:$0xff] }
 0x526   : > { %3075 = vst [vmem:[%s5366_s15 + $0x368] sm:$0xff] %v2819_v14  ;;  %v3747_v14 = vld [vmem:[%s4202_s9 + $0x418] sm:$0xff] }
 0x527   : > { %2375 = vperm.xlu1 %3522, %v5345_v26  }
 0x528   : > { %2357 = vperm.xlu2 %3519, %v5345_v26  }
 0x529   : > { %v2273_v59 = vpop.permute.xlu1 %2272 }
 0x52a   : > { %v2820_v49 = vmul.f32 %v3730_v61, %v2273_v59  ;;  %v2821_v39 = vmul.f32 %v3731_v44, %v2273_v59 }
 0x52c   : > { %3076 = vst [vmem:[%s5366_s15 + $0x370] sm:$0xff] %v2820_v49  ;;  %v3748_v49 = vld [vmem:[%s4202_s9 + $0x420] sm:$0xff] }
 0x52d   : > { %3077 = vst [vmem:[%s5366_s15 + $0x378] sm:$0xff] %v2821_v39 }
 0x52f   : > { %3525 = vset.pattern.permute.xlu1 %v5339_v63 }
 0x530   : > { %3521 = vset.pattern.permute.xlu2 %v5300_v50 }
 0x532   : > { %v2279_v13 = vpop.permute.xlu2 %2278 }
 0x533   : > { %v2822_v45 = vmul.f32 %v3732_v46, %v2279_v13  ;;  %v2823_v1 = vmul.f32 %v3733_v22, %v2279_v13  ;;  %v3750_v46 = vld [vmem:[%s4202_s9 + $0x430] sm:$0xff]  ;;  %v3751_v22 = vld [vmem:[%s4202_s9 + $0x438] sm:$0xff] }
 0x535   : > { %3078 = vst [vmem:[%s5366_s15 + $0x380] sm:$0xff] %v2822_v45 }
 0x536   : > { %3079 = vst [vmem:[%s5366_s15 + $0x388] sm:$0xff] %v2823_v1 }
 0x537   : > { %2393 = vperm.xlu1 %3525, %v5345_v26  }
 0x538   : > { %2369 = vperm.xlu2 %3521, %v5345_v26  }
 0x539   : > { %v2285_v52 = vpop.permute.xlu1 %2284 }
 0x53a   : > { %v2824_v57 = vmul.f32 %v3734_v18, %v2285_v52  ;;  %v2825_v6 = vmul.f32 %v3735_v60, %v2285_v52  ;;  %v3752_v18 = vld [vmem:[%s4202_s9 + $0x450] sm:$0xff]  ;;  %v3753_v60 = vld [vmem:[%s4202_s9 + $0x458] sm:$0xff] }
 0x53c   : > { %3080 = vst [vmem:[%s5366_s15 + $0x390] sm:$0xff] %v2824_v57 }
 0x53d   : > { %3081 = vst [vmem:[%s5366_s15 + $0x398] sm:$0xff] %v2825_v6 }
 0x53f   : > { %3527 = vset.pattern.permute.xlu1 %v5427_v48 }
 0x540   : > { %3524 = vset.pattern.permute.xlu2 %v5312_v15 }
 0x542   : > { %v2297_v12 = vpop.permute.xlu2 %2296 }
 0x543   : > { %v2828_v41 = vmul.f32 %v3736_v0, %v2297_v12  ;;  %v2829_v24 = vmul.f32 %v3737_v31, %v2297_v12  ;;  %v3754_v0 = vld [vmem:[%s4202_s9 + $0x460] sm:$0xff]  ;;  %v3755_v31 = vld [vmem:[%s4202_s9 + $0x468] sm:$0xff] }
 0x545   : > { %3084 = vst [vmem:[%s5366_s15 + $0x3b0] sm:$0xff] %v2828_v41 }
 0x546   : > { %3085 = vst [vmem:[%s5366_s15 + $0x3b8] sm:$0xff] %v2829_v24 }
 0x547   : > { %2405 = vperm.xlu1 %3527, %v5345_v26  }
 0x548   : > { %2387 = vperm.xlu2 %3524, %v5345_v26  }
 0x549   : > { %v2303_v27 = vpop.permute.xlu1 %2302 }
 0x54a   : > { %v2830_v20 = vmul.f32 %v3738_v36, %v2303_v27  ;;  %v2831_v34 = vmul.f32 %v3739_v56, %v2303_v27  ;;  %v3756_v36 = vld [vmem:[%s4202_s9 + $0x470] sm:$0xff]  ;;  %v3757_v56 = vld [vmem:[%s4202_s9 + $0x478] sm:$0xff] }
 0x54c   : > { %3086 = vst [vmem:[%s5366_s15 + $0x3c0] sm:$0xff] %v2830_v20 }
 0x54d   : > { %3087 = vst [vmem:[%s5366_s15 + $0x3c8] sm:$0xff] %v2831_v34 }
 0x54f   : > { %3530 = vset.pattern.permute.xlu1 %v5263_v17 }
 0x550   : > { %3526 = vset.pattern.permute.xlu2 %v5327_v3 }
 0x552   : > { %v2309_v23 = vpop.permute.xlu2 %2308 }
 0x553   : > { %v2832_v10 = vmul.f32 %v3740_v25, %v2309_v23  ;;  %v2833_v29 = vmul.f32 %v3741_v38, %v2309_v23  ;;  %v3758_v25 = vld [vmem:[%s4202_s9 + $0x480] sm:$0xff]  ;;  %v3759_v38 = vld [vmem:[%s4202_s9 + $0x488] sm:$0xff] }
 0x555   : > { %3088 = vst [vmem:[%s5366_s15 + $0x3d0] sm:$0xff] %v2832_v10 }
 0x556   : > { %3089 = vst [vmem:[%s5366_s15 + $0x3d8] sm:$0xff] %v2833_v29 }
 0x557   : > { %2424 = vperm.xlu1 %3530, %v5397_v8  }
 0x558   : > { %2399 = vperm.xlu2 %3526, %v5345_v26  }
 0x559   : > { %v2315_v21 = vpop.permute.xlu1 %2314 }
 0x55a   : > { %v2834_v11 = vmul.f32 %v3742_v53, %v2315_v21  ;;  %v2835_v51 = vmul.f32 %v3743_v32, %v2315_v21  ;;  %v3760_v53 = vld [vmem:[%s4202_s9 + $0x4a0] sm:$0xff]  ;;  %v3761_v32 = vld [vmem:[%s4202_s9 + $0x4a8] sm:$0xff] }
 0x55c   : > { %3090 = vst [vmem:[%s5366_s15 + $0x3e0] sm:$0xff] %v2834_v11 }
 0x55d   : > { %3091 = vst [vmem:[%s5366_s15 + $0x3e8] sm:$0xff] %v2835_v51 }
 0x55f   : > { %3532 = vset.pattern.permute.xlu1 %v5270_v16 }
 0x560   : > { %3529 = vset.pattern.permute.xlu2 %v5324_v47 }
 0x562   : > { %v2328_v40 = vpop.permute.xlu2 %2327 }
 0x563   : > { %v2838_v54 = vmul.f32 %v3744_v30, %v2328_v40  ;;  %v2839_v9 = vmul.f32 %v3745_v37, %v2328_v40  ;;  %v3762_v30 = vld [vmem:[%s4202_s9 + $0x4b0] sm:$0xff]  ;;  %v3763_v37 = vld [vmem:[%s4202_s9 + $0x4b8] sm:$0xff] }
 0x565   : > { %3094 = vst [vmem:[%s5366_s15 + $0x400] sm:$0xff] %v2838_v54 }
 0x566   : > { %3095 = vst [vmem:[%s5366_s15 + $0x408] sm:$0xff] %v2839_v9 }
 0x567   : > { %2436 = vperm.xlu1 %3532, %v5397_v8  }
 0x568   : > { %2417 = vperm.xlu2 %3529, %v5345_v26   ;;  %v3749_v26 = vld [vmem:[%s4202_s9 + $0x428] sm:$0xff] }
 0x569   : > { %v2334_v62 = vpop.permute.xlu1 %2333 }
 0x56a   : > { %v2840_v42 = vmul.f32 %v3746_v5, %v2334_v62  ;;  %v2841_v59 = vmul.f32 %v3747_v14, %v2334_v62  ;;  %v3764_v5 = vld [vmem:[%s4202_s9 + $0x4c0] sm:$0xff]  ;;  %v3765_v14 = vld [vmem:[%s4202_s9 + $0x4c8] sm:$0xff] }
 0x56c   : > { %3096 = vst [vmem:[%s5366_s15 + $0x410] sm:$0xff] %v2840_v42 }
 0x56d   : > { %3097 = vst [vmem:[%s5366_s15 + $0x418] sm:$0xff] %v2841_v59 }
 0x56f   : > { %3535 = vset.pattern.permute.xlu1 %v5283_v35 }
 0x570   : > { %3531 = vset.pattern.permute.xlu2 %v5351_v33 }
 0x572   : > { %v2340_v61 = vpop.permute.xlu2 %2339 }
 0x573   : > { %v2842_v44 = vmul.f32 %v3748_v49, %v2340_v61  ;;  %v2843_v39 = vmul.f32 %v3749_v26, %v2340_v61  ;;  %v3766_v49 = vld [vmem:[%s4202_s9 + $0x4d0] sm:$0xff]  ;;  %v3767_v26 = vld [vmem:[%s4202_s9 + $0x4d8] sm:$0xff] }
 0x575   : > { %3098 = vst [vmem:[%s5366_s15 + $0x420] sm:$0xff] %v2842_v44 }
 0x576   : > { %3099 = vst [vmem:[%s5366_s15 + $0x428] sm:$0xff] %v2843_v39 }
 0x577   : > { %2454 = vperm.xlu1 %3535, %v5397_v8  }
 0x578   : > { %2430 = vperm.xlu2 %3531, %v5397_v8  }
 0x579   : > { %v2346_v13 = vpop.permute.xlu1 %2345 }
 0x57a   : > { %v2844_v45 = vmul.f32 %v3750_v46, %v2346_v13  ;;  %v2845_v1 = vmul.f32 %v3751_v22, %v2346_v13  ;;  %v3768_v46 = vld [vmem:[%s4202_s9 + $0x4f0] sm:$0xff]  ;;  %v3769_v22 = vld [vmem:[%s4202_s9 + $0x4f8] sm:$0xff] }
 0x57c   : > { %3100 = vst [vmem:[%s5366_s15 + $0x430] sm:$0xff] %v2844_v45 }
 0x57d   : > { %3101 = vst [vmem:[%s5366_s15 + $0x438] sm:$0xff] %v2845_v1 }
 0x57f   : > { %3537 = vset.pattern.permute.xlu1 %v5300_v50 }
 0x580   : > { %3534 = vset.pattern.permute.xlu2 %v5303_v7 }
 0x582   : > { %v2358_v52 = vpop.permute.xlu2 %2357 }
 0x583   : > { %v2848_v57 = vmul.f32 %v3752_v18, %v2358_v52  ;;  %v2849_v6 = vmul.f32 %v3753_v60, %v2358_v52  ;;  %v3770_v52 = vld [vmem:[%s4202_s9 + $0x500] sm:$0xff] }
 0x585   : > { %3104 = vst [vmem:[%s5366_s15 + $0x450] sm:$0xff] %v2848_v57  ;;  %v3771_v57 = vld [vmem:[%s4202_s9 + $0x508] sm:$0xff] }
 0x586   : > { %3105 = vst [vmem:[%s5366_s15 + $0x458] sm:$0xff] %v2849_v6 }
 0x587   : > { %2466 = vperm.xlu1 %3537, %v5397_v8  }
 0x588   : > { %2448 = vperm.xlu2 %3534, %v5397_v8  }
 0x589   : > { %v2364_v12 = vpop.permute.xlu1 %2363 }
 0x58a   : > { %v2850_v41 = vmul.f32 %v3754_v0, %v2364_v12  ;;  %v2851_v24 = vmul.f32 %v3755_v31, %v2364_v12  ;;  %v3772_v12 = vld [vmem:[%s4202_s9 + $0x510] sm:$0xff] }
 0x58c   : > { %3106 = vst [vmem:[%s5366_s15 + $0x460] sm:$0xff] %v2850_v41 }
 0x58d   : > { %3107 = vst [vmem:[%s5366_s15 + $0x468] sm:$0xff] %v2851_v24  ;;  %v3774_v24 = vld [vmem:[%s4202_s9 + $0x520] sm:$0xff] }
 0x58f   : > { %3541 = vset.pattern.permute.xlu1 %v5312_v15 }
 0x590   : > { %3536 = vset.pattern.permute.xlu2 %v5315_v2 }
 0x592   : > { %v2370_v27 = vpop.permute.xlu2 %2369 }
 0x593   : > { %v2852_v20 = vmul.f32 %v3756_v36, %v2370_v27  ;;  %v2853_v34 = vmul.f32 %v3757_v56, %v2370_v27  ;;  %v3775_v36 = vld [vmem:[%s4202_s9 + $0x528] sm:$0xff] }
 0x595   : > { %3108 = vst [vmem:[%s5366_s15 + $0x470] sm:$0xff] %v2852_v20 }
 0x596   : > { %3109 = vst [vmem:[%s5366_s15 + $0x478] sm:$0xff] %v2853_v34  ;;  %v3776_v34 = vld [vmem:[%s4202_s9 + $0x540] sm:$0xff] }
 0x597   : > { %2484 = vperm.xlu1 %3541, %v5397_v8  }
 0x598   : > { %2460 = vperm.xlu2 %3536, %v5397_v8  }
 0x599   : > { %v2376_v23 = vpop.permute.xlu1 %2375 }
 0x59a   : > { %v2854_v10 = vmul.f32 %v3758_v25, %v2376_v23  ;;  %v2855_v29 = vmul.f32 %v3759_v38, %v2376_v23  ;;  %v3777_v25 = vld [vmem:[%s4202_s9 + $0x548] sm:$0xff]  ;;  %v3778_v38 = vld [vmem:[%s4202_s9 + $0x550] sm:$0xff] }
 0x59c   : > { %3110 = vst [vmem:[%s5366_s15 + $0x480] sm:$0xff] %v2854_v10 }
 0x59d   : > { %3111 = vst [vmem:[%s5366_s15 + $0x488] sm:$0xff] %v2855_v29 }
 0x59f   : > { %3543 = vset.pattern.permute.xlu1 %v5327_v3 }
 0x5a0   : > { %3540 = vset.pattern.permute.xlu2 %v5330_v19 }
 0x5a2   : > { %v2388_v21 = vpop.permute.xlu2 %2387 }
 0x5a3   : > { %v2858_v11 = vmul.f32 %v3760_v53, %v2388_v21  ;;  %v2859_v51 = vmul.f32 %v3761_v32, %v2388_v21  ;;  %v3779_v21 = vld [vmem:[%s4202_s9 + $0x558] sm:$0xff]  ;;  %v3780_v32 = vld [vmem:[%s4202_s9 + $0x560] sm:$0xff] }
 0x5a5   : > { %3114 = vst [vmem:[%s5366_s15 + $0x4a0] sm:$0xff] %v2858_v11 }
 0x5a6   : > { %3115 = vst [vmem:[%s5366_s15 + $0x4a8] sm:$0xff] %v2859_v51 }
 0x5a7   : > { %2496 = vperm.xlu1 %3543, %v5397_v8  }
 0x5a8   : > { %2478 = vperm.xlu2 %3540, %v5397_v8  }
 0x5a9   : > { %v2394_v40 = vpop.permute.xlu1 %2393 }
 0x5aa   : > { %v2860_v54 = vmul.f32 %v3762_v30, %v2394_v40  ;;  %v2861_v9 = vmul.f32 %v3763_v37, %v2394_v40  ;;  %v3781_v40 = vld [vmem:[%s4202_s9 + $0x568] sm:$0xff]  ;;  %v3782_v37 = vld [vmem:[%s4202_s9 + $0x570] sm:$0xff] }
 0x5ac   : > { %3116 = vst [vmem:[%s5366_s15 + $0x4b0] sm:$0xff] %v2860_v54 }
 0x5ad   : > { %3117 = vst [vmem:[%s5366_s15 + $0x4b8] sm:$0xff] %v2861_v9 }
 0x5af   : > { %3546 = vset.pattern.permute.xlu1 %v5324_v47 }
 0x5b0   : > { %3542 = vset.pattern.permute.xlu2 %v5339_v63 }
 0x5b2   : > { %v2400_v62 = vpop.permute.xlu2 %2399 }
 0x5b3   : > { %v2862_v42 = vmul.f32 %v3764_v5, %v2400_v62  ;;  %v2863_v59 = vmul.f32 %v3765_v14, %v2400_v62  ;;  %v3783_v62 = vld [vmem:[%s4202_s9 + $0x578] sm:$0xff]  ;;  %v3784_v14 = vld [vmem:[%s4202_s9 + $0x590] sm:$0xff] }
 0x5b5   : > { %3118 = vst [vmem:[%s5366_s15 + $0x4c0] sm:$0xff] %v2862_v42 }
 0x5b6   : > { %3119 = vst [vmem:[%s5366_s15 + $0x4c8] sm:$0xff] %v2863_v59 }
 0x5b7   : > { %2514 = vperm.xlu1 %3546, %v5397_v8  }
 0x5b8   : > { %2490 = vperm.xlu2 %3542, %v5397_v8  }
 0x5b9   : > { %v2406_v61 = vpop.permute.xlu1 %2405 }
 0x5ba   : > { %v2864_v44 = vmul.f32 %v3766_v49, %v2406_v61  ;;  %v2865_v39 = vmul.f32 %v3767_v26, %v2406_v61  ;;  %v3785_v61 = vld [vmem:[%s4202_s9 + $0x598] sm:$0xff] }
 0x5bc   : > { %3120 = vst [vmem:[%s5366_s15 + $0x4d0] sm:$0xff] %v2864_v44  ;;  %v3786_v44 = vld [vmem:[%s4202_s9 + $0x5a0] sm:$0xff] }
 0x5bd   : > { %3121 = vst [vmem:[%s5366_s15 + $0x4d8] sm:$0xff] %v2865_v39  ;;  %v3787_v39 = vld [vmem:[%s4202_s9 + $0x5a8] sm:$0xff] }
 0x5bf   : > { %3548 = vset.pattern.permute.xlu1 %v5351_v33 }
 0x5c0   : > { %3545 = vset.pattern.permute.xlu2 %v5354_v55 }
 0x5c2   : > { %v2418_v13 = vpop.permute.xlu2 %2417 }
 0x5c3   : > { %v2868_v45 = vmul.f32 %v3768_v46, %v2418_v13  ;;  %v2869_v1 = vmul.f32 %v3769_v22, %v2418_v13 }
 0x5c5   : > { %3124 = vst [vmem:[%s5366_s15 + $0x4f0] sm:$0xff] %v2868_v45  ;;  %v3788_v45 = vld [vmem:[%s4202_s9 + $0x5b0] sm:$0xff] }
 0x5c6   : > { %3125 = vst [vmem:[%s5366_s15 + $0x4f8] sm:$0xff] %v2869_v1  ;;  %v3789_v1 = vld [vmem:[%s4202_s9 + $0x5b8] sm:$0xff] }
 0x5c7   : > { %2527 = vperm.xlu1 %3548, %v5478_v58  }
 0x5c8   : > { %2508 = vperm.xlu2 %3545, %v5397_v8   ;;  %v3773_v8 = vld [vmem:[%s4202_s9 + $0x518] sm:$0xff] }
 0x5c9   : > { %v2425_v33 = vpop.permute.xlu1 %2424 }
 0x5ca   : > { %v2870_v18 = vmul.f32 %v3770_v52, %v2425_v33  ;;  %v2871_v60 = vmul.f32 %v3771_v57, %v2425_v33 }
 0x5cc   : > { %3126 = vst [vmem:[%s5366_s15 + $0x500] sm:$0xff] %v2870_v18  ;;  %v3790_v18 = vld [vmem:[%s4202_s9 + $0x5c0] sm:$0xff] }
 0x5cd   : > { %3127 = vst [vmem:[%s5366_s15 + $0x508] sm:$0xff] %v2871_v60  ;;  %v3791_v60 = vld [vmem:[%s4202_s9 + $0x5c8] sm:$0xff] }
 0x5cf   : > { %3551 = vset.pattern.permute.xlu1 %v5303_v7 }
 0x5d0   : > { %3547 = vset.pattern.permute.xlu2 %v5263_v17 }
 0x5d2   : > { %v2431_v6 = vpop.permute.xlu2 %2430 }
 0x5d3   : > { %v2872_v0 = vmul.f32 %v3772_v12, %v2431_v6  ;;  %v2873_v41 = vmul.f32 %v3773_v8, %v2431_v6 }
 0x5d5   : > { %3128 = vst [vmem:[%s5366_s15 + $0x510] sm:$0xff] %v2872_v0  ;;  %v3792_v0 = vld [vmem:[%s4202_s9 + $0x5e0] sm:$0xff] }
 0x5d6   : > { %3129 = vst [vmem:[%s5366_s15 + $0x518] sm:$0xff] %v2873_v41  ;;  %v3793_v41 = vld [vmem:[%s4202_s9 + $0x5e8] sm:$0xff] }
 0x5d7   : > { %2545 = vperm.xlu1 %3551, %v5478_v58  }
 0x5d8   : > { %2521 = vperm.xlu2 %3547, %v5478_v58  }
 0x5d9   : > { %v2437_v31 = vpop.permute.xlu1 %2436 }
 0x5da   : > { %v2874_v27 = vmul.f32 %v3774_v24, %v2437_v31  ;;  %v2875_v20 = vmul.f32 %v3775_v36, %v2437_v31  ;;  %v3794_v24 = vld [vmem:[%s4202_s9 + $0x5f0] sm:$0xff]  ;;  %v3795_v36 = vld [vmem:[%s4202_s9 + $0x5f8] sm:$0xff] }
 0x5dc   : > { %3130 = vst [vmem:[%s5366_s15 + $0x520] sm:$0xff] %v2874_v27 }
 0x5dd   : > { %3131 = vst [vmem:[%s5366_s15 + $0x528] sm:$0xff] %v2875_v20 }
 0x5df   : > { %3553 = vset.pattern.permute.xlu1 %v5315_v2 }
 0x5e0   : > { %3550 = vset.pattern.permute.xlu2 %v5286_v28 }
 0x5e2   : > { %v2449_v56 = vpop.permute.xlu2 %2448 }
 0x5e3   : > { %v2878_v23 = vmul.f32 %v3776_v34, %v2449_v56  ;;  %v2879_v10 = vmul.f32 %v3777_v25, %v2449_v56  ;;  %v3796_v34 = vld [vmem:[%s4202_s9 + $0x600] sm:$0xff]  ;;  %v3797_v25 = vld [vmem:[%s4202_s9 + $0x608] sm:$0xff] }
 0x5e5   : > { %3134 = vst [vmem:[%s5366_s15 + $0x540] sm:$0xff] %v2878_v23 }
 0x5e6   : > { %3135 = vst [vmem:[%s5366_s15 + $0x548] sm:$0xff] %v2879_v10 }
 0x5e7   : > { %2557 = vperm.xlu1 %3553, %v5478_v58  }
 0x5e8   : > { %2539 = vperm.xlu2 %3550, %v5478_v58  }
 0x5e9   : > { %v2455_v2 = vpop.permute.xlu1 %2454 }
 0x5ea   : > { %v2880_v29 = vmul.f32 %v3778_v38, %v2455_v2  ;;  %v2881_v53 = vmul.f32 %v3779_v21, %v2455_v2  ;;  %v3798_v2 = vld [vmem:[%s4202_s9 + $0x610] sm:$0xff] }
 0x5ec   : > { %3136 = vst [vmem:[%s5366_s15 + $0x550] sm:$0xff] %v2880_v29  ;;  %v3799_v29 = vld [vmem:[%s4202_s9 + $0x618] sm:$0xff] }
 0x5ed   : > { %3137 = vst [vmem:[%s5366_s15 + $0x558] sm:$0xff] %v2881_v53 }
 0x5ef   : > { %3556 = vset.pattern.permute.xlu1 %v5330_v19 }
 0x5f0   : > { %3552 = vset.pattern.permute.xlu2 %v5283_v35 }
 0x5f2   : > { %v2461_v11 = vpop.permute.xlu2 %2460 }
 0x5f3   : > { %v2882_v51 = vmul.f32 %v3780_v32, %v2461_v11  ;;  %v2883_v30 = vmul.f32 %v3781_v40, %v2461_v11  ;;  %v3800_v11 = vld [vmem:[%s4202_s9 + $0x630] sm:$0xff]  ;;  %v3802_v40 = vld [vmem:[%s4202_s9 + $0x640] sm:$0xff] }
 0x5f5   : > { %3138 = vst [vmem:[%s5366_s15 + $0x560] sm:$0xff] %v2882_v51 }
 0x5f6   : > { %3139 = vst [vmem:[%s5366_s15 + $0x568] sm:$0xff] %v2883_v30 }
 0x5f7   : > { %2575 = vperm.xlu1 %3556, %v5478_v58  }
 0x5f8   : > { %2551 = vperm.xlu2 %3552, %v5478_v58  }
 0x5f9   : > { %v2467_v54 = vpop.permute.xlu1 %2466 }
 0x5fa   : > { %v2884_v9 = vmul.f32 %v3782_v37, %v2467_v54  ;;  %v2885_v5 = vmul.f32 %v3783_v62, %v2467_v54 }
 0x5fc   : > { %3140 = vst [vmem:[%s5366_s15 + $0x570] sm:$0xff] %v2884_v9  ;;  %v3804_v9 = vld [vmem:[%s4202_s9 + $0x650] sm:$0xff] }
 0x5fd   : > { %3141 = vst [vmem:[%s5366_s15 + $0x578] sm:$0xff] %v2885_v5  ;;  %v3805_v5 = vld [vmem:[%s4202_s9 + $0x658] sm:$0xff] }
 0x5ff   : > { %3558 = vset.pattern.permute.xlu1 %v5339_v63 }
 0x600   : > { %3555 = vset.pattern.permute.xlu2 %v5267_v43 }
 0x602   : > { %v2479_v42 = vpop.permute.xlu2 %2478 }
 0x603   : > { %v2888_v59 = vmul.f32 %v3784_v14, %v2479_v42  ;;  %v2889_v49 = vmul.f32 %v3785_v61, %v2479_v42  ;;  %v3806_v14 = vld [vmem:[%s4202_s9 + $0x660] sm:$0xff] }
 0x605   : > { %3144 = vst [vmem:[%s5366_s15 + $0x590] sm:$0xff] %v2888_v59 }
 0x606   : > { %3145 = vst [vmem:[%s5366_s15 + $0x598] sm:$0xff] %v2889_v49 }
 0x607   : > { %2587 = vperm.xlu1 %3558, %v5478_v58  }
 0x608   : > { %2569 = vperm.xlu2 %3555, %v5478_v58  }
 0x609   : > { %v2485_v63 = vpop.permute.xlu1 %2484 }
 0x60a   : > { %v2890_v26 = vmul.f32 %v3786_v44, %v2485_v63  ;;  %v2891_v13 = vmul.f32 %v3787_v39, %v2485_v63  ;;  %v3808_v63 = vld [vmem:[%s4202_s9 + $0x680] sm:$0xff] }
 0x60c   : > { %3146 = vst [vmem:[%s5366_s15 + $0x5a0] sm:$0xff] %v2890_v26  ;;  %v3809_v26 = vld [vmem:[%s4202_s9 + $0x688] sm:$0xff] }
 0x60d   : > { %3147 = vst [vmem:[%s5366_s15 + $0x5a8] sm:$0xff] %v2891_v13  ;;  %v3810_v13 = vld [vmem:[%s4202_s9 + $0x690] sm:$0xff] }
 0x60f   : > { %3561 = vset.pattern.permute.xlu1 %v5354_v55 }
 0x610   : > { %3557 = vset.pattern.permute.xlu2 %v5312_v15 }
 0x612   : > { %v2491_v46 = vpop.permute.xlu2 %2490 }
 0x613   : > { %v2892_v22 = vmul.f32 %v3788_v45, %v2491_v46  ;;  %v2893_v33 = vmul.f32 %v3789_v1, %v2491_v46  ;;  %v3812_v1 = vld [vmem:[%s4202_s9 + $0x6a0] sm:$0xff] }
 0x615   : > { %3148 = vst [vmem:[%s5366_s15 + $0x5b0] sm:$0xff] %v2892_v22 }
 0x616   : > { %3149 = vst [vmem:[%s5366_s15 + $0x5b8] sm:$0xff] %v2893_v33 }
 0x617   : > { %2605 = vperm.xlu1 %3561, %v5478_v58  }
 0x618   : > { %2581 = vperm.xlu2 %3557, %v5478_v58  }
 0x619   : > { %v2497_v52 = vpop.permute.xlu1 %2496 }
 0x61a   : > { %v2894_v57 = vmul.f32 %v3790_v18, %v2497_v52  ;;  %v2895_v6 = vmul.f32 %v3791_v60, %v2497_v52  ;;  %v3813_v52 = vld [vmem:[%s4202_s9 + $0x6a8] sm:$0xff] }
 0x61c   : > { %3150 = vst [vmem:[%s5366_s15 + $0x5c0] sm:$0xff] %v2894_v57  ;;  %v3814_v57 = vld [vmem:[%s4202_s9 + $0x6b0] sm:$0xff] }
 0x61d   : > { %3151 = vst [vmem:[%s5366_s15 + $0x5c8] sm:$0xff] %v2895_v6 }
 0x61f   : > { %3563 = vset.pattern.permute.xlu1 %v5263_v17 }
 0x620   : > { %3560 = vset.pattern.permute.xlu2 %v5427_v48 }
 0x622   : > { %v2509_v12 = vpop.permute.xlu2 %2508 }
 0x623   : > { %v2898_v8 = vmul.f32 %v3792_v0, %v2509_v12  ;;  %v2899_v31 = vmul.f32 %v3793_v41, %v2509_v12  ;;  %v3816_v0 = vld [vmem:[%s4202_s9 + $0x6d0] sm:$0xff]  ;;  %v3817_v41 = vld [vmem:[%s4202_s9 + $0x6d8] sm:$0xff] }
 0x625   : > { %3154 = vst [vmem:[%s5366_s15 + $0x5e0] sm:$0xff] %v2898_v8 }
 0x626   : > { %3155 = vst [vmem:[%s5366_s15 + $0x5e8] sm:$0xff] %v2899_v31 }
 0x627   : > { %2618 = vperm.xlu1 %3563, %v5571_v4  }
 0x628   : > { %2599 = vperm.xlu2 %3560, %v5478_v58  }
 0x629   : > { %v2515_v17 = vpop.permute.xlu1 %2514 }
 0x62a   : > { %v2900_v27 = vmul.f32 %v3794_v24, %v2515_v17  ;;  %v2901_v20 = vmul.f32 %v3795_v36, %v2515_v17  ;;  %v3818_v17 = vld [vmem:[%s4202_s9 + $0x6e0] sm:$0xff]  ;;  %v3819_v24 = vld [vmem:[%s4202_s9 + $0x6e8] sm:$0xff] }
 0x62c   : > { %3156 = vst [vmem:[%s5366_s15 + $0x5f0] sm:$0xff] %v2900_v27 }
 0x62d   : > { %3157 = vst [vmem:[%s5366_s15 + $0x5f8] sm:$0xff] %v2901_v20  ;;  %v3820_v20 = vld [vmem:[%s4202_s9 + $0x6f0] sm:$0xff] }
 0x62f   : > { %3566 = vset.pattern.permute.xlu1 %v5286_v28 }
 0x630   : > { %3562 = vset.pattern.permute.xlu2 %v5324_v47 }
 0x632   : > { %v2522_v56 = vpop.permute.xlu2 %2521 }
 0x633   : > { %v2902_v23 = vmul.f32 %v3796_v34, %v2522_v56  ;;  %v2903_v10 = vmul.f32 %v3797_v25, %v2522_v56  ;;  %v3821_v34 = vld [vmem:[%s4202_s9 + $0x6f8] sm:$0xff] }
 0x635   : > { %3158 = vst [vmem:[%s5366_s15 + $0x600] sm:$0xff] %v2902_v23 }
 0x636   : > { %3159 = vst [vmem:[%s5366_s15 + $0x608] sm:$0xff] %v2903_v10  ;;  %v3822_v10 = vld [vmem:[%s4202_s9 + $0x700] sm:$0xff] }
 0x637   : > { %2636 = vperm.xlu1 %3566, %v5571_v4  }
 0x638   : > { %2611 = vperm.xlu2 %3562, %v5478_v58   ;;  %v3801_v58 = vld [vmem:[%s4202_s9 + $0x638] sm:$0xff] }
 0x639   : > { %v2528_v28 = vpop.permute.xlu1 %2527 }
 0x63a   : > { %v2904_v38 = vmul.f32 %v3798_v2, %v2528_v28  ;;  %v2905_v21 = vmul.f32 %v3799_v29, %v2528_v28  ;;  %v3823_v2 = vld [vmem:[%s4202_s9 + $0x708] sm:$0xff]  ;;  %v3824_v29 = vld [vmem:[%s4202_s9 + $0x720] sm:$0xff] }
 0x63c   : > { %3160 = vst [vmem:[%s5366_s15 + $0x610] sm:$0xff] %v2904_v38 }
 0x63d   : > { %3161 = vst [vmem:[%s5366_s15 + $0x618] sm:$0xff] %v2905_v21 }
 0x63f   : > { %3568 = vset.pattern.permute.xlu1 %v5283_v35 }
 0x640   : > { %3565 = vset.pattern.permute.xlu2 %v5270_v16  ;;  %v3803_v16 = vld [vmem:[%s4202_s9 + $0x648] sm:$0xff] }
 0x642   : > { %v2540_v53 = vpop.permute.xlu2 %2539 }
 0x643   : > { %v2908_v32 = vmul.f32 %v3800_v11, %v2540_v53  ;;  %v2909_v51 = vmul.f32 %v3801_v58, %v2540_v53  ;;  %v3825_v53 = vld [vmem:[%s4202_s9 + $0x728] sm:$0xff] }
 0x645   : > { %3164 = vst [vmem:[%s5366_s15 + $0x630] sm:$0xff] %v2908_v32  ;;  %v3826_v32 = vld [vmem:[%s4202_s9 + $0x730] sm:$0xff] }
 0x646   : > { %3165 = vst [vmem:[%s5366_s15 + $0x638] sm:$0xff] %v2909_v51  ;;  %v3827_v51 = vld [vmem:[%s4202_s9 + $0x738] sm:$0xff] }
 0x647   : > { %2648 = vperm.xlu1 %3568, %v5571_v4  }
 0x648   : > { %2630 = vperm.xlu2 %3565, %v5571_v4  }
 0x649   : > { %v2546_v35 = vpop.permute.xlu1 %2545 }
 0x64a   : > { %v2910_v30 = vmul.f32 %v3802_v40, %v2546_v35  ;;  %v2911_v54 = vmul.f32 %v3803_v16, %v2546_v35 }
 0x64c   : > { %3166 = vst [vmem:[%s5366_s15 + $0x640] sm:$0xff] %v2910_v30  ;;  %v3828_v30 = vld [vmem:[%s4202_s9 + $0x740] sm:$0xff] }
 0x64d   : > { %3167 = vst [vmem:[%s5366_s15 + $0x648] sm:$0xff] %v2911_v54  ;;  %v3829_v54 = vld [vmem:[%s4202_s9 + $0x748] sm:$0xff] }
 0x64f   : > { %3571 = vset.pattern.permute.xlu1 %v5267_v43 }
 0x650   : > { %3567 = vset.pattern.permute.xlu2 %v5303_v7  ;;  %v3807_v7 = vld [vmem:[%s4202_s9 + $0x668] sm:$0xff] }
 0x652   : > { %v2552_v37 = vpop.permute.xlu2 %2551 }
 0x653   : > { %v2912_v62 = vmul.f32 %v3804_v9, %v2552_v37  ;;  %v2913_v42 = vmul.f32 %v3805_v5, %v2552_v37 }
 0x655   : > { %3168 = vst [vmem:[%s5366_s15 + $0x650] sm:$0xff] %v2912_v62  ;;  %v3830_v62 = vld [vmem:[%s4202_s9 + $0x750] sm:$0xff] }
 0x656   : > { %3169 = vst [vmem:[%s5366_s15 + $0x658] sm:$0xff] %v2913_v42  ;;  %v3831_v42 = vld [vmem:[%s4202_s9 + $0x758] sm:$0xff] }
 0x657   : > { %2666 = vperm.xlu1 %3571, %v5571_v4  }
 0x658   : > { %2642 = vperm.xlu2 %3567, %v5571_v4  }
 0x659   : > { %v2558_v43 = vpop.permute.xlu1 %2557 }
 0x65a   : > { %v2914_v59 = vmul.f32 %v3806_v14, %v2558_v43  ;;  %v2915_v61 = vmul.f32 %v3807_v7, %v2558_v43 }
 0x65c   : > { %3170 = vst [vmem:[%s5366_s15 + $0x660] sm:$0xff] %v2914_v59  ;;  %v3832_v59 = vld [vmem:[%s4202_s9 + $0x770] sm:$0xff] }
 0x65d   : > { %3171 = vst [vmem:[%s5366_s15 + $0x668] sm:$0xff] %v2915_v61  ;;  %v3833_v61 = vld [vmem:[%s4202_s9 + $0x778] sm:$0xff] }
 0x65f   : > { %3573 = vset.pattern.permute.xlu1 %v5312_v15 }
 0x660   : > { %3570 = vset.pattern.permute.xlu2 %v5300_v50  ;;  %v3811_v50 = vld [vmem:[%s4202_s9 + $0x698] sm:$0xff] }
 0x662   : > { %v2570_v49 = vpop.permute.xlu2 %2569 }
 0x663   : > { %v2918_v44 = vmul.f32 %v3808_v63, %v2570_v49  ;;  %v2919_v39 = vmul.f32 %v3809_v26, %v2570_v49 }
 0x665   : > { %3174 = vst [vmem:[%s5366_s15 + $0x680] sm:$0xff] %v2918_v44  ;;  %v3834_v44 = vld [vmem:[%s4202_s9 + $0x780] sm:$0xff] }
 0x666   : > { %3175 = vst [vmem:[%s5366_s15 + $0x688] sm:$0xff] %v2919_v39  ;;  %v3835_v39 = vld [vmem:[%s4202_s9 + $0x788] sm:$0xff] }
 0x667   : > { %2678 = vperm.xlu1 %3573, %v5571_v4  }
 0x668   : > { %2660 = vperm.xlu2 %3570, %v5571_v4  }
 0x669   : > { %v2576_v15 = vpop.permute.xlu1 %2575 }
 0x66a   : > { %v2920_v46 = vmul.f32 %v3810_v13, %v2576_v15  ;;  %v2921_v45 = vmul.f32 %v3811_v50, %v2576_v15 }
 0x66c   : > { %3176 = vst [vmem:[%s5366_s15 + $0x690] sm:$0xff] %v2920_v46  ;;  %v3836_v46 = vld [vmem:[%s4202_s9 + $0x790] sm:$0xff] }
 0x66d   : > { %3177 = vst [vmem:[%s5366_s15 + $0x698] sm:$0xff] %v2921_v45  ;;  %v3837_v45 = vld [vmem:[%s4202_s9 + $0x798] sm:$0xff] }
 0x66f   : > { %3575 = vset.pattern.permute.xlu1 %v5427_v48 }
 0x670   : > { %3572 = vset.pattern.permute.xlu2 %v5330_v19  ;;  %v3815_v19 = vld [vmem:[%s4202_s9 + $0x6b8] sm:$0xff] }
 0x672   : > { %v2582_v22 = vpop.permute.xlu2 %2581 }
 0x673   : > { %v2922_v33 = vmul.f32 %v3812_v1, %v2582_v22  ;;  %v2923_v18 = vmul.f32 %v3813_v52, %v2582_v22 }
 0x675   : > { %3178 = vst [vmem:[%s5366_s15 + $0x6a0] sm:$0xff] %v2922_v33  ;;  %v3838_v33 = vld [vmem:[%s4202_s9 + $0x7a0] sm:$0xff] }
 0x676   : > { %3179 = vst [vmem:[%s5366_s15 + $0x6a8] sm:$0xff] %v2923_v18  ;;  %v3839_v18 = vld [vmem:[%s4202_s9 + $0x7a8] sm:$0xff] }
 0x677   : > { %2696 = vperm.xlu1 %3575, %v5571_v4  }
 0x678   : > { %2672 = vperm.xlu2 %3572, %v5571_v4  }
 0x679   : > { %v2588_v48 = vpop.permute.xlu1 %2587 }
 0x67a   : > { %v2924_v60 = vmul.f32 %v3814_v57, %v2588_v48  ;;  %v2925_v6 = vmul.f32 %v3815_v19, %v2588_v48 }
 0x67c   : > { %3180 = vst [vmem:[%s5366_s15 + $0x6b0] sm:$0xff] %v2924_v60  ;;  %v3840_v60 = vld [vmem:[%s4202_s9 + $0x7c0] sm:$0xff] }
 0x67d   : > { %3181 = vst [vmem:[%s5366_s15 + $0x6b8] sm:$0xff] %v2925_v6  ;;  %v3841_v6 = vld [vmem:[%s4202_s9 + $0x7c8] sm:$0xff] }
 0x67f   : > { %3577 = vset.pattern.permute.xlu1 %v5324_v47 }
 0x680   : > { %3574 = vset.pattern.permute.xlu2 %v5327_v3 }
 0x682   : > { %v2600_v12 = vpop.permute.xlu2 %2599 }
 0x683   : > { %v2928_v8 = vmul.f32 %v3816_v0, %v2600_v12  ;;  %v2929_v31 = vmul.f32 %v3817_v41, %v2600_v12 }
 0x685   : > { %3184 = vst [vmem:[%s5366_s15 + $0x6d0] sm:$0xff] %v2928_v8  ;;  %v3842_v8 = vld [vmem:[%s4202_s9 + $0x7d0] sm:$0xff] }
 0x686   : > { %3185 = vst [vmem:[%s5366_s15 + $0x6d8] sm:$0xff] %v2929_v31  ;;  %v3843_v31 = vld [vmem:[%s4202_s9 + $0x7d8] sm:$0xff] }
 0x687   : > { %2708 = vperm.xlu1 %3577, %v5571_v4  }
 0x688   : > { %2690 = vperm.xlu2 %3574, %v5571_v4  }
 0x689   : > { %v2606_v47 = vpop.permute.xlu1 %2605 }
 0x68a   : > { %v2930_v3 = vmul.f32 %v3818_v17, %v2606_v47  ;;  %v2931_v27 = vmul.f32 %v3819_v24, %v2606_v47 }
 0x68c   : > { %3186 = vst [vmem:[%s5366_s15 + $0x6e0] sm:$0xff] %v2930_v3  ;;  %v3844_v3 = vld [vmem:[%s4202_s9 + $0x7e0] sm:$0xff] }
 0x68d   : > { %3187 = vst [vmem:[%s5366_s15 + $0x6e8] sm:$0xff] %v2931_v27  ;;  %v3845_v27 = vld [vmem:[%s4202_s9 + $0x7e8] sm:$0xff] }
 0x690   : > { %3576 = vset.pattern.permute.xlu2 %v5354_v55 }
 0x692   : > { %v2612_v36 = vpop.permute.xlu2 %2611 }
 0x693   : > { %v2932_v56 = vmul.f32 %v3820_v20, %v2612_v36  ;;  %v2933_v23 = vmul.f32 %v3821_v34, %v2612_v36 }
 0x695   : > { %3188 = vst [vmem:[%s5366_s15 + $0x6f0] sm:$0xff] %v2932_v56  ;;  %v3846_v56 = vld [vmem:[%s4202_s9 + $0x7f0] sm:$0xff] }
 0x696   : > { %3189 = vst [vmem:[%s5366_s15 + $0x6f8] sm:$0xff] %v2933_v23  ;;  %v3847_v23 = vld [vmem:[%s4202_s9 + $0x7f8] sm:$0xff] }
 0x698   : > { %2702 = vperm.xlu2 %3576, %v5571_v4  }
 0x699   : > { %v2619_v25 = vpop.permute.xlu1 %2618 }
 0x69a   : > { %v2934_v28 = vmul.f32 %v3822_v10, %v2619_v25  ;;  %v2935_v55 = vmul.f32 %v3823_v2, %v2619_v25 }
 0x69c   : > { %3190 = vst [vmem:[%s5366_s15 + $0x700] sm:$0xff] %v2934_v28 }
 0x69d   : > { %3191 = vst [vmem:[%s5366_s15 + $0x708] sm:$0xff] %v2935_v55 }
 0x6a2   : > { %v2631_v38 = vpop.permute.xlu2 %2630 }
 0x6a3   : > { %v2938_v21 = vmul.f32 %v3824_v29, %v2631_v38  ;;  %v2939_v11 = vmul.f32 %v3825_v53, %v2631_v38 }
 0x6a5   : > { %3194 = vst [vmem:[%s5366_s15 + $0x720] sm:$0xff] %v2938_v21 }
 0x6a6   : > { %3195 = vst [vmem:[%s5366_s15 + $0x728] sm:$0xff] %v2939_v11 }
 0x6a9   : > { %v2637_v4 = vpop.permute.xlu1 %2636 }
 0x6aa   : > { %v2940_v58 = vmul.f32 %v3826_v32, %v2637_v4  ;;  %v2941_v35 = vmul.f32 %v3827_v51, %v2637_v4 }
 0x6ac   : > { %3196 = vst [vmem:[%s5366_s15 + $0x730] sm:$0xff] %v2940_v58 }
 0x6ad   : > { %3197 = vst [vmem:[%s5366_s15 + $0x738] sm:$0xff] %v2941_v35 }
 0x6b2   : > { %v2643_v40 = vpop.permute.xlu2 %2642 }
 0x6b3   : > { %v2942_v16 = vmul.f32 %v3828_v30, %v2643_v40  ;;  %v2943_v37 = vmul.f32 %v3829_v54, %v2643_v40 }
 0x6b5   : > { %3198 = vst [vmem:[%s5366_s15 + $0x740] sm:$0xff] %v2942_v16 }
 0x6b6   : > { %3199 = vst [vmem:[%s5366_s15 + $0x748] sm:$0xff] %v2943_v37 }
 0x6b9   : > { %v2649_v9 = vpop.permute.xlu1 %2648 }
 0x6ba   : > { %v2944_v5 = vmul.f32 %v3830_v62, %v2649_v9  ;;  %v2945_v43 = vmul.f32 %v3831_v42, %v2649_v9 }
 0x6bc   : > { %3200 = vst [vmem:[%s5366_s15 + $0x750] sm:$0xff] %v2944_v5 }
 0x6bd   : > { %3201 = vst [vmem:[%s5366_s15 + $0x758] sm:$0xff] %v2945_v43 }
 0x6c2   : > { %v2661_v14 = vpop.permute.xlu2 %2660 }
 0x6c3   : > { %v2948_v7 = vmul.f32 %v3832_v59, %v2661_v14  ;;  %v2949_v49 = vmul.f32 %v3833_v61, %v2661_v14 }
 0x6c5   : > { %3204 = vst [vmem:[%s5366_s15 + $0x770] sm:$0xff] %v2948_v7 }
 0x6c6   : > { %3205 = vst [vmem:[%s5366_s15 + $0x778] sm:$0xff] %v2949_v49 }
 0x6c9   : > { %v2667_v63 = vpop.permute.xlu1 %2666 }
 0x6ca   : > { %v2950_v26 = vmul.f32 %v3834_v44, %v2667_v63  ;;  %v2951_v15 = vmul.f32 %v3835_v39, %v2667_v63 }
 0x6cc   : > { %3206 = vst [vmem:[%s5366_s15 + $0x780] sm:$0xff] %v2950_v26 }
 0x6cd   : > { %3207 = vst [vmem:[%s5366_s15 + $0x788] sm:$0xff] %v2951_v15 }
 0x6d2   : > { %v2673_v13 = vpop.permute.xlu2 %2672 }
 0x6d3   : > { %v2952_v50 = vmul.f32 %v3836_v46, %v2673_v13  ;;  %v2953_v22 = vmul.f32 %v3837_v45, %v2673_v13 }
 0x6d5   : > { %3208 = vst [vmem:[%s5366_s15 + $0x790] sm:$0xff] %v2952_v50 }
 0x6d6   : > { %3209 = vst [vmem:[%s5366_s15 + $0x798] sm:$0xff] %v2953_v22 }
 0x6d9   : > { %v2679_v1 = vpop.permute.xlu1 %2678 }
 0x6da   : > { %v2954_v52 = vmul.f32 %v3838_v33, %v2679_v1  ;;  %v2955_v48 = vmul.f32 %v3839_v18, %v2679_v1 }
 0x6dc   : > { %3210 = vst [vmem:[%s5366_s15 + $0x7a0] sm:$0xff] %v2954_v52 }
 0x6dd   : > { %3211 = vst [vmem:[%s5366_s15 + $0x7a8] sm:$0xff] %v2955_v48 }
 0x6e2   : > { %v2691_v57 = vpop.permute.xlu2 %2690 }
 0x6e3   : > { %v2958_v19 = vmul.f32 %v3840_v60, %v2691_v57  ;;  %v2959_v12 = vmul.f32 %v3841_v6, %v2691_v57 }
 0x6e5   : > { %3214 = vst [vmem:[%s5366_s15 + $0x7c0] sm:$0xff] %v2958_v19 }
 0x6e6   : > { %3215 = vst [vmem:[%s5366_s15 + $0x7c8] sm:$0xff] %v2959_v12 }
 0x6e9   : > { %v2697_v0 = vpop.permute.xlu1 %2696 }
 0x6ea   : > { %v2960_v41 = vmul.f32 %v3842_v8, %v2697_v0  ;;  %v2961_v47 = vmul.f32 %v3843_v31, %v2697_v0 }
 0x6ec   : > { %3216 = vst [vmem:[%s5366_s15 + $0x7d0] sm:$0xff] %v2960_v41 }
 0x6ed   : > { %3217 = vst [vmem:[%s5366_s15 + $0x7d8] sm:$0xff] %v2961_v47 }
 0x6f2   : > { %v2703_v17 = vpop.permute.xlu2 %2702 }
 0x6f3   : > { %v2962_v24 = vmul.f32 %v3844_v3, %v2703_v17  ;;  %v2963_v36 = vmul.f32 %v3845_v27, %v2703_v17 }
 0x6f5   : > { %3218 = vst [vmem:[%s5366_s15 + $0x7e0] sm:$0xff] %v2962_v24 }
 0x6f6   : > { %3219 = vst [vmem:[%s5366_s15 + $0x7e8] sm:$0xff] %v2963_v36 }
 0x6f9   : > { %v2709_v20 = vpop.permute.xlu1 %2708 }
 0x6fa   : > { %v2964_v34 = vmul.f32 %v3846_v56, %v2709_v20  ;;  %v2965_v25 = vmul.f32 %v3847_v23, %v2709_v20 }
 0x6fc   : > { %3220 = vst [vmem:[%s5366_s15 + $0x7f0] sm:$0xff] %v2964_v34 }
 0x6fd   : > { %3221 = vst [vmem:[%s5366_s15 + $0x7f8] sm:$0xff] %v2965_v25 }
 0x6fe   : > { %3995 = shalt.err (!%p3992_p11)
}
 0x6ff   : > { %s4049_s17 = smov 256   ;;  %s4050_s9 = smov 16  }
 0x700   : > { %3391 = dma.vmem_to_hbm [thread:$0]  (%p4166_p3), %s3236_s29, 32768, %s3238_s14, %s3223_s22, %s4049_s17, %s4049_s17, %s4050_s9  }
 0x701 PF: > { %s3252_s15 = sand.u32 1, %s4030_s18   ;;  %p6226_p12 = scmp.ge.s32.totalorder %s4042_s21, 2 }
 0x702   : > { %s3253_s13 = scalar_lea.sflag [#allocation4], %s3252_s15 }
 0x703   : > { %p3408_p13 = pnand %p6226_p12, %p4116_p6 }
 0x705   : > { %p3409_p0 = pneg %p3408_p13 }
 0x707   : > { %4025 = dma.done.wait (%p3409_p0), %s3253_s13, 32768  }
 0x708   : > { %4027 = vsyncadd (%p3409_p0), %s3253_s13, 4294934528  ;;  %p20_p5 = scmp.ge.s32.totalorder %s4153_s27, 4   ;;  %s6227_s18 = smov %s4034_s19 }
 0x709   : > { %s6228_s19 = smov %s4038_s20  ;;  %s6229_s20 = smov %s4162_s6 }
 0x70a   : > { %s6230_s21 = smov %s4153_s27  ;;  %22 = sbr.rel (!%p20_p5) target bundleno = 7 (0x7), region = 97 }
 0x70f   :  { %3259 = vsyncpa [#allocation3], 1 }
 0x710   :  { %3261 = vsyncpa [#allocation3 + $0x1], 1 }
 0x711   :  { %3262 = vsyncpa [#allocation6], 1 }
 0x712   :  { %3263 = vsyncpa [#allocation9], 1 }
 0x713   :  { %3264 = vsyncpa [#allocation4], 1 }
 0x714   :  { %3266 = vsyncpa [#allocation4 + $0x1], 1 }

</bundles_post_ra>
